<compile_context>
chip_gen: v7x
topology: tpu7x:2x2x1
jax: 0.10.0
libtpu: 0.0.40
codegen_flags: <defaults>
</compile_context>

<pallas_src>
import math

import jax
import jax.numpy as jnp
from jax.experimental import pallas as pl
from jax.experimental.pallas import tpu as pltpu

# ----------------------------- hyperparameters --------------------------------
B = 2                 # batch
T = 8                 # frames (frame-rate sequence length)
H = 32                # hidden_size
N_HARMONIC = 8        # n_harmonic
N_BANDS = 8           # n_bands
SAMPLING_RATE = 64    # sampling_rate
BLOCK_SIZE = 16       # block_size
N = T * BLOCK_SIZE    # audio samples = 128 == lane width
BT = B * T            # 16 frame-rate rows, (t, b) ordered
REVERB_LEN = SAMPLING_RATE
LOG10 = math.log(10.0)
EPS_LN = 1e-5
LANES = 128


# ----------------------- packed parameter slab layout --------------------------
def _build_layout():
    pieces = [
        ("exp_w", 4),                        # Linear(1,H) folded into 4x128 expansion
        ("ib0", 1), ("ig0", 1), ("ibe0", 1),
        ("w1", 4 * H),                       # block-diag iw1 (128x128)
        ("ib1", 1), ("ig1", 1), ("ibe1", 1),
        ("w2", 4 * H),                       # block-diag iw2
        ("ib2", 1), ("ig2", 1), ("ibe2", 1),
        ("avg", 4 * H),                      # block-diag group-mean matrix (1/32 blocks)
        ("gwih", 4 * H), ("gwhh", H), ("gbih", 1), ("gbhh", 1),
        ("ow0", H), ("ow0x", 4),
        ("ob0", 1), ("og0", 1), ("obe0", 1),
        ("ow1", H), ("ob1", 1), ("og1", 1), ("obe1", 1),
        ("ow2", H), ("ob2", 1), ("og2", 1), ("obe2", 1),
        ("projw", H), ("projb", 1),
        ("omega", T),                        # (T, N) upsample+cumsum operator (pre-scaled)
        ("krep", B * N_HARMONIC),            # harmonic-index columns per batch
        ("ampmask", BT),                     # batch placement mask (BT, B*NH)
        ("sel0", BT), ("sel1", BT),          # per-batch frame-selection masks (BT, N)
    ]
    off, o = {}, 0
    for name, n in pieces:
        o = (o + 7) // 8 * 8                 # sublane-tile aligned pieces
        off[name] = (o, n)
        o += n
    return off, (o + 7) // 8 * 8


P_OFF, P_ROWS = _build_layout()

# runtime slab rows
RT_COND = 0                                  # rows 0:16  -> cond (BT, 4) in lanes 0:4
RT_PITCH = BT                                # rows 16:18 -> pitch (B, T) in lanes 0:8
RT_ROWS = (BT + B + 7) // 8 * 8

# output slab rows
OUT_BAND = 0                                 # rows 0:16  -> full-width band projection
OUT_HARM = BT                                # rows 16:18 -> harmonic audio (B, N)
OUT_ROWS = BT + B


# ------------------------------- kernel helpers --------------------------------
def _scale_fn(x):
    # 2 * sigmoid(x) ** log(10) + 1e-7, via log-sigmoid so large |x| stays finite.
    log_sig = jnp.minimum(x, 0.0) - jnp.log(1.0 + jnp.exp(-jnp.abs(x)))
    return 2.0 * jnp.exp(LOG10 * log_sig) + 1e-7


# ----------------------------- fused Pallas kernel ------------------------------
def ddsp_kernel(rt_ref, pp_ref, out_ref, gru_scr):
    f32 = jnp.float32

    def P(name, lanes=LANES):
        o, n = P_OFF[name]
        return pp_ref[o:o + n, 0:lanes]

    cond = rt_ref[RT_COND:RT_COND + BT, 0:4]            # (16, 4)  [pitch|p1|p2|p3]
    pitch_bt = rt_ref[RT_PITCH:RT_PITCH + B, 0:T]       # (2, 8)
    pitch_c = cond[:, 0:1]

    # ---- shared in_mlp, lane-dense: activations (BT, 4H = 128) ----
    avg = P("avg")

    def group_ln_lrelu(h, g, b):
        # LayerNorm over each 32-lane group; reductions done on the MXU.
        mu = jnp.dot(h, avg, preferred_element_type=f32)
        d = h - mu
        var = jnp.dot(d * d, avg, preferred_element_type=f32)
        y = d * jax.lax.rsqrt(var + EPS_LN) * g + b
        return jnp.where(y >= 0, y, 0.01 * y)

    expw = P("exp_w")                                    # (4, 128), iw0 on block-diag
    h = (cond[:, 0:1] * expw[0:1, :] + cond[:, 1:2] * expw[1:2, :]
         + cond[:, 2:3] * expw[2:3, :] + cond[:, 3:4] * expw[3:4, :] + P("ib0"))
    h = group_ln_lrelu(h, P("ig0"), P("ibe0"))
    h = jnp.dot(h, P("w1"), preferred_element_type=f32) + P("ib1")
    h = group_ln_lrelu(h, P("ig1"), P("ibe1"))
    h = jnp.dot(h, P("w2"), preferred_element_type=f32) + P("ib2")
    f_all = group_ln_lrelu(h, P("ig2"), P("ibe2"))       # == cat of the 4 mlp outputs

    # ---- GRU (batched over B, rows (t, b)-ordered). One big input matmul. ----
    gi = (jnp.dot(f_all, P("gwih", 3 * H), preferred_element_type=f32)
          + P("gbih", 3 * H))                            # (BT, 3H)
    gwhh = P("gwhh", 3 * H)
    gbhh = P("gbhh", 3 * H)
    hstate = jnp.zeros((B, H), f32)
    # NOTE: W_hh stays a plain jnp.dot; Mosaic keeps it VMEM-resident across the
    # 8 unrolled steps (explicit matmul_push_rhs left as a follow-up).
    for t in range(T):                                   # static unroll, T = 8
        gh = jnp.dot(hstate, gwhh, preferred_element_type=f32) + gbhh
        gi_t = gi[t * B:(t + 1) * B, :]
        r = jax.nn.sigmoid(gi_t[:, 0:H] + gh[:, 0:H])
        z = jax.nn.sigmoid(gi_t[:, H:2 * H] + gh[:, H:2 * H])
        n = jnp.tanh(gi_t[:, 2 * H:3 * H] + r * gh[:, 2 * H:3 * H])
        hstate = (1.0 - z) * n + z * hstate
        gru_scr[t * B:(t + 1) * B, :] = hstate           # no sublane concat needed
    gru_out = gru_scr[...]                               # (BT, H)

    # ---- out_mlp: Linear(H+4, H) concat-free (rank-1 extra input columns) ----
    def ln_lrelu(hh, g, b):
        mu = jnp.mean(hh, axis=-1, keepdims=True)
        var = jnp.mean((hh - mu) ** 2, axis=-1, keepdims=True)
        y = (hh - mu) * jax.lax.rsqrt(var + EPS_LN) * g + b
        return jnp.where(y >= 0, y, 0.01 * y)

    ow0x = P("ow0x", H)                                  # (4, H) extra-input rows
    hb = (jnp.dot(gru_out, P("ow0", H), preferred_element_type=f32)
          + pitch_c * ow0x[0:1, :] + cond[:, 1:2] * ow0x[1:2, :]
          + cond[:, 2:3] * ow0x[2:3, :] + cond[:, 3:4] * ow0x[3:4, :]
          + P("ob0", H))
    hb = ln_lrelu(hb, P("og0", H), P("obe0", H))
    hb = jnp.dot(hb, P("ow1", H), preferred_element_type=f32) + P("ob1", H)
    hb = ln_lrelu(hb, P("og1", H), P("obe1", H))
    hb = jnp.dot(hb, P("ow2", H), preferred_element_type=f32) + P("ob2", H)
    hb = ln_lrelu(hb, P("og2", H), P("obe2", H))         # (BT, H)

    # ---- fused projections at full lane width (lanes >= 17 carry zero weights)
    pr = jnp.dot(hb, P("projw"), preferred_element_type=f32) + P("projb")   # (BT,128)

    # noise-band output: single unmasked (16, 128) store, wrapper slices lanes 9:17
    out_ref[OUT_BAND:OUT_BAND + BT, :] = _scale_fn(pr - 5.0)

    # ---- harmonic amplitudes + nyquist mask + normalisation ----
    s_h = _scale_fn(pr[:, 0:N_HARMONIC + 1])
    total_amp = s_h[:, 0:1]
    amps = s_h[:, 1:N_HARMONIC + 1]                      # (BT, NH)
    kh = (jax.lax.broadcasted_iota(jnp.int32, (BT, N_HARMONIC), 1) + 1).astype(f32)
    aa = jnp.where(pitch_c * kh < SAMPLING_RATE / 2.0, 1.0, 0.0) + 1e-4
    amps = amps * aa
    denom = jnp.sum(amps, axis=-1, keepdims=True)
    amps = amps * pl.reciprocal(denom, approx=True) * total_amp   # (BT, NH)

    # ---- fused upsample + phase-cumsum + additive synth (both batches at once)
    omega = jnp.dot(pitch_bt, P("omega"), preferred_element_type=f32)       # (B, N)
    krep = P("krep", B)                                  # (B*NH, B) harmonic indices
    arg = krep[:, 0:1] * omega[0:1, :] + krep[:, 1:2] * omega[1:2, :]       # (B*NH, N)
    s_tab = jnp.sin(arg)                                                    # (B*NH, N)
    a_mat = P("ampmask", B * N_HARMONIC) * jnp.concatenate([amps, amps], axis=1)
    m = jnp.dot(a_mat, s_tab, preferred_element_type=f32)                   # (BT, N)
    harm0 = jnp.sum(m * P("sel0"), axis=0, keepdims=True)
    harm1 = jnp.sum(m * P("sel1"), axis=0, keepdims=True)
    out_ref[OUT_HARM:OUT_HARM + B, :] = jnp.concatenate([harm0, harm1], axis=0)


def run_frame_synth(rt_slab, param_slab):
    return pl.pallas_call(
        ddsp_kernel,
        out_shape=jax.ShapeDtypeStruct((OUT_ROWS, LANES), jnp.float32),
        in_specs=[pl.BlockSpec(memory_space=pltpu.MemorySpace.VMEM),
                  pl.BlockSpec(memory_space=pltpu.MemorySpace.VMEM)],
        out_specs=pl.BlockSpec(memory_space=pltpu.MemorySpace.VMEM),
        scratch_shapes=[pltpu.VMEM((BT, H), jnp.float32)],
    )(rt_slab, param_slab)


# --------------------------------- JAX glue -------------------------------------
def fft_convolve(signal, kernel):
    # TODO(synk): FFT has no Pallas equivalent; plain jnp.fft (matches torch ref).
    ls, lk = signal.shape[-1], kernel.shape[-1]
    s = jnp.pad(signal, [(0, 0)] * (signal.ndim - 1) + [(0, ls)])
    k = jnp.pad(kernel, [(0, 0)] * (kernel.ndim - 1) + [(lk, 0)])
    out = jnp.fft.irfft(jnp.fft.rfft(s) * jnp.fft.rfft(k))
    return out[..., out.shape[-1] // 2:]


def amp_to_impulse_response(amp, target_size):
    ir = jnp.fft.irfft(amp.astype(jnp.complex64))
    filter_size = ir.shape[-1]
    ir = jnp.roll(ir, filter_size // 2, axis=-1)
    win = 0.5 * (1.0 - jnp.cos(2.0 * jnp.pi * jnp.arange(filter_size) / filter_size))
    ir = ir * win.astype(ir.dtype)
    ir = jnp.pad(ir, [(0, 0)] * (ir.ndim - 1) + [(0, int(target_size) - filter_size)])
    ir = jnp.roll(ir, -(filter_size // 2), axis=-1)
    return ir


def reverb_apply(x, rev_noise, decay, wet):
    lenx = x.shape[1]
    t = (jnp.arange(REVERB_LEN, dtype=jnp.float32) / SAMPLING_RATE).reshape(1, -1, 1)
    dec = jnp.exp(-jax.nn.softplus(-decay) * t * 500.0)
    impulse = rev_noise[None] * dec * jax.nn.sigmoid(wet)     # (1, L, 1)
    impulse = impulse.at[:, 0].set(1.0)
    impulse = jnp.pad(impulse, ((0, 0), (0, lenx - REVERB_LEN), (0, 0)))
    return fft_convolve(x[..., 0], impulse[..., 0])[..., None]


def pack_runtime_slab(pitch, p1, p2, p3):
    def tb(sig):                         # (B, T, 1) -> (BT, 1) in (t, b) row order
        return jnp.transpose(sig[..., 0], (1, 0)).reshape(BT, 1)

    cond = jnp.concatenate([tb(pitch), tb(p1), tb(p2), tb(p3)], axis=1)     # (BT, 4)
    slab = jnp.zeros((RT_ROWS, LANES), jnp.float32)
    slab = slab.at[RT_COND:RT_COND + BT, 0:4].set(cond)
    slab = slab.at[RT_PITCH:RT_PITCH + B, 0:T].set(pitch[..., 0])
    return slab


def ddsp_forward(pitch, param, param2, param3, param_slab, rev_noise, noise_key):
    rt_slab = pack_runtime_slab(pitch, param, param2, param3)
    out = run_frame_synth(rt_slab, param_slab)

    harmonic = out[OUT_HARM:OUT_HARM + B, :][..., None]                     # (B, N, 1)
    band_tb = out[OUT_BAND:OUT_BAND + BT,
                  N_HARMONIC + 1:N_HARMONIC + 1 + N_BANDS]                  # (BT, NB)
    bands = jnp.transpose(band_tb.reshape(T, B, N_BANDS), (1, 0, 2))        # (B, T, NB)

    impulse = amp_to_impulse_response(bands, BLOCK_SIZE)                    # (B,T,block)
    noise = jax.random.uniform(noise_key, (B, T, BLOCK_SIZE), jnp.float32) * 2.0 - 1.0
    noise = fft_convolve(noise, impulse).reshape(B, -1, 1)                  # (B, N, 1)

    signal = harmonic + noise
    signal = reverb_apply(signal, rev_noise, 4.5, 0.0)                      # decay, wet
    return signal


ddsp_forward_jit = jax.jit(ddsp_forward)


# ----------------------- parameter init / host-side packing ---------------------
def init_params(key):
    ks = iter(jax.random.split(key, 40))
    nrm = lambda shape, s=0.2: jax.random.normal(next(ks), shape, jnp.float32) * s
    ones = lambda shape: jnp.ones(shape, jnp.float32)
    zeros = lambda shape: jnp.zeros(shape, jnp.float32)

    p = {}
    # shared in_mlp(1, H, 3)  (ModuleList([mlp(1,H,3)]*4) aliases ONE module)
    p["iw0"], p["ib0"], p["ig0"], p["ibe0"] = nrm((1, H)), nrm((1, H), 0.05), ones((1, H)), zeros((1, H))
    p["iw1"], p["ib1"], p["ig1"], p["ibe1"] = nrm((H, H)), nrm((1, H), 0.05), ones((1, H)), zeros((1, H))
    p["iw2"], p["ib2"], p["ig2"], p["ibe2"] = nrm((H, H)), nrm((1, H), 0.05), ones((1, H)), zeros((1, H))
    # GRU(4H -> H): W_ih^T (4H,3H), W_hh^T (H,3H), gate order [r|z|n]
    p["gwih"] = nrm((4 * H, 3 * H)); p["gwhh"] = nrm((H, 3 * H))
    p["gbih"] = nrm((1, 3 * H), 0.05); p["gbhh"] = nrm((1, 3 * H), 0.05)
    # out_mlp(H+4, H, 3); ow0 input order = [gru_out | pitch | p1 | p2 | p3]
    p["ow0"], p["ob0"], p["og0"], p["obe0"] = nrm((H + 4, H)), nrm((1, H), 0.05), ones((1, H)), zeros((1, H))
    p["ow1"], p["ob1"], p["og1"], p["obe1"] = nrm((H, H)), nrm((1, H), 0.05), ones((1, H)), zeros((1, H))
    p["ow2"], p["ob2"], p["og2"], p["obe2"] = nrm((H, H)), nrm((1, H), 0.05), ones((1, H)), zeros((1, H))
    # proj_matrices: Linear(H, n_harm+1), Linear(H, n_bands)
    p["p0w"] = nrm((H, N_HARMONIC + 1)); p["p0b"] = nrm((1, N_HARMONIC + 1), 0.05)
    p["p1w"] = nrm((H, N_BANDS)); p["p1b"] = nrm((1, N_BANDS), 0.05)
    return p


def _static_constants():
    n_idx = jnp.arange(N, dtype=jnp.float32)
    t_idx = jnp.arange(T, dtype=jnp.float32)
    cnt = jnp.clip(n_idx[None, :] - t_idx[:, None] * BLOCK_SIZE + 1.0,
                   0.0, float(BLOCK_SIZE))
    omega_mat = (2.0 * math.pi / SAMPLING_RATE) * cnt                       # (T, N)

    k = jnp.arange(1, N_HARMONIC + 1, dtype=jnp.float32)
    krep = jnp.zeros((B * N_HARMONIC, B), jnp.float32)
    krep = krep.at[0:N_HARMONIC, 0].set(k)
    krep = krep.at[N_HARMONIC:, 1].set(k)                                   # (B*NH, B)

    r = jnp.arange(BT)
    c = jnp.arange(B * N_HARMONIC)
    ampmask = ((c[None, :] // N_HARMONIC) == (r[:, None] % B)).astype(jnp.float32)

    frame = jnp.arange(N) // BLOCK_SIZE
    sel0 = (r[:, None] == frame[None, :] * B + 0).astype(jnp.float32)       # (BT, N)
    sel1 = (r[:, None] == frame[None, :] * B + 1).astype(jnp.float32)
    return omega_mat, krep, ampmask, sel0, sel1


def pack_param_slab(p):
    eye4 = jnp.eye(4, dtype=jnp.float32)
    omega_mat, krep, ampmask, sel0, sel1 = _static_constants()
    rep4 = lambda v: jnp.tile(v, (1, 4))
    pieces = {
        "exp_w": jnp.kron(eye4, p["iw0"]),                # (4, 128)
        "ib0": rep4(p["ib0"]), "ig0": rep4(p["ig0"]), "ibe0": rep4(p["ibe0"]),
        "w1": jnp.kron(eye4, p["iw1"]),                   # (128, 128) block-diag
        "ib1": rep4(p["ib1"]), "ig1": rep4(p["ig1"]), "ibe1": rep4(p["ibe1"]),
        "w2": jnp.kron(eye4, p["iw2"]),
        "ib2": rep4(p["ib2"]), "ig2": rep4(p["ig2"]), "ibe2": rep4(p["ibe2"]),
        "avg": jnp.kron(eye4, jnp.full((H, H), 1.0 / H, jnp.float32)),
        "gwih": p["gwih"], "gwhh": p["gwhh"], "gbih": p["gbih"], "gbhh": p["gbhh"],
        "ow0": p["ow0"][:H], "ow0x": p["ow0"][H:H + 4],
        "ob0": p["ob0"], "og0": p["og0"], "obe0": p["obe0"],
        "ow1": p["ow1"], "ob1": p["ob1"], "og1": p["og1"], "obe1": p["obe1"],
        "ow2": p["ow2"], "ob2": p["ob2"], "og2": p["og2"], "obe2": p["obe2"],
        "projw": jnp.concatenate([p["p0w"], p["p1w"]], axis=1),
        "projb": jnp.concatenate([p["p0b"], p["p1b"]], axis=1),
        "omega": omega_mat, "krep": krep, "ampmask": ampmask,
        "sel0": sel0, "sel1": sel1,
    }
    slab = jnp.zeros((P_ROWS, LANES), jnp.float32)
    for name, (o, n) in P_OFF.items():
        a = jnp.asarray(pieces[name], jnp.float32)
        assert a.shape[0] == n, (name, a.shape)
        slab = slab.at[o:o + n, 0:a.shape[1]].set(a)
    return slab


# ------------------------------------ main ---------------------------------------
if __name__ == "__main__":
    key = jax.random.PRNGKey(0)
    k_par, k_pitch, k_p1, k_p2, k_p3, k_rev, k_noise = jax.random.split(key, 7)

    param_slab = pack_param_slab(init_params(k_par))
    pitch = jax.random.uniform(k_pitch, (B, T, 1), jnp.float32, 20.0, 40.0)
    param = jax.random.normal(k_p1, (B, T, 1), jnp.float32)
    param2 = jax.random.normal(k_p2, (B, T, 1), jnp.float32)
    param3 = jax.random.normal(k_p3, (B, T, 1), jnp.float32)
    rev_noise = jax.random.uniform(k_rev, (REVERB_LEN, 1), jnp.float32) * 2.0 - 1.0

    out = ddsp_forward_jit(pitch, param, param2, param3, param_slab, rev_noise, k_noise)
    out = jax.block_until_ready(out)
    assert out.shape == (B, N, 1), out.shape
    assert bool(jnp.all(jnp.isfinite(out)))
    print("KERNEL_OK")
</pallas_src>

<mosaic_0001>
module attributes {stable_mosaic.version = 11 : i64} {
  func.func @ddsp_kernel(%arg0: memref<24x128xf32, #tpu.memory_space<vmem>>, %arg1: memref<928x128xf32, #tpu.memory_space<vmem>>, %arg2: memref<18x128xf32, #tpu.memory_space<vmem>>, %arg3: memref<16x32xf32, #tpu.memory_space<vmem>>) attributes {dimension_semantics = [], scalar_prefetch = 0 : i64, scratch_operands = 1 : i64, tpu.core_type = #tpu.core_type<tc>} {
    %c0 = arith.constant 0 : index
    %c0_0 = arith.constant 0 : index
    %0 = vector.load %arg0[%c0, %c0_0] : memref<24x128xf32, #tpu.memory_space<vmem>>, vector<16x4xf32>
    %c16 = arith.constant 16 : index
    %c0_1 = arith.constant 0 : index
    %1 = vector.load %arg0[%c16, %c0_1] : memref<24x128xf32, #tpu.memory_space<vmem>>, vector<2x8xf32>
    %2 = vector.extract_strided_slice %0 {offsets = [0, 0], sizes = [16, 1], strides = [1, 1]} : vector<16x4xf32> to vector<16x1xf32>
    %c336 = arith.constant 336 : index
    %c0_2 = arith.constant 0 : index
    %3 = vector.load %arg1[%c336, %c0_2] : memref<928x128xf32, #tpu.memory_space<vmem>>, vector<128x128xf32>
    %c0_3 = arith.constant 0 : index
    %c0_4 = arith.constant 0 : index
    %4 = vector.load %arg1[%c0_3, %c0_4] : memref<928x128xf32, #tpu.memory_space<vmem>>, vector<4x128xf32>
    %5 = vector.extract_strided_slice %0 {offsets = [0, 0], sizes = [16, 1], strides = [1, 1]} : vector<16x4xf32> to vector<16x1xf32>
    %6 = vector.extract_strided_slice %4 {offsets = [0, 0], sizes = [1, 128], strides = [1, 1]} : vector<4x128xf32> to vector<1x128xf32>
    %7 = vector.broadcast %5 : vector<16x1xf32> to vector<16x128xf32>
    %8 = vector.broadcast %6 : vector<1x128xf32> to vector<16x128xf32>
    %9 = arith.mulf %7, %8 : vector<16x128xf32>
    %10 = vector.extract_strided_slice %0 {offsets = [0, 1], sizes = [16, 1], strides = [1, 1]} : vector<16x4xf32> to vector<16x1xf32>
    %11 = vector.extract_strided_slice %4 {offsets = [1, 0], sizes = [1, 128], strides = [1, 1]} : vector<4x128xf32> to vector<1x128xf32>
    %12 = vector.broadcast %10 : vector<16x1xf32> to vector<16x128xf32>
    %13 = vector.broadcast %11 : vector<1x128xf32> to vector<16x128xf32>
    %14 = arith.mulf %12, %13 : vector<16x128xf32>
    %15 = arith.addf %9, %14 : vector<16x128xf32>
    %16 = vector.extract_strided_slice %0 {offsets = [0, 2], sizes = [16, 1], strides = [1, 1]} : vector<16x4xf32> to vector<16x1xf32>
    %17 = vector.extract_strided_slice %4 {offsets = [2, 0], sizes = [1, 128], strides = [1, 1]} : vector<4x128xf32> to vector<1x128xf32>
    %18 = vector.broadcast %16 : vector<16x1xf32> to vector<16x128xf32>
    %19 = vector.broadcast %17 : vector<1x128xf32> to vector<16x128xf32>
    %20 = arith.mulf %18, %19 : vector<16x128xf32>
    %21 = arith.addf %15, %20 : vector<16x128xf32>
    %22 = vector.extract_strided_slice %0 {offsets = [0, 3], sizes = [16, 1], strides = [1, 1]} : vector<16x4xf32> to vector<16x1xf32>
    %23 = vector.extract_strided_slice %4 {offsets = [3, 0], sizes = [1, 128], strides = [1, 1]} : vector<4x128xf32> to vector<1x128xf32>
    %24 = vector.broadcast %22 : vector<16x1xf32> to vector<16x128xf32>
    %25 = vector.broadcast %23 : vector<1x128xf32> to vector<16x128xf32>
    %26 = arith.mulf %24, %25 : vector<16x128xf32>
    %27 = arith.addf %21, %26 : vector<16x128xf32>
    %c8 = arith.constant 8 : index
    %c0_5 = arith.constant 0 : index
    %28 = vector.load %arg1[%c8, %c0_5] : memref<928x128xf32, #tpu.memory_space<vmem>>, vector<1x128xf32>
    %29 = vector.broadcast %28 : vector<1x128xf32> to vector<16x128xf32>
    %30 = arith.addf %27, %29 : vector<16x128xf32>
    %c16_6 = arith.constant 16 : index
    %c0_7 = arith.constant 0 : index
    %31 = vector.load %arg1[%c16_6, %c0_7] : memref<928x128xf32, #tpu.memory_space<vmem>>, vector<1x128xf32>
    %c24 = arith.constant 24 : index
    %c0_8 = arith.constant 0 : index
    %32 = vector.load %arg1[%c24, %c0_8] : memref<928x128xf32, #tpu.memory_space<vmem>>, vector<1x128xf32>
    %cst = arith.constant dense<0.000000e+00> : vector<16x128xf32>
    %33 = tpu.matmul %30, %3, %cst {dimension_numbers = #tpu.dot_dimension_numbers<[1], [0], [0], [1], [0, 0, 1, 1], [], []>} : vector<16x128xf32>, vector<128x128xf32>, vector<16x128xf32> -> vector<16x128xf32>
    %34 = arith.subf %30, %33 : vector<16x128xf32>
    %35 = arith.mulf %34, %34 : vector<16x128xf32>
    %cst_9 = arith.constant dense<0.000000e+00> : vector<16x128xf32>
    %36 = tpu.matmul %35, %3, %cst_9 {dimension_numbers = #tpu.dot_dimension_numbers<[1], [0], [0], [1], [0, 0, 1, 1], [], []>} : vector<16x128xf32>, vector<128x128xf32>, vector<16x128xf32> -> vector<16x128xf32>
    %cst_10 = arith.constant 9.99999974E-6 : f32
    %37 = vector.broadcast %cst_10 : f32 to vector<16x128xf32>
    %38 = arith.addf %36, %37 : vector<16x128xf32>
    %39 = math.rsqrt %38 : vector<16x128xf32>
    %40 = arith.mulf %34, %39 : vector<16x128xf32>
    %41 = vector.broadcast %31 : vector<1x128xf32> to vector<16x128xf32>
    %42 = arith.mulf %40, %41 : vector<16x128xf32>
    %43 = vector.broadcast %32 : vector<1x128xf32> to vector<16x128xf32>
    %44 = arith.addf %42, %43 : vector<16x128xf32>
    %cst_11 = arith.constant 0.000000e+00 : f32
    %45 = vector.broadcast %cst_11 : f32 to vector<16x128xf32>
    %46 = arith.cmpf oge, %44, %45 : vector<16x128xf32>
    %cst_12 = arith.constant 0.00999999977 : f32
    %47 = vector.broadcast %cst_12 : f32 to vector<16x128xf32>
    %48 = arith.mulf %47, %44 : vector<16x128xf32>
    %49 = arith.select %46, %44, %48 : vector<16x128xi1>, vector<16x128xf32>
    %c32 = arith.constant 32 : index
    %c0_13 = arith.constant 0 : index
    %50 = vector.load %arg1[%c32, %c0_13] : memref<928x128xf32, #tpu.memory_space<vmem>>, vector<128x128xf32>
    %cst_14 = arith.constant dense<0.000000e+00> : vector<16x128xf32>
    %51 = tpu.matmul %49, %50, %cst_14 {dimension_numbers = #tpu.dot_dimension_numbers<[1], [0], [0], [1], [0, 0, 1, 1], [], []>} : vector<16x128xf32>, vector<128x128xf32>, vector<16x128xf32> -> vector<16x128xf32>
    %c160 = arith.constant 160 : index
    %c0_15 = arith.constant 0 : index
    %52 = vector.load %arg1[%c160, %c0_15] : memref<928x128xf32, #tpu.memory_space<vmem>>, vector<1x128xf32>
    %53 = vector.broadcast %52 : vector<1x128xf32> to vector<16x128xf32>
    %54 = arith.addf %51, %53 : vector<16x128xf32>
    %c168 = arith.constant 168 : index
    %c0_16 = arith.constant 0 : index
    %55 = vector.load %arg1[%c168, %c0_16] : memref<928x128xf32, #tpu.memory_space<vmem>>, vector<1x128xf32>
    %c176 = arith.constant 176 : index
    %c0_17 = arith.constant 0 : index
    %56 = vector.load %arg1[%c176, %c0_17] : memref<928x128xf32, #tpu.memory_space<vmem>>, vector<1x128xf32>
    %cst_18 = arith.constant dense<0.000000e+00> : vector<16x128xf32>
    %57 = tpu.matmul %54, %3, %cst_18 {dimension_numbers = #tpu.dot_dimension_numbers<[1], [0], [0], [1], [0, 0, 1, 1], [], []>} : vector<16x128xf32>, vector<128x128xf32>, vector<16x128xf32> -> vector<16x128xf32>
    %58 = arith.subf %54, %57 : vector<16x128xf32>
    %59 = arith.mulf %58, %58 : vector<16x128xf32>
    %cst_19 = arith.constant dense<0.000000e+00> : vector<16x128xf32>
    %60 = tpu.matmul %59, %3, %cst_19 {dimension_numbers = #tpu.dot_dimension_numbers<[1], [0], [0], [1], [0, 0, 1, 1], [], []>} : vector<16x128xf32>, vector<128x128xf32>, vector<16x128xf32> -> vector<16x128xf32>
    %cst_20 = arith.constant 9.99999974E-6 : f32
    %61 = vector.broadcast %cst_20 : f32 to vector<16x128xf32>
    %62 = arith.addf %60, %61 : vector<16x128xf32>
    %63 = math.rsqrt %62 : vector<16x128xf32>
    %64 = arith.mulf %58, %63 : vector<16x128xf32>
    %65 = vector.broadcast %55 : vector<1x128xf32> to vector<16x128xf32>
    %66 = arith.mulf %64, %65 : vector<16x128xf32>
    %67 = vector.broadcast %56 : vector<1x128xf32> to vector<16x128xf32>
    %68 = arith.addf %66, %67 : vector<16x128xf32>
    %cst_21 = arith.constant 0.000000e+00 : f32
    %69 = vector.broadcast %cst_21 : f32 to vector<16x128xf32>
    %70 = arith.cmpf oge, %68, %69 : vector<16x128xf32>
    %cst_22 = arith.constant 0.00999999977 : f32
    %71 = vector.broadcast %cst_22 : f32 to vector<16x128xf32>
    %72 = arith.mulf %71, %68 : vector<16x128xf32>
    %73 = arith.select %70, %68, %72 : vector<16x128xi1>, vector<16x128xf32>
    %c184 = arith.constant 184 : index
    %c0_23 = arith.constant 0 : index
    %74 = vector.load %arg1[%c184, %c0_23] : memref<928x128xf32, #tpu.memory_space<vmem>>, vector<128x128xf32>
    %cst_24 = arith.constant dense<0.000000e+00> : vector<16x128xf32>
    %75 = tpu.matmul %73, %74, %cst_24 {dimension_numbers = #tpu.dot_dimension_numbers<[1], [0], [0], [1], [0, 0, 1, 1], [], []>} : vector<16x128xf32>, vector<128x128xf32>, vector<16x128xf32> -> vector<16x128xf32>
    %c312 = arith.constant 312 : index
    %c0_25 = arith.constant 0 : index
    %76 = vector.load %arg1[%c312, %c0_25] : memref<928x128xf32, #tpu.memory_space<vmem>>, vector<1x128xf32>
    %77 = vector.broadcast %76 : vector<1x128xf32> to vector<16x128xf32>
    %78 = arith.addf %75, %77 : vector<16x128xf32>
    %c320 = arith.constant 320 : index
    %c0_26 = arith.constant 0 : index
    %79 = vector.load %arg1[%c320, %c0_26] : memref<928x128xf32, #tpu.memory_space<vmem>>, vector<1x128xf32>
    %c328 = arith.constant 328 : index
    %c0_27 = arith.constant 0 : index
    %80 = vector.load %arg1[%c328, %c0_27] : memref<928x128xf32, #tpu.memory_space<vmem>>, vector<1x128xf32>
    %cst_28 = arith.constant dense<0.000000e+00> : vector<16x128xf32>
    %81 = tpu.matmul %78, %3, %cst_28 {dimension_numbers = #tpu.dot_dimension_numbers<[1], [0], [0], [1], [0, 0, 1, 1], [], []>} : vector<16x128xf32>, vector<128x128xf32>, vector<16x128xf32> -> vector<16x128xf32>
    %82 = arith.subf %78, %81 : vector<16x128xf32>
    %83 = arith.mulf %82, %82 : vector<16x128xf32>
    %cst_29 = arith.constant dense<0.000000e+00> : vector<16x128xf32>
    %84 = tpu.matmul %83, %3, %cst_29 {dimension_numbers = #tpu.dot_dimension_numbers<[1], [0], [0], [1], [0, 0, 1, 1], [], []>} : vector<16x128xf32>, vector<128x128xf32>, vector<16x128xf32> -> vector<16x128xf32>
    %cst_30 = arith.constant 9.99999974E-6 : f32
    %85 = vector.broadcast %cst_30 : f32 to vector<16x128xf32>
    %86 = arith.addf %84, %85 : vector<16x128xf32>
    %87 = math.rsqrt %86 : vector<16x128xf32>
    %88 = arith.mulf %82, %87 : vector<16x128xf32>
    %89 = vector.broadcast %79 : vector<1x128xf32> to vector<16x128xf32>
    %90 = arith.mulf %88, %89 : vector<16x128xf32>
    %91 = vector.broadcast %80 : vector<1x128xf32> to vector<16x128xf32>
    %92 = arith.addf %90, %91 : vector<16x128xf32>
    %cst_31 = arith.constant 0.000000e+00 : f32
    %93 = vector.broadcast %cst_31 : f32 to vector<16x128xf32>
    %94 = arith.cmpf oge, %92, %93 : vector<16x128xf32>
    %cst_32 = arith.constant 0.00999999977 : f32
    %95 = vector.broadcast %cst_32 : f32 to vector<16x128xf32>
    %96 = arith.mulf %95, %92 : vector<16x128xf32>
    %97 = arith.select %94, %92, %96 : vector<16x128xi1>, vector<16x128xf32>
    %c464 = arith.constant 464 : index
    %c0_33 = arith.constant 0 : index
    %98 = vector.load %arg1[%c464, %c0_33] : memref<928x128xf32, #tpu.memory_space<vmem>>, vector<128x96xf32>
    %cst_34 = arith.constant dense<0.000000e+00> : vector<16x96xf32>
    %99 = tpu.matmul %97, %98, %cst_34 {dimension_numbers = #tpu.dot_dimension_numbers<[1], [0], [0], [1], [0, 0, 1, 1], [], []>} : vector<16x128xf32>, vector<128x96xf32>, vector<16x96xf32> -> vector<16x96xf32>
    %c624 = arith.constant 624 : index
    %c0_35 = arith.constant 0 : index
    %100 = vector.load %arg1[%c624, %c0_35] : memref<928x128xf32, #tpu.memory_space<vmem>>, vector<1x96xf32>
    %101 = vector.broadcast %100 : vector<1x96xf32> to vector<16x96xf32>
    %102 = arith.addf %99, %101 : vector<16x96xf32>
    %c592 = arith.constant 592 : index
    %c0_36 = arith.constant 0 : index
    %103 = vector.load %arg1[%c592, %c0_36] : memref<928x128xf32, #tpu.memory_space<vmem>>, vector<32x96xf32>
    %c632 = arith.constant 632 : index
    %c0_37 = arith.constant 0 : index
    %104 = vector.load %arg1[%c632, %c0_37] : memref<928x128xf32, #tpu.memory_space<vmem>>, vector<1x96xf32>
    %cst_38 = arith.constant 0.000000e+00 : f32
    %105 = vector.broadcast %cst_38 : f32 to vector<2x32xf32>
    %cst_39 = arith.constant dense<0.000000e+00> : vector<2x96xf32>
    %106 = tpu.matmul %105, %103, %cst_39 {dimension_numbers = #tpu.dot_dimension_numbers<[1], [0], [0], [1], [0, 0, 1, 1], [], []>} : vector<2x32xf32>, vector<32x96xf32>, vector<2x96xf32> -> vector<2x96xf32>
    %107 = vector.broadcast %104 : vector<1x96xf32> to vector<2x96xf32>
    %108 = arith.addf %106, %107 : vector<2x96xf32>
    %109 = vector.extract_strided_slice %102 {offsets = [0, 0], sizes = [2, 96], strides = [1, 1]} : vector<16x96xf32> to vector<2x96xf32>
    %110 = vector.extract_strided_slice %109 {offsets = [0, 0], sizes = [2, 32], strides = [1, 1]} : vector<2x96xf32> to vector<2x32xf32>
    %111 = vector.extract_strided_slice %108 {offsets = [0, 0], sizes = [2, 32], strides = [1, 1]} : vector<2x96xf32> to vector<2x32xf32>
    %112 = arith.addf %110, %111 : vector<2x32xf32>
    %113 = arith.negf %112 : vector<2x32xf32>
    %114 = math.exp %113 : vector<2x32xf32>
    %cst_40 = arith.constant 1.000000e+00 : f32
    %115 = vector.broadcast %cst_40 : f32 to vector<2x32xf32>
    %116 = arith.addf %115, %114 : vector<2x32xf32>
    %117 = arith.divf %115, %116 : vector<2x32xf32>
    %118 = vector.extract_strided_slice %109 {offsets = [0, 32], sizes = [2, 32], strides = [1, 1]} : vector<2x96xf32> to vector<2x32xf32>
    %119 = vector.extract_strided_slice %108 {offsets = [0, 32], sizes = [2, 32], strides = [1, 1]} : vector<2x96xf32> to vector<2x32xf32>
    %120 = arith.addf %118, %119 : vector<2x32xf32>
    %121 = arith.negf %120 : vector<2x32xf32>
    %122 = math.exp %121 : vector<2x32xf32>
    %cst_41 = arith.constant 1.000000e+00 : f32
    %123 = vector.broadcast %cst_41 : f32 to vector<2x32xf32>
    %124 = arith.addf %123, %122 : vector<2x32xf32>
    %125 = arith.divf %123, %124 : vector<2x32xf32>
    %126 = vector.extract_strided_slice %109 {offsets = [0, 64], sizes = [2, 32], strides = [1, 1]} : vector<2x96xf32> to vector<2x32xf32>
    %127 = vector.extract_strided_slice %108 {offsets = [0, 64], sizes = [2, 32], strides = [1, 1]} : vector<2x96xf32> to vector<2x32xf32>
    %128 = arith.mulf %117, %127 : vector<2x32xf32>
    %129 = arith.addf %126, %128 : vector<2x32xf32>
    %130 = math.tanh %129 : vector<2x32xf32>
    %cst_42 = arith.constant 1.000000e+00 : f32
    %131 = vector.broadcast %cst_42 : f32 to vector<2x32xf32>
    %132 = arith.subf %131, %125 : vector<2x32xf32>
    %133 = arith.mulf %132, %130 : vector<2x32xf32>
    %134 = arith.mulf %125, %105 : vector<2x32xf32>
    %135 = arith.addf %133, %134 : vector<2x32xf32>
    %c0_43 = arith.constant 0 : index
    %c0_44 = arith.constant 0 : index
    %136 = vector.load %arg3[%c0_43, %c0_44] : memref<16x32xf32, #tpu.memory_space<vmem>>, vector<2x32xf32>
    tpu.vector_store %arg3[%c0_43, %c0_44], %135 {strides = array<i32>} : memref<16x32xf32, #tpu.memory_space<vmem>>, vector<2x32xf32>,
    %cst_45 = arith.constant dense<0.000000e+00> : vector<2x96xf32>
    %137 = tpu.matmul %135, %103, %cst_45 {dimension_numbers = #tpu.dot_dimension_numbers<[1], [0], [0], [1], [0, 0, 1, 1], [], []>} : vector<2x32xf32>, vector<32x96xf32>, vector<2x96xf32> -> vector<2x96xf32>
    %138 = vector.broadcast %104 : vector<1x96xf32> to vector<2x96xf32>
    %139 = arith.addf %137, %138 : vector<2x96xf32>
    %140 = vector.extract_strided_slice %102 {offsets = [2, 0], sizes = [2, 96], strides = [1, 1]} : vector<16x96xf32> to vector<2x96xf32>
    %141 = vector.extract_strided_slice %140 {offsets = [0, 0], sizes = [2, 32], strides = [1, 1]} : vector<2x96xf32> to vector<2x32xf32>
    %142 = vector.extract_strided_slice %139 {offsets = [0, 0], sizes = [2, 32], strides = [1, 1]} : vector<2x96xf32> to vector<2x32xf32>
    %143 = arith.addf %141, %142 : vector<2x32xf32>
    %144 = arith.negf %143 : vector<2x32xf32>
    %145 = math.exp %144 : vector<2x32xf32>
    %cst_46 = arith.constant 1.000000e+00 : f32
    %146 = vector.broadcast %cst_46 : f32 to vector<2x32xf32>
    %147 = arith.addf %146, %145 : vector<2x32xf32>
    %148 = arith.divf %146, %147 : vector<2x32xf32>
    %149 = vector.extract_strided_slice %140 {offsets = [0, 32], sizes = [2, 32], strides = [1, 1]} : vector<2x96xf32> to vector<2x32xf32>
    %150 = vector.extract_strided_slice %139 {offsets = [0, 32], sizes = [2, 32], strides = [1, 1]} : vector<2x96xf32> to vector<2x32xf32>
    %151 = arith.addf %149, %150 : vector<2x32xf32>
    %152 = arith.negf %151 : vector<2x32xf32>
    %153 = math.exp %152 : vector<2x32xf32>
    %cst_47 = arith.constant 1.000000e+00 : f32
    %154 = vector.broadcast %cst_47 : f32 to vector<2x32xf32>
    %155 = arith.addf %154, %153 : vector<2x32xf32>
    %156 = arith.divf %154, %155 : vector<2x32xf32>
    %157 = vector.extract_strided_slice %140 {offsets = [0, 64], sizes = [2, 32], strides = [1, 1]} : vector<2x96xf32> to vector<2x32xf32>
    %158 = vector.extract_strided_slice %139 {offsets = [0, 64], sizes = [2, 32], strides = [1, 1]} : vector<2x96xf32> to vector<2x32xf32>
    %159 = arith.mulf %148, %158 : vector<2x32xf32>
    %160 = arith.addf %157, %159 : vector<2x32xf32>
    %161 = math.tanh %160 : vector<2x32xf32>
    %cst_48 = arith.constant 1.000000e+00 : f32
    %162 = vector.broadcast %cst_48 : f32 to vector<2x32xf32>
    %163 = arith.subf %162, %156 : vector<2x32xf32>
    %164 = arith.mulf %163, %161 : vector<2x32xf32>
    %165 = arith.mulf %156, %135 : vector<2x32xf32>
    %166 = arith.addf %164, %165 : vector<2x32xf32>
    %c2 = arith.constant 2 : index
    %c0_49 = arith.constant 0 : index
    %167 = vector.load %arg3[%c2, %c0_49] : memref<16x32xf32, #tpu.memory_space<vmem>>, vector<2x32xf32>
    tpu.vector_store %arg3[%c2, %c0_49], %166 {strides = array<i32>} : memref<16x32xf32, #tpu.memory_space<vmem>>, vector<2x32xf32>,
    %cst_50 = arith.constant dense<0.000000e+00> : vector<2x96xf32>
    %168 = tpu.matmul %166, %103, %cst_50 {dimension_numbers = #tpu.dot_dimension_numbers<[1], [0], [0], [1], [0, 0, 1, 1], [], []>} : vector<2x32xf32>, vector<32x96xf32>, vector<2x96xf32> -> vector<2x96xf32>
    %169 = vector.broadcast %104 : vector<1x96xf32> to vector<2x96xf32>
    %170 = arith.addf %168, %169 : vector<2x96xf32>
    %171 = vector.extract_strided_slice %102 {offsets = [4, 0], sizes = [2, 96], strides = [1, 1]} : vector<16x96xf32> to vector<2x96xf32>
    %172 = vector.extract_strided_slice %171 {offsets = [0, 0], sizes = [2, 32], strides = [1, 1]} : vector<2x96xf32> to vector<2x32xf32>
    %173 = vector.extract_strided_slice %170 {offsets = [0, 0], sizes = [2, 32], strides = [1, 1]} : vector<2x96xf32> to vector<2x32xf32>
    %174 = arith.addf %172, %173 : vector<2x32xf32>
    %175 = arith.negf %174 : vector<2x32xf32>
    %176 = math.exp %175 : vector<2x32xf32>
    %cst_51 = arith.constant 1.000000e+00 : f32
    %177 = vector.broadcast %cst_51 : f32 to vector<2x32xf32>
    %178 = arith.addf %177, %176 : vector<2x32xf32>
    %179 = arith.divf %177, %178 : vector<2x32xf32>
    %180 = vector.extract_strided_slice %171 {offsets = [0, 32], sizes = [2, 32], strides = [1, 1]} : vector<2x96xf32> to vector<2x32xf32>
    %181 = vector.extract_strided_slice %170 {offsets = [0, 32], sizes = [2, 32], strides = [1, 1]} : vector<2x96xf32> to vector<2x32xf32>
    %182 = arith.addf %180, %181 : vector<2x32xf32>
    %183 = arith.negf %182 : vector<2x32xf32>
    %184 = math.exp %183 : vector<2x32xf32>
    %cst_52 = arith.constant 1.000000e+00 : f32
    %185 = vector.broadcast %cst_52 : f32 to vector<2x32xf32>
    %186 = arith.addf %185, %184 : vector<2x32xf32>
    %187 = arith.divf %185, %186 : vector<2x32xf32>
    %188 = vector.extract_strided_slice %171 {offsets = [0, 64], sizes = [2, 32], strides = [1, 1]} : vector<2x96xf32> to vector<2x32xf32>
    %189 = vector.extract_strided_slice %170 {offsets = [0, 64], sizes = [2, 32], strides = [1, 1]} : vector<2x96xf32> to vector<2x32xf32>
    %190 = arith.mulf %179, %189 : vector<2x32xf32>
    %191 = arith.addf %188, %190 : vector<2x32xf32>
    %192 = math.tanh %191 : vector<2x32xf32>
    %cst_53 = arith.constant 1.000000e+00 : f32
    %193 = vector.broadcast %cst_53 : f32 to vector<2x32xf32>
    %194 = arith.subf %193, %187 : vector<2x32xf32>
    %195 = arith.mulf %194, %192 : vector<2x32xf32>
    %196 = arith.mulf %187, %166 : vector<2x32xf32>
    %197 = arith.addf %195, %196 : vector<2x32xf32>
    %c4 = arith.constant 4 : index
    %c0_54 = arith.constant 0 : index
    %198 = vector.load %arg3[%c4, %c0_54] : memref<16x32xf32, #tpu.memory_space<vmem>>, vector<2x32xf32>
    tpu.vector_store %arg3[%c4, %c0_54], %197 {strides = array<i32>} : memref<16x32xf32, #tpu.memory_space<vmem>>, vector<2x32xf32>,
    %cst_55 = arith.constant dense<0.000000e+00> : vector<2x96xf32>
    %199 = tpu.matmul %197, %103, %cst_55 {dimension_numbers = #tpu.dot_dimension_numbers<[1], [0], [0], [1], [0, 0, 1, 1], [], []>} : vector<2x32xf32>, vector<32x96xf32>, vector<2x96xf32> -> vector<2x96xf32>
    %200 = vector.broadcast %104 : vector<1x96xf32> to vector<2x96xf32>
    %201 = arith.addf %199, %200 : vector<2x96xf32>
    %202 = vector.extract_strided_slice %102 {offsets = [6, 0], sizes = [2, 96], strides = [1, 1]} : vector<16x96xf32> to vector<2x96xf32>
    %203 = vector.extract_strided_slice %202 {offsets = [0, 0], sizes = [2, 32], strides = [1, 1]} : vector<2x96xf32> to vector<2x32xf32>
    %204 = vector.extract_strided_slice %201 {offsets = [0, 0], sizes = [2, 32], strides = [1, 1]} : vector<2x96xf32> to vector<2x32xf32>
    %205 = arith.addf %203, %204 : vector<2x32xf32>
    %206 = arith.negf %205 : vector<2x32xf32>
    %207 = math.exp %206 : vector<2x32xf32>
    %cst_56 = arith.constant 1.000000e+00 : f32
    %208 = vector.broadcast %cst_56 : f32 to vector<2x32xf32>
    %209 = arith.addf %208, %207 : vector<2x32xf32>
    %210 = arith.divf %208, %209 : vector<2x32xf32>
    %211 = vector.extract_strided_slice %202 {offsets = [0, 32], sizes = [2, 32], strides = [1, 1]} : vector<2x96xf32> to vector<2x32xf32>
    %212 = vector.extract_strided_slice %201 {offsets = [0, 32], sizes = [2, 32], strides = [1, 1]} : vector<2x96xf32> to vector<2x32xf32>
    %213 = arith.addf %211, %212 : vector<2x32xf32>
    %214 = arith.negf %213 : vector<2x32xf32>
    %215 = math.exp %214 : vector<2x32xf32>
    %cst_57 = arith.constant 1.000000e+00 : f32
    %216 = vector.broadcast %cst_57 : f32 to vector<2x32xf32>
    %217 = arith.addf %216, %215 : vector<2x32xf32>
    %218 = arith.divf %216, %217 : vector<2x32xf32>
    %219 = vector.extract_strided_slice %202 {offsets = [0, 64], sizes = [2, 32], strides = [1, 1]} : vector<2x96xf32> to vector<2x32xf32>
    %220 = vector.extract_strided_slice %201 {offsets = [0, 64], sizes = [2, 32], strides = [1, 1]} : vector<2x96xf32> to vector<2x32xf32>
    %221 = arith.mulf %210, %220 : vector<2x32xf32>
    %222 = arith.addf %219, %221 : vector<2x32xf32>
    %223 = math.tanh %222 : vector<2x32xf32>
    %cst_58 = arith.constant 1.000000e+00 : f32
    %224 = vector.broadcast %cst_58 : f32 to vector<2x32xf32>
    %225 = arith.subf %224, %218 : vector<2x32xf32>
    %226 = arith.mulf %225, %223 : vector<2x32xf32>
    %227 = arith.mulf %218, %197 : vector<2x32xf32>
    %228 = arith.addf %226, %227 : vector<2x32xf32>
    %c6 = arith.constant 6 : index
    %c0_59 = arith.constant 0 : index
    %229 = vector.load %arg3[%c6, %c0_59] : memref<16x32xf32, #tpu.memory_space<vmem>>, vector<2x32xf32>
    tpu.vector_store %arg3[%c6, %c0_59], %228 {strides = array<i32>} : memref<16x32xf32, #tpu.memory_space<vmem>>, vector<2x32xf32>,
    %cst_60 = arith.constant dense<0.000000e+00> : vector<2x96xf32>
    %230 = tpu.matmul %228, %103, %cst_60 {dimension_numbers = #tpu.dot_dimension_numbers<[1], [0], [0], [1], [0, 0, 1, 1], [], []>} : vector<2x32xf32>, vector<32x96xf32>, vector<2x96xf32> -> vector<2x96xf32>
    %231 = vector.broadcast %104 : vector<1x96xf32> to vector<2x96xf32>
    %232 = arith.addf %230, %231 : vector<2x96xf32>
    %233 = vector.extract_strided_slice %102 {offsets = [8, 0], sizes = [2, 96], strides = [1, 1]} : vector<16x96xf32> to vector<2x96xf32>
    %234 = vector.extract_strided_slice %233 {offsets = [0, 0], sizes = [2, 32], strides = [1, 1]} : vector<2x96xf32> to vector<2x32xf32>
    %235 = vector.extract_strided_slice %232 {offsets = [0, 0], sizes = [2, 32], strides = [1, 1]} : vector<2x96xf32> to vector<2x32xf32>
    %236 = arith.addf %234, %235 : vector<2x32xf32>
    %237 = arith.negf %236 : vector<2x32xf32>
    %238 = math.exp %237 : vector<2x32xf32>
    %cst_61 = arith.constant 1.000000e+00 : f32
    %239 = vector.broadcast %cst_61 : f32 to vector<2x32xf32>
    %240 = arith.addf %239, %238 : vector<2x32xf32>
    %241 = arith.divf %239, %240 : vector<2x32xf32>
    %242 = vector.extract_strided_slice %233 {offsets = [0, 32], sizes = [2, 32], strides = [1, 1]} : vector<2x96xf32> to vector<2x32xf32>
    %243 = vector.extract_strided_slice %232 {offsets = [0, 32], sizes = [2, 32], strides = [1, 1]} : vector<2x96xf32> to vector<2x32xf32>
    %244 = arith.addf %242, %243 : vector<2x32xf32>
    %245 = arith.negf %244 : vector<2x32xf32>
    %246 = math.exp %245 : vector<2x32xf32>
    %cst_62 = arith.constant 1.000000e+00 : f32
    %247 = vector.broadcast %cst_62 : f32 to vector<2x32xf32>
    %248 = arith.addf %247, %246 : vector<2x32xf32>
    %249 = arith.divf %247, %248 : vector<2x32xf32>
    %250 = vector.extract_strided_slice %233 {offsets = [0, 64], sizes = [2, 32], strides = [1, 1]} : vector<2x96xf32> to vector<2x32xf32>
    %251 = vector.extract_strided_slice %232 {offsets = [0, 64], sizes = [2, 32], strides = [1, 1]} : vector<2x96xf32> to vector<2x32xf32>
    %252 = arith.mulf %241, %251 : vector<2x32xf32>
    %253 = arith.addf %250, %252 : vector<2x32xf32>
    %254 = math.tanh %253 : vector<2x32xf32>
    %cst_63 = arith.constant 1.000000e+00 : f32
    %255 = vector.broadcast %cst_63 : f32 to vector<2x32xf32>
    %256 = arith.subf %255, %249 : vector<2x32xf32>
    %257 = arith.mulf %256, %254 : vector<2x32xf32>
    %258 = arith.mulf %249, %228 : vector<2x32xf32>
    %259 = arith.addf %257, %258 : vector<2x32xf32>
    %c8_64 = arith.constant 8 : index
    %c0_65 = arith.constant 0 : index
    %260 = vector.load %arg3[%c8_64, %c0_65] : memref<16x32xf32, #tpu.memory_space<vmem>>, vector<2x32xf32>
    tpu.vector_store %arg3[%c8_64, %c0_65], %259 {strides = array<i32>} : memref<16x32xf32, #tpu.memory_space<vmem>>, vector<2x32xf32>,
    %cst_66 = arith.constant dense<0.000000e+00> : vector<2x96xf32>
    %261 = tpu.matmul %259, %103, %cst_66 {dimension_numbers = #tpu.dot_dimension_numbers<[1], [0], [0], [1], [0, 0, 1, 1], [], []>} : vector<2x32xf32>, vector<32x96xf32>, vector<2x96xf32> -> vector<2x96xf32>
    %262 = vector.broadcast %104 : vector<1x96xf32> to vector<2x96xf32>
    %263 = arith.addf %261, %262 : vector<2x96xf32>
    %264 = vector.extract_strided_slice %102 {offsets = [10, 0], sizes = [2, 96], strides = [1, 1]} : vector<16x96xf32> to vector<2x96xf32>
    %265 = vector.extract_strided_slice %264 {offsets = [0, 0], sizes = [2, 32], strides = [1, 1]} : vector<2x96xf32> to vector<2x32xf32>
    %266 = vector.extract_strided_slice %263 {offsets = [0, 0], sizes = [2, 32], strides = [1, 1]} : vector<2x96xf32> to vector<2x32xf32>
    %267 = arith.addf %265, %266 : vector<2x32xf32>
    %268 = arith.negf %267 : vector<2x32xf32>
    %269 = math.exp %268 : vector<2x32xf32>
    %cst_67 = arith.constant 1.000000e+00 : f32
    %270 = vector.broadcast %cst_67 : f32 to vector<2x32xf32>
    %271 = arith.addf %270, %269 : vector<2x32xf32>
    %272 = arith.divf %270, %271 : vector<2x32xf32>
    %273 = vector.extract_strided_slice %264 {offsets = [0, 32], sizes = [2, 32], strides = [1, 1]} : vector<2x96xf32> to vector<2x32xf32>
    %274 = vector.extract_strided_slice %263 {offsets = [0, 32], sizes = [2, 32], strides = [1, 1]} : vector<2x96xf32> to vector<2x32xf32>
    %275 = arith.addf %273, %274 : vector<2x32xf32>
    %276 = arith.negf %275 : vector<2x32xf32>
    %277 = math.exp %276 : vector<2x32xf32>
    %cst_68 = arith.constant 1.000000e+00 : f32
    %278 = vector.broadcast %cst_68 : f32 to vector<2x32xf32>
    %279 = arith.addf %278, %277 : vector<2x32xf32>
    %280 = arith.divf %278, %279 : vector<2x32xf32>
    %281 = vector.extract_strided_slice %264 {offsets = [0, 64], sizes = [2, 32], strides = [1, 1]} : vector<2x96xf32> to vector<2x32xf32>
    %282 = vector.extract_strided_slice %263 {offsets = [0, 64], sizes = [2, 32], strides = [1, 1]} : vector<2x96xf32> to vector<2x32xf32>
    %283 = arith.mulf %272, %282 : vector<2x32xf32>
    %284 = arith.addf %281, %283 : vector<2x32xf32>
    %285 = math.tanh %284 : vector<2x32xf32>
    %cst_69 = arith.constant 1.000000e+00 : f32
    %286 = vector.broadcast %cst_69 : f32 to vector<2x32xf32>
    %287 = arith.subf %286, %280 : vector<2x32xf32>
    %288 = arith.mulf %287, %285 : vector<2x32xf32>
    %289 = arith.mulf %280, %259 : vector<2x32xf32>
    %290 = arith.addf %288, %289 : vector<2x32xf32>
    %c10 = arith.constant 10 : index
    %c0_70 = arith.constant 0 : index
    %291 = vector.load %arg3[%c10, %c0_70] : memref<16x32xf32, #tpu.memory_space<vmem>>, vector<2x32xf32>
    tpu.vector_store %arg3[%c10, %c0_70], %290 {strides = array<i32>} : memref<16x32xf32, #tpu.memory_space<vmem>>, vector<2x32xf32>,
    %cst_71 = arith.constant dense<0.000000e+00> : vector<2x96xf32>
    %292 = tpu.matmul %290, %103, %cst_71 {dimension_numbers = #tpu.dot_dimension_numbers<[1], [0], [0], [1], [0, 0, 1, 1], [], []>} : vector<2x32xf32>, vector<32x96xf32>, vector<2x96xf32> -> vector<2x96xf32>
    %293 = vector.broadcast %104 : vector<1x96xf32> to vector<2x96xf32>
    %294 = arith.addf %292, %293 : vector<2x96xf32>
    %295 = vector.extract_strided_slice %102 {offsets = [12, 0], sizes = [2, 96], strides = [1, 1]} : vector<16x96xf32> to vector<2x96xf32>
    %296 = vector.extract_strided_slice %295 {offsets = [0, 0], sizes = [2, 32], strides = [1, 1]} : vector<2x96xf32> to vector<2x32xf32>
    %297 = vector.extract_strided_slice %294 {offsets = [0, 0], sizes = [2, 32], strides = [1, 1]} : vector<2x96xf32> to vector<2x32xf32>
    %298 = arith.addf %296, %297 : vector<2x32xf32>
    %299 = arith.negf %298 : vector<2x32xf32>
    %300 = math.exp %299 : vector<2x32xf32>
    %cst_72 = arith.constant 1.000000e+00 : f32
    %301 = vector.broadcast %cst_72 : f32 to vector<2x32xf32>
    %302 = arith.addf %301, %300 : vector<2x32xf32>
    %303 = arith.divf %301, %302 : vector<2x32xf32>
    %304 = vector.extract_strided_slice %295 {offsets = [0, 32], sizes = [2, 32], strides = [1, 1]} : vector<2x96xf32> to vector<2x32xf32>
    %305 = vector.extract_strided_slice %294 {offsets = [0, 32], sizes = [2, 32], strides = [1, 1]} : vector<2x96xf32> to vector<2x32xf32>
    %306 = arith.addf %304, %305 : vector<2x32xf32>
    %307 = arith.negf %306 : vector<2x32xf32>
    %308 = math.exp %307 : vector<2x32xf32>
    %cst_73 = arith.constant 1.000000e+00 : f32
    %309 = vector.broadcast %cst_73 : f32 to vector<2x32xf32>
    %310 = arith.addf %309, %308 : vector<2x32xf32>
    %311 = arith.divf %309, %310 : vector<2x32xf32>
    %312 = vector.extract_strided_slice %295 {offsets = [0, 64], sizes = [2, 32], strides = [1, 1]} : vector<2x96xf32> to vector<2x32xf32>
    %313 = vector.extract_strided_slice %294 {offsets = [0, 64], sizes = [2, 32], strides = [1, 1]} : vector<2x96xf32> to vector<2x32xf32>
    %314 = arith.mulf %303, %313 : vector<2x32xf32>
    %315 = arith.addf %312, %314 : vector<2x32xf32>
    %316 = math.tanh %315 : vector<2x32xf32>
    %cst_74 = arith.constant 1.000000e+00 : f32
    %317 = vector.broadcast %cst_74 : f32 to vector<2x32xf32>
    %318 = arith.subf %317, %311 : vector<2x32xf32>
    %319 = arith.mulf %318, %316 : vector<2x32xf32>
    %320 = arith.mulf %311, %290 : vector<2x32xf32>
    %321 = arith.addf %319, %320 : vector<2x32xf32>
    %c12 = arith.constant 12 : index
    %c0_75 = arith.constant 0 : index
    %322 = vector.load %arg3[%c12, %c0_75] : memref<16x32xf32, #tpu.memory_space<vmem>>, vector<2x32xf32>
    tpu.vector_store %arg3[%c12, %c0_75], %321 {strides = array<i32>} : memref<16x32xf32, #tpu.memory_space<vmem>>, vector<2x32xf32>,
    %cst_76 = arith.constant dense<0.000000e+00> : vector<2x96xf32>
    %323 = tpu.matmul %321, %103, %cst_76 {dimension_numbers = #tpu.dot_dimension_numbers<[1], [0], [0], [1], [0, 0, 1, 1], [], []>} : vector<2x32xf32>, vector<32x96xf32>, vector<2x96xf32> -> vector<2x96xf32>
    %324 = vector.broadcast %104 : vector<1x96xf32> to vector<2x96xf32>
    %325 = arith.addf %323, %324 : vector<2x96xf32>
    %326 = vector.extract_strided_slice %102 {offsets = [14, 0], sizes = [2, 96], strides = [1, 1]} : vector<16x96xf32> to vector<2x96xf32>
    %327 = vector.extract_strided_slice %326 {offsets = [0, 0], sizes = [2, 32], strides = [1, 1]} : vector<2x96xf32> to vector<2x32xf32>
    %328 = vector.extract_strided_slice %325 {offsets = [0, 0], sizes = [2, 32], strides = [1, 1]} : vector<2x96xf32> to vector<2x32xf32>
    %329 = arith.addf %327, %328 : vector<2x32xf32>
    %330 = arith.negf %329 : vector<2x32xf32>
    %331 = math.exp %330 : vector<2x32xf32>
    %cst_77 = arith.constant 1.000000e+00 : f32
    %332 = vector.broadcast %cst_77 : f32 to vector<2x32xf32>
    %333 = arith.addf %332, %331 : vector<2x32xf32>
    %334 = arith.divf %332, %333 : vector<2x32xf32>
    %335 = vector.extract_strided_slice %326 {offsets = [0, 32], sizes = [2, 32], strides = [1, 1]} : vector<2x96xf32> to vector<2x32xf32>
    %336 = vector.extract_strided_slice %325 {offsets = [0, 32], sizes = [2, 32], strides = [1, 1]} : vector<2x96xf32> to vector<2x32xf32>
    %337 = arith.addf %335, %336 : vector<2x32xf32>
    %338 = arith.negf %337 : vector<2x32xf32>
    %339 = math.exp %338 : vector<2x32xf32>
    %cst_78 = arith.constant 1.000000e+00 : f32
    %340 = vector.broadcast %cst_78 : f32 to vector<2x32xf32>
    %341 = arith.addf %340, %339 : vector<2x32xf32>
    %342 = arith.divf %340, %341 : vector<2x32xf32>
    %343 = vector.extract_strided_slice %326 {offsets = [0, 64], sizes = [2, 32], strides = [1, 1]} : vector<2x96xf32> to vector<2x32xf32>
    %344 = vector.extract_strided_slice %325 {offsets = [0, 64], sizes = [2, 32], strides = [1, 1]} : vector<2x96xf32> to vector<2x32xf32>
    %345 = arith.mulf %334, %344 : vector<2x32xf32>
    %346 = arith.addf %343, %345 : vector<2x32xf32>
    %347 = math.tanh %346 : vector<2x32xf32>
    %cst_79 = arith.constant 1.000000e+00 : f32
    %348 = vector.broadcast %cst_79 : f32 to vector<2x32xf32>
    %349 = arith.subf %348, %342 : vector<2x32xf32>
    %350 = arith.mulf %349, %347 : vector<2x32xf32>
    %351 = arith.mulf %342, %321 : vector<2x32xf32>
    %352 = arith.addf %350, %351 : vector<2x32xf32>
    %c14 = arith.constant 14 : index
    %c0_80 = arith.constant 0 : index
    %353 = vector.load %arg3[%c14, %c0_80] : memref<16x32xf32, #tpu.memory_space<vmem>>, vector<2x32xf32>
    tpu.vector_store %arg3[%c14, %c0_80], %352 {strides = array<i32>} : memref<16x32xf32, #tpu.memory_space<vmem>>, vector<2x32xf32>,
    %c0_81 = arith.constant 0 : index
    %c0_82 = arith.constant 0 : index
    %354 = vector.load %arg3[%c0_81, %c0_82] : memref<16x32xf32, #tpu.memory_space<vmem>>, vector<16x32xf32>
    %c672 = arith.constant 672 : index
    %c0_83 = arith.constant 0 : index
    %355 = vector.load %arg1[%c672, %c0_83] : memref<928x128xf32, #tpu.memory_space<vmem>>, vector<4x32xf32>
    %c640 = arith.constant 640 : index
    %c0_84 = arith.constant 0 : index
    %356 = vector.load %arg1[%c640, %c0_84] : memref<928x128xf32, #tpu.memory_space<vmem>>, vector<32x32xf32>
    %cst_85 = arith.constant dense<0.000000e+00> : vector<16x32xf32>
    %357 = tpu.matmul %354, %356, %cst_85 {dimension_numbers = #tpu.dot_dimension_numbers<[1], [0], [0], [1], [0, 0, 1, 1], [], []>} : vector<16x32xf32>, vector<32x32xf32>, vector<16x32xf32> -> vector<16x32xf32>
    %358 = vector.extract_strided_slice %355 {offsets = [0, 0], sizes = [1, 32], strides = [1, 1]} : vector<4x32xf32> to vector<1x32xf32>
    %359 = vector.broadcast %2 : vector<16x1xf32> to vector<16x32xf32>
    %360 = vector.broadcast %358 : vector<1x32xf32> to vector<16x32xf32>
    %361 = arith.mulf %359, %360 : vector<16x32xf32>
    %362 = arith.addf %357, %361 : vector<16x32xf32>
    %363 = vector.extract_strided_slice %0 {offsets = [0, 1], sizes = [16, 1], strides = [1, 1]} : vector<16x4xf32> to vector<16x1xf32>
    %364 = vector.extract_strided_slice %355 {offsets = [1, 0], sizes = [1, 32], strides = [1, 1]} : vector<4x32xf32> to vector<1x32xf32>
    %365 = vector.broadcast %363 : vector<16x1xf32> to vector<16x32xf32>
    %366 = vector.broadcast %364 : vector<1x32xf32> to vector<16x32xf32>
    %367 = arith.mulf %365, %366 : vector<16x32xf32>
    %368 = arith.addf %362, %367 : vector<16x32xf32>
    %369 = vector.extract_strided_slice %0 {offsets = [0, 2], sizes = [16, 1], strides = [1, 1]} : vector<16x4xf32> to vector<16x1xf32>
    %370 = vector.extract_strided_slice %355 {offsets = [2, 0], sizes = [1, 32], strides = [1, 1]} : vector<4x32xf32> to vector<1x32xf32>
    %371 = vector.broadcast %369 : vector<16x1xf32> to vector<16x32xf32>
    %372 = vector.broadcast %370 : vector<1x32xf32> to vector<16x32xf32>
    %373 = arith.mulf %371, %372 : vector<16x32xf32>
    %374 = arith.addf %368, %373 : vector<16x32xf32>
    %375 = vector.extract_strided_slice %0 {offsets = [0, 3], sizes = [16, 1], strides = [1, 1]} : vector<16x4xf32> to vector<16x1xf32>
    %376 = vector.extract_strided_slice %355 {offsets = [3, 0], sizes = [1, 32], strides = [1, 1]} : vector<4x32xf32> to vector<1x32xf32>
    %377 = vector.broadcast %375 : vector<16x1xf32> to vector<16x32xf32>
    %378 = vector.broadcast %376 : vector<1x32xf32> to vector<16x32xf32>
    %379 = arith.mulf %377, %378 : vector<16x32xf32>
    %380 = arith.addf %374, %379 : vector<16x32xf32>
    %c680 = arith.constant 680 : index
    %c0_86 = arith.constant 0 : index
    %381 = vector.load %arg1[%c680, %c0_86] : memref<928x128xf32, #tpu.memory_space<vmem>>, vector<1x32xf32>
    %382 = vector.broadcast %381 : vector<1x32xf32> to vector<16x32xf32>
    %383 = arith.addf %380, %382 : vector<16x32xf32>
    %c688 = arith.constant 688 : index
    %c0_87 = arith.constant 0 : index
    %384 = vector.load %arg1[%c688, %c0_87] : memref<928x128xf32, #tpu.memory_space<vmem>>, vector<1x32xf32>
    %c696 = arith.constant 696 : index
    %c0_88 = arith.constant 0 : index
    %385 = vector.load %arg1[%c696, %c0_88] : memref<928x128xf32, #tpu.memory_space<vmem>>, vector<1x32xf32>
    %cst_89 = arith.constant dense<0.000000e+00> : vector<16xf32>
    %386 = vector.multi_reduction <add>, %383, %cst_89 [1] : vector<16x32xf32> to vector<16xf32>
    %387 = vector.shape_cast %386 : vector<16xf32> to vector<16x1xf32>
    %cst_90 = arith.constant 3.200000e+01 : f32
    %388 = vector.broadcast %cst_90 : f32 to vector<16x1xf32>
    %389 = arith.divf %387, %388 : vector<16x1xf32>
    %390 = vector.broadcast %389 : vector<16x1xf32> to vector<16x32xf32>
    %391 = arith.subf %383, %390 : vector<16x32xf32>
    %392 = arith.mulf %391, %391 : vector<16x32xf32>
    %cst_91 = arith.constant dense<0.000000e+00> : vector<16xf32>
    %393 = vector.multi_reduction <add>, %392, %cst_91 [1] : vector<16x32xf32> to vector<16xf32>
    %394 = vector.shape_cast %393 : vector<16xf32> to vector<16x1xf32>
    %cst_92 = arith.constant 3.200000e+01 : f32
    %395 = vector.broadcast %cst_92 : f32 to vector<16x1xf32>
    %396 = arith.divf %394, %395 : vector<16x1xf32>
    %397 = vector.broadcast %389 : vector<16x1xf32> to vector<16x32xf32>
    %398 = arith.subf %383, %397 : vector<16x32xf32>
    %cst_93 = arith.constant 9.99999974E-6 : f32
    %399 = vector.broadcast %cst_93 : f32 to vector<16x1xf32>
    %400 = arith.addf %396, %399 : vector<16x1xf32>
    %401 = math.rsqrt %400 : vector<16x1xf32>
    %402 = vector.broadcast %401 : vector<16x1xf32> to vector<16x32xf32>
    %403 = arith.mulf %398, %402 : vector<16x32xf32>
    %404 = vector.broadcast %384 : vector<1x32xf32> to vector<16x32xf32>
    %405 = arith.mulf %403, %404 : vector<16x32xf32>
    %406 = vector.broadcast %385 : vector<1x32xf32> to vector<16x32xf32>
    %407 = arith.addf %405, %406 : vector<16x32xf32>
    %cst_94 = arith.constant 0.000000e+00 : f32
    %408 = vector.broadcast %cst_94 : f32 to vector<16x32xf32>
    %409 = arith.cmpf oge, %407, %408 : vector<16x32xf32>
    %cst_95 = arith.constant 0.00999999977 : f32
    %410 = vector.broadcast %cst_95 : f32 to vector<16x32xf32>
    %411 = arith.mulf %410, %407 : vector<16x32xf32>
    %412 = arith.select %409, %407, %411 : vector<16x32xi1>, vector<16x32xf32>
    %c704 = arith.constant 704 : index
    %c0_96 = arith.constant 0 : index
    %413 = vector.load %arg1[%c704, %c0_96] : memref<928x128xf32, #tpu.memory_space<vmem>>, vector<32x32xf32>
    %cst_97 = arith.constant dense<0.000000e+00> : vector<16x32xf32>
    %414 = tpu.matmul %412, %413, %cst_97 {dimension_numbers = #tpu.dot_dimension_numbers<[1], [0], [0], [1], [0, 0, 1, 1], [], []>} : vector<16x32xf32>, vector<32x32xf32>, vector<16x32xf32> -> vector<16x32xf32>
    %c736 = arith.constant 736 : index
    %c0_98 = arith.constant 0 : index
    %415 = vector.load %arg1[%c736, %c0_98] : memref<928x128xf32, #tpu.memory_space<vmem>>, vector<1x32xf32>
    %416 = vector.broadcast %415 : vector<1x32xf32> to vector<16x32xf32>
    %417 = arith.addf %414, %416 : vector<16x32xf32>
    %c744 = arith.constant 744 : index
    %c0_99 = arith.constant 0 : index
    %418 = vector.load %arg1[%c744, %c0_99] : memref<928x128xf32, #tpu.memory_space<vmem>>, vector<1x32xf32>
    %c752 = arith.constant 752 : index
    %c0_100 = arith.constant 0 : index
    %419 = vector.load %arg1[%c752, %c0_100] : memref<928x128xf32, #tpu.memory_space<vmem>>, vector<1x32xf32>
    %cst_101 = arith.constant dense<0.000000e+00> : vector<16xf32>
    %420 = vector.multi_reduction <add>, %417, %cst_101 [1] : vector<16x32xf32> to vector<16xf32>
    %421 = vector.shape_cast %420 : vector<16xf32> to vector<16x1xf32>
    %cst_102 = arith.constant 3.200000e+01 : f32
    %422 = vector.broadcast %cst_102 : f32 to vector<16x1xf32>
    %423 = arith.divf %421, %422 : vector<16x1xf32>
    %424 = vector.broadcast %423 : vector<16x1xf32> to vector<16x32xf32>
    %425 = arith.subf %417, %424 : vector<16x32xf32>
    %426 = arith.mulf %425, %425 : vector<16x32xf32>
    %cst_103 = arith.constant dense<0.000000e+00> : vector<16xf32>
    %427 = vector.multi_reduction <add>, %426, %cst_103 [1] : vector<16x32xf32> to vector<16xf32>
    %428 = vector.shape_cast %427 : vector<16xf32> to vector<16x1xf32>
    %cst_104 = arith.constant 3.200000e+01 : f32
    %429 = vector.broadcast %cst_104 : f32 to vector<16x1xf32>
    %430 = arith.divf %428, %429 : vector<16x1xf32>
    %431 = vector.broadcast %423 : vector<16x1xf32> to vector<16x32xf32>
    %432 = arith.subf %417, %431 : vector<16x32xf32>
    %cst_105 = arith.constant 9.99999974E-6 : f32
    %433 = vector.broadcast %cst_105 : f32 to vector<16x1xf32>
    %434 = arith.addf %430, %433 : vector<16x1xf32>
    %435 = math.rsqrt %434 : vector<16x1xf32>
    %436 = vector.broadcast %435 : vector<16x1xf32> to vector<16x32xf32>
    %437 = arith.mulf %432, %436 : vector<16x32xf32>
    %438 = vector.broadcast %418 : vector<1x32xf32> to vector<16x32xf32>
    %439 = arith.mulf %437, %438 : vector<16x32xf32>
    %440 = vector.broadcast %419 : vector<1x32xf32> to vector<16x32xf32>
    %441 = arith.addf %439, %440 : vector<16x32xf32>
    %cst_106 = arith.constant 0.000000e+00 : f32
    %442 = vector.broadcast %cst_106 : f32 to vector<16x32xf32>
    %443 = arith.cmpf oge, %441, %442 : vector<16x32xf32>
    %cst_107 = arith.constant 0.00999999977 : f32
    %444 = vector.broadcast %cst_107 : f32 to vector<16x32xf32>
    %445 = arith.mulf %444, %441 : vector<16x32xf32>
    %446 = arith.select %443, %441, %445 : vector<16x32xi1>, vector<16x32xf32>
    %c760 = arith.constant 760 : index
    %c0_108 = arith.constant 0 : index
    %447 = vector.load %arg1[%c760, %c0_108] : memref<928x128xf32, #tpu.memory_space<vmem>>, vector<32x32xf32>
    %cst_109 = arith.constant dense<0.000000e+00> : vector<16x32xf32>
    %448 = tpu.matmul %446, %447, %cst_109 {dimension_numbers = #tpu.dot_dimension_numbers<[1], [0], [0], [1], [0, 0, 1, 1], [], []>} : vector<16x32xf32>, vector<32x32xf32>, vector<16x32xf32> -> vector<16x32xf32>
    %c792 = arith.constant 792 : index
    %c0_110 = arith.constant 0 : index
    %449 = vector.load %arg1[%c792, %c0_110] : memref<928x128xf32, #tpu.memory_space<vmem>>, vector<1x32xf32>
    %450 = vector.broadcast %449 : vector<1x32xf32> to vector<16x32xf32>
    %451 = arith.addf %448, %450 : vector<16x32xf32>
    %c800 = arith.constant 800 : index
    %c0_111 = arith.constant 0 : index
    %452 = vector.load %arg1[%c800, %c0_111] : memref<928x128xf32, #tpu.memory_space<vmem>>, vector<1x32xf32>
    %c808 = arith.constant 808 : index
    %c0_112 = arith.constant 0 : index
    %453 = vector.load %arg1[%c808, %c0_112] : memref<928x128xf32, #tpu.memory_space<vmem>>, vector<1x32xf32>
    %cst_113 = arith.constant dense<0.000000e+00> : vector<16xf32>
    %454 = vector.multi_reduction <add>, %451, %cst_113 [1] : vector<16x32xf32> to vector<16xf32>
    %455 = vector.shape_cast %454 : vector<16xf32> to vector<16x1xf32>
    %cst_114 = arith.constant 3.200000e+01 : f32
    %456 = vector.broadcast %cst_114 : f32 to vector<16x1xf32>
    %457 = arith.divf %455, %456 : vector<16x1xf32>
    %458 = vector.broadcast %457 : vector<16x1xf32> to vector<16x32xf32>
    %459 = arith.subf %451, %458 : vector<16x32xf32>
    %460 = arith.mulf %459, %459 : vector<16x32xf32>
    %cst_115 = arith.constant dense<0.000000e+00> : vector<16xf32>
    %461 = vector.multi_reduction <add>, %460, %cst_115 [1] : vector<16x32xf32> to vector<16xf32>
    %462 = vector.shape_cast %461 : vector<16xf32> to vector<16x1xf32>
    %cst_116 = arith.constant 3.200000e+01 : f32
    %463 = vector.broadcast %cst_116 : f32 to vector<16x1xf32>
    %464 = arith.divf %462, %463 : vector<16x1xf32>
    %465 = vector.broadcast %457 : vector<16x1xf32> to vector<16x32xf32>
    %466 = arith.subf %451, %465 : vector<16x32xf32>
    %cst_117 = arith.constant 9.99999974E-6 : f32
    %467 = vector.broadcast %cst_117 : f32 to vector<16x1xf32>
    %468 = arith.addf %464, %467 : vector<16x1xf32>
    %469 = math.rsqrt %468 : vector<16x1xf32>
    %470 = vector.broadcast %469 : vector<16x1xf32> to vector<16x32xf32>
    %471 = arith.mulf %466, %470 : vector<16x32xf32>
    %472 = vector.broadcast %452 : vector<1x32xf32> to vector<16x32xf32>
    %473 = arith.mulf %471, %472 : vector<16x32xf32>
    %474 = vector.broadcast %453 : vector<1x32xf32> to vector<16x32xf32>
    %475 = arith.addf %473, %474 : vector<16x32xf32>
    %cst_118 = arith.constant 0.000000e+00 : f32
    %476 = vector.broadcast %cst_118 : f32 to vector<16x32xf32>
    %477 = arith.cmpf oge, %475, %476 : vector<16x32xf32>
    %cst_119 = arith.constant 0.00999999977 : f32
    %478 = vector.broadcast %cst_119 : f32 to vector<16x32xf32>
    %479 = arith.mulf %478, %475 : vector<16x32xf32>
    %480 = arith.select %477, %475, %479 : vector<16x32xi1>, vector<16x32xf32>
    %c816 = arith.constant 816 : index
    %c0_120 = arith.constant 0 : index
    %481 = vector.load %arg1[%c816, %c0_120] : memref<928x128xf32, #tpu.memory_space<vmem>>, vector<32x128xf32>
    %cst_121 = arith.constant dense<0.000000e+00> : vector<16x128xf32>
    %482 = tpu.matmul %480, %481, %cst_121 {dimension_numbers = #tpu.dot_dimension_numbers<[1], [0], [0], [1], [0, 0, 1, 1], [], []>} : vector<16x32xf32>, vector<32x128xf32>, vector<16x128xf32> -> vector<16x128xf32>
    %c848 = arith.constant 848 : index
    %c0_122 = arith.constant 0 : index
    %483 = vector.load %arg1[%c848, %c0_122] : memref<928x128xf32, #tpu.memory_space<vmem>>, vector<1x128xf32>
    %484 = vector.broadcast %483 : vector<1x128xf32> to vector<16x128xf32>
    %485 = arith.addf %482, %484 : vector<16x128xf32>
    %cst_123 = arith.constant 5.000000e+00 : f32
    %486 = vector.broadcast %cst_123 : f32 to vector<16x128xf32>
    %487 = arith.subf %485, %486 : vector<16x128xf32>
    %cst_124 = arith.constant 0.000000e+00 : f32
    %488 = vector.broadcast %cst_124 : f32 to vector<16x128xf32>
    %489 = arith.minimumf %487, %488 : vector<16x128xf32>
    %490 = math.absf %487 : vector<16x128xf32>
    %cst_125 = arith.constant 0.000000e+00 : f32
    %491 = vector.broadcast %cst_125 : f32 to vector<16x128xf32>
    %492 = arith.subf %491, %490 : vector<16x128xf32>
    %493 = math.exp %492 : vector<16x128xf32>
    %cst_126 = arith.constant 1.000000e+00 : f32
    %494 = vector.broadcast %cst_126 : f32 to vector<16x128xf32>
    %495 = arith.addf %494, %493 : vector<16x128xf32>
    %496 = math.log %495 : vector<16x128xf32>
    %497 = arith.subf %489, %496 : vector<16x128xf32>
    %cst_127 = arith.constant 2.30258512 : f32
    %498 = vector.broadcast %cst_127 : f32 to vector<16x128xf32>
    %499 = arith.mulf %498, %497 : vector<16x128xf32>
    %500 = math.exp %499 : vector<16x128xf32>
    %cst_128 = arith.constant 2.000000e+00 : f32
    %501 = vector.broadcast %cst_128 : f32 to vector<16x128xf32>
    %502 = arith.mulf %501, %500 : vector<16x128xf32>
    %cst_129 = arith.constant 1.000000e-07 : f32
    %503 = vector.broadcast %cst_129 : f32 to vector<16x128xf32>
    %504 = arith.addf %502, %503 : vector<16x128xf32>
    %c0_130 = arith.constant 0 : index
    %c0_131 = arith.constant 0 : index
    %505 = vector.load %arg2[%c0_130, %c0_131] : memref<18x128xf32, #tpu.memory_space<vmem>>, vector<16x128xf32>
    tpu.vector_store %arg2[%c0_130, %c0_131], %504 {strides = array<i32>} : memref<18x128xf32, #tpu.memory_space<vmem>>, vector<16x128xf32>,
    %506 = vector.extract_strided_slice %485 {offsets = [0, 0], sizes = [16, 9], strides = [1, 1]} : vector<16x128xf32> to vector<16x9xf32>
    %cst_132 = arith.constant 0.000000e+00 : f32
    %507 = vector.broadcast %cst_132 : f32 to vector<16x9xf32>
    %508 = arith.minimumf %506, %507 : vector<16x9xf32>
    %509 = math.absf %506 : vector<16x9xf32>
    %cst_133 = arith.constant 0.000000e+00 : f32
    %510 = vector.broadcast %cst_133 : f32 to vector<16x9xf32>
    %511 = arith.subf %510, %509 : vector<16x9xf32>
    %512 = math.exp %511 : vector<16x9xf32>
    %cst_134 = arith.constant 1.000000e+00 : f32
    %513 = vector.broadcast %cst_134 : f32 to vector<16x9xf32>
    %514 = arith.addf %513, %512 : vector<16x9xf32>
    %515 = math.log %514 : vector<16x9xf32>
    %516 = arith.subf %508, %515 : vector<16x9xf32>
    %cst_135 = arith.constant 2.30258512 : f32
    %517 = vector.broadcast %cst_135 : f32 to vector<16x9xf32>
    %518 = arith.mulf %517, %516 : vector<16x9xf32>
    %519 = math.exp %518 : vector<16x9xf32>
    %cst_136 = arith.constant 2.000000e+00 : f32
    %520 = vector.broadcast %cst_136 : f32 to vector<16x9xf32>
    %521 = arith.mulf %520, %519 : vector<16x9xf32>
    %cst_137 = arith.constant 1.000000e-07 : f32
    %522 = vector.broadcast %cst_137 : f32 to vector<16x9xf32>
    %523 = arith.addf %521, %522 : vector<16x9xf32>
    %524 = vector.extract_strided_slice %523 {offsets = [0, 0], sizes = [16, 1], strides = [1, 1]} : vector<16x9xf32> to vector<16x1xf32>
    %525 = vector.extract_strided_slice %523 {offsets = [0, 1], sizes = [16, 8], strides = [1, 1]} : vector<16x9xf32> to vector<16x8xf32>
    %526 = tpu.iota {dimensions = array<i32: 1>} : vector<16x8xi32>
    %c1_i32 = arith.constant 1 : i32
    %527 = vector.broadcast %c1_i32 : i32 to vector<16x8xi32>
    %528 = arith.addi %526, %527 : vector<16x8xi32>
    %529 = arith.sitofp %528 : vector<16x8xi32> to vector<16x8xf32>
    %530 = vector.broadcast %2 : vector<16x1xf32> to vector<16x8xf32>
    %531 = arith.mulf %530, %529 : vector<16x8xf32>
    %cst_138 = arith.constant 3.200000e+01 : f32
    %532 = vector.broadcast %cst_138 : f32 to vector<16x8xf32>
    %533 = arith.cmpf olt, %531, %532 : vector<16x8xf32>
    %cst_139 = arith.constant 1.000000e+00 : f32
    %cst_140 = arith.constant 0.000000e+00 : f32
    %534 = vector.broadcast %cst_139 : f32 to vector<16x8xf32>
    %535 = vector.broadcast %cst_140 : f32 to vector<16x8xf32>
    %536 = arith.select %533, %534, %535 : vector<16x8xi1>, vector<16x8xf32>
    %cst_141 = arith.constant 9.99999974E-5 : f32
    %537 = vector.broadcast %cst_141 : f32 to vector<16x8xf32>
    %538 = arith.addf %536, %537 : vector<16x8xf32>
    %539 = arith.mulf %525, %538 : vector<16x8xf32>
    %cst_142 = arith.constant dense<0.000000e+00> : vector<16xf32>
    %540 = vector.multi_reduction <add>, %539, %cst_142 [1] : vector<16x8xf32> to vector<16xf32>
    %541 = vector.shape_cast %540 : vector<16xf32> to vector<16x1xf32>
    %542 = tpu.reciprocal %541 {approx = true} : vector<16x1xf32> -> vector<16x1xf32>
    %543 = vector.broadcast %542 : vector<16x1xf32> to vector<16x8xf32>
    %544 = arith.mulf %539, %543 : vector<16x8xf32>
    %545 = vector.broadcast %524 : vector<16x1xf32> to vector<16x8xf32>
    %546 = arith.mulf %544, %545 : vector<16x8xf32>
    %c856 = arith.constant 856 : index
    %c0_143 = arith.constant 0 : index
    %547 = vector.load %arg1[%c856, %c0_143] : memref<928x128xf32, #tpu.memory_space<vmem>>, vector<8x128xf32>
    %cst_144 = arith.constant dense<0.000000e+00> : vector<2x128xf32>
    %548 = tpu.matmul %1, %547, %cst_144 {dimension_numbers = #tpu.dot_dimension_numbers<[1], [0], [0], [1], [0, 0, 1, 1], [], []>} : vector<2x8xf32>, vector<8x128xf32>, vector<2x128xf32> -> vector<2x128xf32>
    %c864 = arith.constant 864 : index
    %c0_145 = arith.constant 0 : index
    %549 = vector.load %arg1[%c864, %c0_145] : memref<928x128xf32, #tpu.memory_space<vmem>>, vector<16x2xf32>
    %550 = vector.extract_strided_slice %549 {offsets = [0, 0], sizes = [16, 1], strides = [1, 1]} : vector<16x2xf32> to vector<16x1xf32>
    %551 = vector.extract_strided_slice %548 {offsets = [0, 0], sizes = [1, 128], strides = [1, 1]} : vector<2x128xf32> to vector<1x128xf32>
    %552 = vector.broadcast %550 : vector<16x1xf32> to vector<16x128xf32>
    %553 = vector.broadcast %551 : vector<1x128xf32> to vector<16x128xf32>
    %554 = arith.mulf %552, %553 : vector<16x128xf32>
    %555 = vector.extract_strided_slice %549 {offsets = [0, 1], sizes = [16, 1], strides = [1, 1]} : vector<16x2xf32> to vector<16x1xf32>
    %556 = vector.extract_strided_slice %548 {offsets = [1, 0], sizes = [1, 128], strides = [1, 1]} : vector<2x128xf32> to vector<1x128xf32>
    %557 = vector.broadcast %555 : vector<16x1xf32> to vector<16x128xf32>
    %558 = vector.broadcast %556 : vector<1x128xf32> to vector<16x128xf32>
    %559 = arith.mulf %557, %558 : vector<16x128xf32>
    %560 = arith.addf %554, %559 : vector<16x128xf32>
    %561 = math.sin %560 : vector<16x128xf32>
    %c880 = arith.constant 880 : index
    %c0_146 = arith.constant 0 : index
    %562 = vector.load %arg1[%c880, %c0_146] : memref<928x128xf32, #tpu.memory_space<vmem>>, vector<16x16xf32>
    %563 = tpu.concatenate %546, %546 in 1 : vector<16x8xf32>, vector<16x8xf32> -> vector<16x16xf32>
    %564 = arith.mulf %562, %563 : vector<16x16xf32>
    %cst_147 = arith.constant dense<0.000000e+00> : vector<16x128xf32>
    %565 = tpu.matmul %564, %561, %cst_147 {dimension_numbers = #tpu.dot_dimension_numbers<[1], [0], [0], [1], [0, 0, 1, 1], [], []>} : vector<16x16xf32>, vector<16x128xf32>, vector<16x128xf32> -> vector<16x128xf32>
    %c896 = arith.constant 896 : index
    %c0_148 = arith.constant 0 : index
    %566 = vector.load %arg1[%c896, %c0_148] : memref<928x128xf32, #tpu.memory_space<vmem>>, vector<16x128xf32>
    %567 = arith.mulf %565, %566 : vector<16x128xf32>
    %cst_149 = arith.constant dense<0.000000e+00> : vector<128xf32>
    %568 = vector.multi_reduction <add>, %567, %cst_149 [0] : vector<16x128xf32> to vector<128xf32>
    %569 = vector.shape_cast %568 : vector<128xf32> to vector<1x128xf32>
    %c912 = arith.constant 912 : index
    %c0_150 = arith.constant 0 : index
    %570 = vector.load %arg1[%c912, %c0_150] : memref<928x128xf32, #tpu.memory_space<vmem>>, vector<16x128xf32>
    %571 = arith.mulf %565, %570 : vector<16x128xf32>
    %cst_151 = arith.constant dense<0.000000e+00> : vector<128xf32>
    %572 = vector.multi_reduction <add>, %571, %cst_151 [0] : vector<16x128xf32> to vector<128xf32>
    %573 = vector.shape_cast %572 : vector<128xf32> to vector<1x128xf32>
    %574 = tpu.concatenate %569, %573 in 0 : vector<1x128xf32>, vector<1x128xf32> -> vector<2x128xf32>
    %c16_152 = arith.constant 16 : index
    %c0_153 = arith.constant 0 : index
    %575 = vector.load %arg2[%c16_152, %c0_153] : memref<18x128xf32, #tpu.memory_space<vmem>>, vector<2x128xf32>
    tpu.vector_store %arg2[%c16_152, %c0_153], %574 {strides = array<i32>} : memref<18x128xf32, #tpu.memory_space<vmem>>, vector<2x128xf32>,
    return
  }
}

</mosaic_0001>

<bundles_post_ra>
// kernel: reverse.3
= control target key start
LH: loop header
LB: loop body
LE: loop exit
PB: predicated region body
PF: predicated region fallthrough
CT: control target
= control target key end

     0   :  { %v2_v0 = vlaneseq  ;;  %s117_s0 = inlined_call_operand.vmem [shape: f32[2,8,6], index: 0, kind: input, shape index: {}]   ;;  %s118_s1 = inlined_call_operand.vmem [shape: f32[2,8,6], index: 1, kind: output, shape index: {}]  }
   0x1   :  { %v34_v2 = vld [vmem:[%s117_s0] sm:$0xff]  ;;  %v36_v3 = vld [vmem:[%s117_s0 + $0x8] sm:$0xff] }
   0x2   :  { %v3_v1 = vsub.s32 5, %v2_v0 }
   0x4   :  { %4 = vset.pattern.permute.xlu0 %v3_v1 }
   0x5   :  { %42 = vperm.xlu0 %4, %v34_v2  }
   0x9   :  { %48 = vperm.xlu0 %4, %v36_v3  }
  0x84   :  { %v43_v4 = vpop.permute.xlu0 %42 }
  0x85   :  { %81 = vst [vmem:[%s118_s1] sm:$0xff] %v43_v4 }
  0x88   :  { %v49_v5 = vpop.permute.xlu0 %48 }
  0x89   :  { %83 = vst [vmem:[%s118_s1 + $0x8] sm:$0xff] %v49_v5 }

// kernel: reverse.1
= control target key start
LH: loop header
LB: loop body
LE: loop exit
PB: predicated region body
PF: predicated region fallthrough
CT: control target
= control target key end

     0   :  { %v2_v0 = vlaneseq  ;;  %s117_s0 = inlined_call_operand.vmem [shape: f32[2,8,15], index: 0, kind: input, shape index: {}]   ;;  %s118_s1 = inlined_call_operand.vmem [shape: f32[2,8,15], index: 1, kind: output, shape index: {}]  }
   0x1   :  { %v34_v2 = vld [vmem:[%s117_s0] sm:$0xff]  ;;  %v36_v3 = vld [vmem:[%s117_s0 + $0x8] sm:$0xff] }
   0x2   :  { %v3_v1 = vsub.s32 14, %v2_v0 }
   0x4   :  { %4 = vset.pattern.permute.xlu0 %v3_v1 }
   0x5   :  { %42 = vperm.xlu0 %4, %v34_v2  }
   0x9   :  { %48 = vperm.xlu0 %4, %v36_v3  }
  0x84   :  { %v43_v4 = vpop.permute.xlu0 %42 }
  0x85   :  { %81 = vst [vmem:[%s118_s1] sm:$0xff] %v43_v4 }
  0x88   :  { %v49_v5 = vpop.permute.xlu0 %48 }
  0x89   :  { %83 = vst [vmem:[%s118_s1 + $0x8] sm:$0xff] %v49_v5 }

// kernel: ddsp_forward.1
= control target key start
LH: loop header
LB: loop body
LE: loop exit
PB: predicated region body
PF: predicated region fallthrough
CT: control target
= control target key end

     0   :  { %7 = vsyncpa [#allocation4], 0  ;;  %s4206_s9 = smov [#allocation3]   ;;  %s4722_s0 = inlined_call_operand.vmem [shape: f32[24,128], index: 0, kind: input, shape index: {}]   ;;  %s4723_s1 = inlined_call_operand.hbm [shape: f32[928,128], index: 1, kind: input, shape index: {}]   ;;  %s4724_s2 = inlined_call_operand.vmem [shape: f32[18,128], index: 2, kind: output, shape index: {}]  }
   0x1   :  { %s15_s10 = sshll.u32 %s4206_s9, 4  ;;  %s4182_s13 = scalar_lea.hbm %s4723_s1, 14848  ;;  %s16_s10 = int_to_ptr.vmem [resolvable:$true] %s15_s10 }
   0x2   :  { %p4183_p0 = scmp.ne.s32.totalorder %s4723_s1, %s4182_s13  ;;  %p4186_p1 = scmp.lt.u32.totalorder %s4182_s13, %s4723_s1 }
   0x4   :  { %p4188_p2 = pnand %p4186_p1, %p4183_p0 }
   0x6   :  { %4191 = shalt.err (!%p4188_p2)
}
   0x7   :  { %s4192_s18 = scalar_lea.vmem %s16_s10, 14848  ;;  %p4197_p4 = scmp.lt.s32.totalorder %s16_s10, %s16_s10 }
   0x8   :  { %p4193_p3 = scmp.ne.s32.totalorder %s16_s10, %s4192_s18  ;;  %p4198_p5 = scmp.lt.s32.totalorder %s4192_s18, %s4192_s18 }
   0xa   :  { %p4199_p6 = por %p4198_p5, %p4197_p4 }
   0xc   :  { %p4200_p7 = pnand %p4199_p6, %p4193_p3 }
   0xe   :  { %4203 = shalt.err (!%p4200_p7)
}
   0xf   :  { %s4207_s19 = smov 128   ;;  %s4208_s20 = smov 8  }
  0x10   :  { %21 = dma.hbm_to_vmem [thread:$0]  %s4723_s1, 14848, %s16_s10, [#allocation4], %s4207_s19, %s4207_s19, %s4208_s20  }
  0x11   :  { %4204 = dma.done.wait [#allocation4], 14848  }
  0x12   :  { %4205 = vsyncadd [#allocation4], 4294952448  ;;  %v4209_v0 = vmov 0   ;;  %v26_v1 = vld [vmem:[%s4722_s0 + $0x8] sm:$0xff]  ;;  %v25_v2 = vld [vmem:[%s4722_s0] sm:$0xff]  ;;  %v4210_v9 = vmov 1   ;;  %v55_v30 = vlaneseq }
  0x13   :  { %4063 = vset.pattern.permute.xlu1 %v4209_v0  ;;  %4061 = vset.pattern.permute.xlu0 %v4209_v0  ;;  %v28_v3 = vld [vmem:[#allocation3 + $0x150] sm:$0xff]  ;;  %v29_v4 = vld [vmem:[#allocation3 + $0x158] sm:$0xff]  ;;  %v30_v5 = vld [vmem:[#allocation3 + $0x160] sm:$0xff]  ;;  %v4211_v13 = vmov 2   ;;  %v4212_v19 = vmov 3   ;;  %vm4214_vm4 = vmmov 0  }
  0x14   :  { %52 = vperm.xlu1 %4063, %v26_v1   ;;  %47 = vperm.xlu0 %4061, %v25_v2   ;;  %v31_v6 = vld [vmem:[#allocation3 + $0x168] sm:$0xff]  ;;  %v4262_v7 = vpack.c.bf16 %v29_v4, %v28_v3  ;;  %v32_v10 = vld [vmem:[#allocation3 + $0x170] sm:$0xff]  ;;  %v33_v11 = vld [vmem:[#allocation3 + $0x178] sm:$0xff]  ;;  %v2412_v31 = vand.u32 127, %v55_v30  ;;  %v56_v34 = vshrl.u32 %v55_v30, 7  ;;  %s4216_s1 = smov 64  }
  0x15   :  { %v4265_v8 = vpack.c.bf16 %v31_v6, %v30_v5  ;;  %v4274_v12 = vpack.c.bf16 %v33_v11, %v32_v10  ;;  %v34_v14 = vld [vmem:[#allocation3 + $0x180] sm:$0xff]  ;;  %v35_v15 = vld [vmem:[#allocation3 + $0x188] sm:$0xff]  ;;  %v36_v17 = vld [vmem:[#allocation3 + $0x190] sm:$0xff]  ;;  %s4217_s27 = smov 96   ;;  %vm1051_vm7 = vcmask 254976   ;;  %vm947_vm8 = vcmask 261120  }
  0x16   :  { %3661 = vmatprep.subr.bf16.mxu0 %v4262_v7  ;;  %3693 = vmatprep.subr.bf16.mxu1 %v4262_v7  ;;  %v4279_v16 = vpack.c.bf16 %v35_v15, %v34_v14  ;;  %v37_v18 = vld [vmem:[#allocation3 + $0x198] sm:$0xff]  ;;  %v38_v21 = vld [vmem:[#allocation3 + $0x1a0] sm:$0xff]  ;;  %v39_v22 = vld [vmem:[#allocation3 + $0x1a8] sm:$0xff]  ;;  %v2413_v32 = vadd.s32 1, %v2412_v31  ;;  %v4325_v39 = vsub.s32 0, %v56_v34  ;;  %v4327_v40 = vsub.s32 1, %v56_v34 }
  0x17   :  { %3663 = vmatpush3.bf16.msra.mxu0 %v4262_v7  ;;  %3695 = vmatpush3.bf16.msra.mxu1 %v4262_v7  ;;  %v4285_v20 = vpack.c.bf16 %v37_v18, %v36_v17  ;;  %v4291_v23 = vpack.c.bf16 %v39_v22, %v38_v21  ;;  %v40_v24 = vld [vmem:[#allocation3 + $0x1b0] sm:$0xff]  ;;  %v41_v25 = vld [vmem:[#allocation3 + $0x1b8] sm:$0xff]  ;;  %v42_v27 = vld [vmem:[#allocation3 + $0x1c0] sm:$0xff]  ;;  %v87_v42 = vsub.s32 2, %v56_v34  ;;  %v103_v52 = vsub.s32 3, %v56_v34  ;;  %s4218_s28 = smov 1  }
  0x18   :  { %4064 = vset.pattern.permute.xlu1 %v4210_v9  ;;  %4062 = vset.pattern.permute.xlu0 %v4210_v9  ;;  %v4298_v26 = vpack.c.bf16 %v41_v25, %v40_v24  ;;  %v43_v28 = vld [vmem:[#allocation3 + $0x1c8] sm:$0xff]  ;;  %v2414_v33 = vcvt.s32.f32 %v2413_v32  ;;  %v44_v41 = vld [vmem:[#allocation3] sm:$0xf]  ;;  %v296_v21 = vld [vmem:[#allocation3 + $0x30] sm:$0xff]  ;;  %vm1159_vm9 = vcmask 257026   ;;  %vm1381_vm10 = vcmask 261126  }
  0x19   :  { %66 = vperm.xlu1 %4064, %v26_v1   ;;  %62 = vperm.xlu0 %4062, %v25_v2   ;;  %v4304_v29 = vpack.c.bf16 %v43_v28, %v42_v27  ;;  %v58_v45 = vrot.slane %v44_v41, %v4325_v39  ;;  %v72_v46 = vrot.slane %v44_v41, %v4327_v40  ;;  %v1819_v47 = vld [vmem:[#allocation3 + $0x2a0] sm:$0xf]  ;;  %v2912_v4 = vld [vmem:[#allocation3 + $0x8] ss:$0 sm:$0xff]  ;;  %v297_v24 = vld [vmem:[#allocation3 + $0x38] sm:$0xff]  ;;  %vm1270_vm11 = vcmask 259076  }
  0x1a   :  { %3665 = vmatprep.subr.bf16.mxu0 %v4265_v8  ;;  %3697 = vmatprep.subr.bf16.mxu1 %v4265_v8  ;;  %v4335_v48 = vrot.slane %v1819_v47, %v87_v42  ;;  %v88_v51 = vrot.slane %v44_v41, %v87_v42  ;;  %v104_v57 = vrot.slane %v44_v41, %v103_v52  ;;  %v294_v18 = vld [vmem:[#allocation3 + $0x20] sm:$0xff]  ;;  %v299_v41 = vld [vmem:[#allocation3 + $0x48] sm:$0xff]  ;;  %s4219_s4 = smov 127   ;;  %s4226_s7 = smov 7  }
  0x1b   :  { %3667 = vmatpush3.bf16.msra.mxu0 %v4265_v8  ;;  %3699 = vmatpush3.bf16.msra.mxu1 %v4265_v8  ;;  %v4342_v58 = vrot.slane %v1819_v47, %v103_v52  ;;  %v3728_v25 = vpack.c.bf16 %v297_v24, %v296_v21  ;;  %v298_v34 = vld [vmem:[#allocation3 + $0x40] sm:$0xff] }
  0x1c   :  { %3669 = vmatprep.subr.bf16.mxu0 %v4274_v12  ;;  %3701 = vmatprep.subr.bf16.mxu1 %v4274_v12  ;;  %v3732_v42 = vpack.c.bf16 %v299_v41, %v298_v34  ;;  %v568_v41 = vld [vmem:[#allocation3 + $0xb8] sm:$0xff] }
  0x1d   :  { %4065 = vset.pattern.permute.xlu1 %v4211_v13  ;;  %4066 = vset.pattern.permute.xlu0 %v4211_v13 }
  0x1e   :  { %78 = vperm.xlu1 %4065, %v25_v2   ;;  %82 = vperm.xlu0 %4066, %v26_v1  }
  0x1f   :  { %3671 = vmatpush3.bf16.msra.mxu0 %v4274_v12  ;;  %3703 = vmatpush3.bf16.msra.mxu1 %v4274_v12 }
  0x20   :  { %3673 = vmatprep.subr.bf16.mxu0 %v4279_v16  ;;  %3705 = vmatprep.subr.bf16.mxu1 %v4279_v16 }
  0x22   :  { %4067 = vset.pattern.permute.xlu1 %v4212_v19  ;;  %4069 = vset.pattern.permute.xlu0 %v4209_v0  ;;  %v295_v19 = vld [vmem:[#allocation3 + $0x28] sm:$0xff] }
  0x23   :  { %94 = vperm.xlu1 %4067, %v25_v2   ;;  %3675 = vmatpush3.bf16.msra.mxu0 %v4279_v16  ;;  %v3724_v22 = vpack.c.bf16 %v295_v19, %v294_v18 }
  0x24   :  { %3677 = vmatprep.subr.bf16.mxu0 %v4285_v20  ;;  %3707 = vmatpush3.bf16.msra.mxu1 %v4279_v16 }
  0x25   :  { %3709 = vmatprep.subr.bf16.mxu1 %v4285_v20 }
  0x27   :  { %98 = vperm.xlu1 %4067, %v26_v1   ;;  %3679 = vmatpush3.bf16.msra.mxu0 %v4285_v20 }
  0x28   :  { %3681 = vmatprep.subr.bf16.mxu0 %v4291_v23  ;;  %3711 = vmatpush3.bf16.msra.mxu1 %v4285_v20 }
  0x29   :  { %3713 = vmatprep.subr.bf16.mxu1 %v4291_v23 }
  0x2b   :  { %4068 = vset.pattern.permute.xlu1 %v4209_v0  ;;  %3683 = vmatpush3.bf16.msra.mxu0 %v4291_v23 }
  0x2c   :  { %3685 = vmatprep.subr.bf16.mxu0 %v4298_v26  ;;  %3715 = vmatpush3.bf16.msra.mxu1 %v4291_v23 }
  0x2d   :  { %3717 = vmatprep.subr.bf16.mxu1 %v4298_v26 }
  0x2f   :  { %3687 = vmatpush3.bf16.msra.mxu0 %v4298_v26 }
  0x30   :  { %3689 = vmatprep.subr.bf16.mxu0 %v4304_v29  ;;  %3719 = vmatpush3.bf16.msra.mxu1 %v4298_v26 }
  0x31   :  { %3721 = vmatprep.subr.bf16.mxu1 %v4304_v29 }
  0x33   :  { %3691 = vmatpush3.bf16.msra.mxu0 %v4304_v29 }
  0x34   :  { %3723 = vmatpush3.bf16.msra.mxu1 %v4304_v29  ;;  %3725 = vmatprep.subr.bf16.mxu0 %v3724_v22 }
  0x35   :  { %3757 = vmatprep.subr.bf16.mxu1 %v4262_v7 }
  0x93   :  { %v4315_v35 = vpop.permute.xlu1 %52  ;;  %v4317_v36 = vpop.permute.xlu0 %47 }
  0x94   :  { %v4320_v37 = vmul.f32 %v2414_v33, %v4315_v35  ;;  %v4323_v38 = vmul.f32 %v2414_v33, %v4317_v36  ;;  %v59_v49 = vmul.f32 %v58_v45, %v4317_v36  ;;  %v60_v61 = vmul.f32 %v58_v45, %v4315_v35  ;;  %v300_v45 = vld [vmem:[#allocation3 + $0x50] sm:$0xff] }
  0x98   :  { %v4329_v43 = vpop.permute.xlu1 %66  ;;  %v4331_v44 = vpop.permute.xlu0 %62 }
  0x99   :  { %v73_v50 = vmul.f32 %v72_v46, %v4331_v44  ;;  %v74_v60 = vmul.f32 %v72_v46, %v4329_v43  ;;  %v301_v46 = vld [vmem:[#allocation3 + $0x58] sm:$0xff] }
  0x9a   :  { %v3736_v47 = vpack.c.bf16 %v301_v46, %v300_v45  ;;  %v570_v45 = vld [vmem:[#allocation3 + $0xc8] sm:$0xff] }
  0x9b   :  { %v75_v55 = vadd.f32 %v73_v50, %v59_v49  ;;  %v76_v5 = vadd.f32 %v74_v60, %v60_v61  ;;  %v302_v49 = vld [vmem:[#allocation3 + $0x60] sm:$0xff]  ;;  %v303_v50 = vld [vmem:[#allocation3 + $0x68] sm:$0xff]  ;;  %v308_v61 = vld [vmem:[#allocation3 + $0x90] sm:$0xff] }
  0x9c   :  { %v3740_v52 = vpack.c.bf16 %v303_v50, %v302_v49 }
  0x9d   :  { %v79_v53 = vpop.permute.xlu1 %78  ;;  %v4344_v59 = vpop.permute.xlu0 %82 }
  0x9e   :  { %v4340_v54 = vmul.f32 %v4335_v48, %v79_v53  ;;  %v89_v56 = vmul.f32 %v88_v51, %v79_v53  ;;  %v90_v1 = vmul.f32 %v88_v51, %v4344_v59  ;;  %v304_v51 = vld [vmem:[#allocation3 + $0x70] sm:$0xff]  ;;  %v305_v53 = vld [vmem:[#allocation3 + $0x78] sm:$0xff] }
  0xa0   :  { %v91_v63 = vadd.f32 %v89_v56, %v75_v55  ;;  %v92_v11 = vadd.f32 %v90_v1, %v76_v5  ;;  %v3744_v55 = vpack.c.bf16 %v305_v53, %v304_v51  ;;  %v306_v56 = vld [vmem:[#allocation3 + $0x80] sm:$0xff] }
  0xa2   :  { %v95_v62 = vpop.permute.xlu1 %94 }
  0xa3   :  { %v105_v2 = vmul.f32 %v104_v57, %v95_v62  ;;  %v4350_v3 = vmul.f32 %v4342_v58, %v95_v62  ;;  %v309_v62 = vld [vmem:[#allocation3 + $0x98] sm:$0xff] }
  0xa5   :  { %v107_v6 = vadd.f32 %v105_v2, %v91_v63  ;;  %v3752_v63 = vpack.c.bf16 %v309_v62, %v308_v61  ;;  %v574_v62 = vld [vmem:[#allocation3 + $0xe8] sm:$0xff] }
  0xa6   :  { %v4352_v10 = vpop.permute.xlu1 %98 }
  0xa7   :  { %v106_v13 = vmul.f32 %v104_v57, %v4352_v10  ;;  %v114_v14 = vadd.f32 %v2912_v4, %v107_v6  ;;  %v307_v57 = vld [vmem:[#allocation3 + $0x88] sm:$0xff] }
  0xa8   :  { %v3748_v60 = vpack.c.bf16 %v307_v57, %v306_v56  ;;  %v572_v57 = vld [vmem:[#allocation3 + $0xd8] sm:$0xff] }
  0xa9   :  { %v108_v15 = vadd.f32 %v106_v13, %v92_v11  ;;  %3233 = vmatprep.mubr.f32.mxu0 %v114_v14  ;;  %v2913_v11 = vld [vmem:[#allocation3 + $0x10] ss:$0 sm:$0xff] }
  0xab   :  { %v115_v17 = vadd.f32 %v2912_v4, %v108_v15  ;;  %v2914_v15 = vld [vmem:[#allocation3 + $0x18] ss:$0 sm:$0xff] }
  0xad   :  { %3234 = vmatmul.mubr.f32.vlgmr.msra.gmra.mrb[0].mxu0 %v115_v17 }
  0xae   :  { %3727 = vmatpush3.bf16.msra.mxu0 %v3724_v22 }
  0xaf   :  { %3729 = vmatprep.subr.bf16.mxu0 %v3728_v25 }
  0xb2   :  { %3731 = vmatpush3.bf16.msra.mxu0 %v3728_v25 }
  0xb3   :  { %3733 = vmatprep.subr.bf16.mxu0 %v3732_v42 }
  0xb6   :  { %3735 = vmatpush3.bf16.msra.mxu0 %v3732_v42  ;;  %v569_v42 = vld [vmem:[#allocation3 + $0xc0] sm:$0xff] }
  0xb7   :  { %3737 = vmatprep.subr.bf16.mxu0 %v3736_v47  ;;  %v3820_v46 = vpack.c.bf16 %v569_v42, %v568_v41 }
  0xba   :  { %3739 = vmatpush3.bf16.msra.mxu0 %v3736_v47  ;;  %v571_v47 = vld [vmem:[#allocation3 + $0xd0] sm:$0xff] }
  0xbb   :  { %3741 = vmatprep.subr.bf16.mxu0 %v3740_v52  ;;  %v3824_v49 = vpack.c.bf16 %v571_v47, %v570_v45 }
  0xbe   :  { %3743 = vmatpush3.bf16.msra.mxu0 %v3740_v52 }
  0xbf   :  { %3745 = vmatprep.subr.bf16.mxu0 %v3744_v55 }
  0xc2   :  { %3747 = vmatpush3.bf16.msra.mxu0 %v3744_v55 }
  0xc3   :  { %3749 = vmatprep.subr.bf16.mxu0 %v3748_v60 }
  0xc6   :  { %3751 = vmatpush3.bf16.msra.mxu0 %v3748_v60  ;;  %v573_v60 = vld [vmem:[#allocation3 + $0xe0] sm:$0xff] }
  0xc7   :  { %3753 = vmatprep.subr.bf16.mxu0 %v3752_v63  ;;  %v3828_v61 = vpack.c.bf16 %v573_v60, %v572_v57  ;;  %v845_v57 = vld [vmem:[#allocation3 + $0x1e8] sm:$0xff] }
  0xca   :  { %3755 = vmatpush3.bf16.msra.mxu0 %v3752_v63  ;;  %v575_v63 = vld [vmem:[#allocation3 + $0xf0] sm:$0xff] }
  0xcb   :  { %3789 = vmatprep.subr.bf16.mxu0 %v4262_v7 }
 0x180   :  { %v3235_v27 = vpop.f32.mrb[0].mxu0 }
 0x181   :  { %v194_v28 = vsub.f32 %v115_v17, %v3235_v27  ;;  %v184_v30 = vpop.f32.mrb[1].mxu0 }
 0x182   :  { %v193_v31 = vsub.f32 %v114_v14, %v184_v30 }
 0x183   :  { %v196_v33 = vmul.f32 %v194_v28, %v194_v28 }
 0x184   :  { %v195_v32 = vmul.f32 %v193_v31, %v193_v31 }
 0x186   :  { %3268 = vmatprep.mubr.f32.mxu1 %v195_v32 }
 0x187   :  { %3269 = vmatmul.mubr.f32.vlgmr.msra.gmra.mrb[0].mxu1 %v196_v33 }
 0x188   :  { %3759 = vmatpush3.bf16.msra.mxu1 %v4262_v7 }
 0x189   :  { %3761 = vmatprep.subr.bf16.mxu1 %v4265_v8 }
 0x18c   :  { %3763 = vmatpush3.bf16.msra.mxu1 %v4265_v8 }
 0x18d   :  { %3765 = vmatprep.subr.bf16.mxu1 %v4274_v12 }
 0x190   :  { %3767 = vmatpush3.bf16.msra.mxu1 %v4274_v12 }
 0x191   :  { %3769 = vmatprep.subr.bf16.mxu1 %v4279_v16 }
 0x194   :  { %3771 = vmatpush3.bf16.msra.mxu1 %v4279_v16 }
 0x195   :  { %3773 = vmatprep.subr.bf16.mxu1 %v4285_v20 }
 0x198   :  { %3775 = vmatpush3.bf16.msra.mxu1 %v4285_v20 }
 0x199   :  { %3777 = vmatprep.subr.bf16.mxu1 %v4291_v23 }
 0x19c   :  { %3779 = vmatpush3.bf16.msra.mxu1 %v4291_v23 }
 0x19d   :  { %3781 = vmatprep.subr.bf16.mxu1 %v4298_v26 }
 0x1a0   :  { %3783 = vmatpush3.bf16.msra.mxu1 %v4298_v26 }
 0x1a1   :  { %3785 = vmatprep.subr.bf16.mxu1 %v4304_v29 }
 0x1a4   :  { %3787 = vmatpush3.bf16.msra.mxu1 %v4304_v29 }
 0x1a5   :  { %3821 = vmatprep.subr.bf16.mxu1 %v3820_v46 }
 0x25a   :  { %v3270_v1 = vpop.f32.mrb[0].mxu1 }
 0x25b   :  { %v269_v2 = vadd.f32 1e-05, %v3270_v1  ;;  %v263_v4 = vpop.f32.mrb[1].mxu1  ;;  %v3832_v1 = vpack.c.bf16 %v575_v63, %v574_v62  ;;  %v938_v62 = vld [vmem:[#allocation3 + $0x250] sm:$0xff]  ;;  %v939_v63 = vld [vmem:[#allocation3 + $0x258] sm:$0xff] }
 0x25c   :  { %v264_v5 = vadd.f32 1e-05, %v263_v4  ;;  %v577_v4 = vld [vmem:[#allocation3 + $0x100] sm:$0xff] }
 0x25d   :  { %4073 = vrsqrt.f32 %v269_v2  ;;  %v576_v2 = vld [vmem:[#allocation3 + $0xf8] sm:$0xff] }
 0x25e   :  { %4075 = vrsqrt.f32 %v264_v5  ;;  %v578_v5 = vld [vmem:[#allocation3 + $0x108] sm:$0xff] }
 0x267   :  { %v4074_v6 = vpop.eup %4073 }
 0x268   :  { %v4076_v13 = vpop.eup %4075  ;;  %v275_v14 = vmul.f32 %v4074_v6, %v194_v28  ;;  %v2915_v28 = vld [vmem:[#allocation3 + $0xa0] ss:$0 sm:$0xff]  ;;  %v3836_v6 = vpack.c.bf16 %v577_v4, %v576_v2  ;;  %v4425_v4 = vpack.c.bf16 %v939_v63, %v938_v62 }
 0x269   :  { %v274_v17 = vmul.f32 %v4076_v13, %v193_v31 }
 0x26a   :  { %v281_v18 = vmul.f32 %v2913_v11, %v275_v14  ;;  %v580_v14 = vld [vmem:[#allocation3 + $0x118] sm:$0xff] }
 0x26b   :  { %v280_v19 = vmul.f32 %v2913_v11, %v274_v17  ;;  %v579_v11 = vld [vmem:[#allocation3 + $0x110] sm:$0xff] }
 0x26c   :  { %v287_v21 = vadd.f32 %v2914_v15, %v281_v18  ;;  %v3840_v13 = vpack.c.bf16 %v579_v11, %v578_v5  ;;  %v582_v18 = vld [vmem:[#allocation3 + $0x128] sm:$0xff] }
 0x26d   :  { %v286_v22 = vadd.f32 %v2914_v15, %v280_v19  ;;  %v581_v15 = vld [vmem:[#allocation3 + $0x120] sm:$0xff]  ;;  %v583_v19 = vld [vmem:[#allocation3 + $0x130] sm:$0xff]  ;;  %v941_v11 = vld [vmem:[#allocation3 + $0x268] sm:$0xff] }
 0x26e   :  { %v291_v24 = vmul.f32 0.01, %v287_v21  ;;  %vm289_vm1 = vcmp.ge.f32.partialorder %v287_v21, 0.0  ;;  %v3844_v17 = vpack.c.bf16 %v581_v15, %v580_v14  ;;  %v4215_v14 = vmov 0.0   ;;  %v846_v15 = vld [vmem:[#allocation3 + $0x1f0] sm:$0xff] }
 0x26f   :  { %vm288_vm0 = vcmp.ge.f32.partialorder %v286_v22, 0.0  ;;  %v290_v25 = vmul.f32 0.01, %v286_v22 }
 0x270   :  { %v293_v30 = vsel %vm289_vm1, %v287_v21, %v291_v24  ;;  %v3848_v21 = vpack.c.bf16 %v583_v19, %v582_v18  ;;  %v848_v19 = vld [vmem:[#allocation3 + $0x200] sm:$0xff]  ;;  %vm2417_vm1 = vcmp.lt.f32.partialorder %v4323_v38, 32.0 }
 0x271   :  { %v292_v27 = vsel %vm288_vm0, %v286_v22, %v290_v25  ;;  %vm2418_vm0 = vcmp.lt.f32.partialorder %v4320_v37, 32.0  ;;  %v2464_v37 = vld [vmem:[#allocation3 + $0x358] sm:$0xff]  ;;  %v27_v38 = vld [vmem:[%s4722_s0 + $0x10] sm:$0x3] }
 0x272   :  { %3303 = vmatprep.mubr.f32.mxu0 %v292_v27 }
 0x273   :  { %3304 = vmatmul.mubr.f32.vlgmr.msra.gmra.mrb[2].mxu0 %v293_v30 }
 0x274   :  { %3791 = vmatpush3.bf16.msra.mxu0 %v4262_v7 }
 0x275   :  { %3793 = vmatprep.subr.bf16.mxu0 %v4265_v8 }
 0x278   :  { %3795 = vmatpush3.bf16.msra.mxu0 %v4265_v8 }
 0x279   :  { %3797 = vmatprep.subr.bf16.mxu0 %v4274_v12 }
 0x27c   :  { %3799 = vmatpush3.bf16.msra.mxu0 %v4274_v12 }
 0x27d   :  { %3801 = vmatprep.subr.bf16.mxu0 %v4279_v16 }
 0x280   :  { %3803 = vmatpush3.bf16.msra.mxu0 %v4279_v16 }
 0x281   :  { %3805 = vmatprep.subr.bf16.mxu0 %v4285_v20 }
 0x284   :  { %3807 = vmatpush3.bf16.msra.mxu0 %v4285_v20 }
 0x285   :  { %3809 = vmatprep.subr.bf16.mxu0 %v4291_v23 }
 0x288   :  { %3811 = vmatpush3.bf16.msra.mxu0 %v4291_v23 }
 0x289   :  { %3813 = vmatprep.subr.bf16.mxu0 %v4298_v26 }
 0x28c   :  { %3815 = vmatpush3.bf16.msra.mxu0 %v4298_v26 }
 0x28d   :  { %3817 = vmatprep.subr.bf16.mxu0 %v4304_v29 }
 0x290   :  { %3819 = vmatpush3.bf16.msra.mxu0 %v4304_v29 }
 0x291   :  { %3853 = vmatprep.subr.bf16.mxu0 %v4262_v7 }
 0x346   :  { %v3305_v31 = vpop.f32.mrb[2].mxu0 }
 0x347   :  { %v381_v32 = vpop.f32.mrb[3].mxu0  ;;  %v387_v34 = vadd.f32 %v3305_v31, %v2915_v28 }
 0x348   :  { %v382_v33 = vadd.f32 %v2915_v28, %v381_v32  ;;  %v2916_v28 = vld [vmem:[#allocation3 + $0xa8] ss:$0 sm:$0xff] }
 0x34a   :  { %3338 = vmatprep.mubr.f32.mxu1 %v382_v33 }
 0x34b   :  { %3339 = vmatmul.mubr.f32.vlgmr.msra.gmra.mrb[2].mxu1 %v387_v34 }
 0x34c   :  { %3823 = vmatpush3.bf16.msra.mxu1 %v3820_v46 }
 0x34d   :  { %3825 = vmatprep.subr.bf16.mxu1 %v3824_v49 }
 0x350   :  { %3827 = vmatpush3.bf16.msra.mxu1 %v3824_v49 }
 0x351   :  { %3829 = vmatprep.subr.bf16.mxu1 %v3828_v61 }
 0x354   :  { %3831 = vmatpush3.bf16.msra.mxu1 %v3828_v61 }
 0x355   :  { %3833 = vmatprep.subr.bf16.mxu1 %v3832_v1 }
 0x358   :  { %3835 = vmatpush3.bf16.msra.mxu1 %v3832_v1 }
 0x359   :  { %3837 = vmatprep.subr.bf16.mxu1 %v3836_v6 }
 0x35c   :  { %3839 = vmatpush3.bf16.msra.mxu1 %v3836_v6  ;;  %v940_v6 = vld [vmem:[#allocation3 + $0x260] sm:$0xff] }
 0x35d   :  { %3841 = vmatprep.subr.bf16.mxu1 %v3840_v13 }
 0x360   :  { %3843 = vmatpush3.bf16.msra.mxu1 %v3840_v13  ;;  %v4430_v13 = vpack.c.bf16 %v941_v11, %v940_v6 }
 0x361   :  { %3845 = vmatprep.subr.bf16.mxu1 %v3844_v17 }
 0x364   :  { %3847 = vmatpush3.bf16.msra.mxu1 %v3844_v17  ;;  %v847_v17 = vld [vmem:[#allocation3 + $0x1f8] sm:$0xff] }
 0x365   :  { %3849 = vmatprep.subr.bf16.mxu1 %v3848_v21  ;;  %v3924_v18 = vpack.c.bf16 %v847_v17, %v846_v15 }
 0x368   :  { %3851 = vmatpush3.bf16.msra.mxu1 %v3848_v21  ;;  %v849_v21 = vld [vmem:[#allocation3 + $0x208] sm:$0xff] }
 0x369   :  { %3885 = vmatprep.subr.bf16.mxu1 %v4262_v7 }
 0x41e   :  { %v3340_v50 = vpop.f32.mrb[2].mxu1 }
 0x41f   :  { %v468_v51 = vsub.f32 %v387_v34, %v3340_v50  ;;  %v458_v52 = vpop.f32.mrb[3].mxu1 }
 0x420   :  { %v467_v53 = vsub.f32 %v382_v33, %v458_v52  ;;  %v2917_v33 = vld [vmem:[#allocation3 + $0xb0] ss:$0 sm:$0xff] }
 0x421   :  { %v470_v56 = vmul.f32 %v468_v51, %v468_v51 }
 0x422   :  { %v469_v55 = vmul.f32 %v467_v53, %v467_v53 }
 0x424   :  { %3373 = vmatprep.mubr.f32.mxu0 %v469_v55  ;;  %v844_v55 = vld [vmem:[#allocation3 + $0x1e0] sm:$0xff] }
 0x425   :  { %3374 = vmatmul.mubr.f32.vlgmr.msra.gmra.mrb[4].mxu0 %v470_v56 }
 0x426   :  { %3855 = vmatpush3.bf16.msra.mxu0 %v4262_v7 }
 0x427   :  { %3857 = vmatprep.subr.bf16.mxu0 %v4265_v8 }
 0x42a   :  { %3859 = vmatpush3.bf16.msra.mxu0 %v4265_v8 }
 0x42b   :  { %3861 = vmatprep.subr.bf16.mxu0 %v4274_v12 }
 0x42e   :  { %3863 = vmatpush3.bf16.msra.mxu0 %v4274_v12 }
 0x42f   :  { %3865 = vmatprep.subr.bf16.mxu0 %v4279_v16 }
 0x432   :  { %3867 = vmatpush3.bf16.msra.mxu0 %v4279_v16 }
 0x433   :  { %3869 = vmatprep.subr.bf16.mxu0 %v4285_v20 }
 0x436   :  { %3871 = vmatpush3.bf16.msra.mxu0 %v4285_v20 }
 0x437   :  { %3873 = vmatprep.subr.bf16.mxu0 %v4291_v23 }
 0x43a   :  { %3875 = vmatpush3.bf16.msra.mxu0 %v4291_v23 }
 0x43b   :  { %3877 = vmatprep.subr.bf16.mxu0 %v4298_v26 }
 0x43e   :  { %3879 = vmatpush3.bf16.msra.mxu0 %v4298_v26 }
 0x43f   :  { %3881 = vmatprep.subr.bf16.mxu0 %v4304_v29 }
 0x442   :  { %3883 = vmatpush3.bf16.msra.mxu0 %v4304_v29 }
 0x4f8   :  { %v3375_v22 = vpop.f32.mrb[4].mxu0 }
 0x4f9   :  { %v543_v24 = vadd.f32 1e-05, %v3375_v22  ;;  %v537_v25 = vpop.f32.mrb[5].mxu0  ;;  %v3928_v22 = vpack.c.bf16 %v849_v21, %v848_v19 }
 0x4fa   :  { %v538_v27 = vadd.f32 1e-05, %v537_v25  ;;  %v851_v25 = vld [vmem:[#allocation3 + $0x218] sm:$0xff] }
 0x4fb   :  { %4077 = vrsqrt.f32 %v543_v24  ;;  %v850_v24 = vld [vmem:[#allocation3 + $0x210] sm:$0xff] }
 0x4fc   :  { %4079 = vrsqrt.f32 %v538_v27  ;;  %v852_v27 = vld [vmem:[#allocation3 + $0x220] sm:$0xff] }
 0x505   :  { %v4078_v30 = vpop.eup %4077 }
 0x506   :  { %v4080_v31 = vpop.eup %4079  ;;  %v549_v32 = vmul.f32 %v4078_v30, %v468_v51  ;;  %v3932_v30 = vpack.c.bf16 %v851_v25, %v850_v24 }
 0x507   :  { %v548_v34 = vmul.f32 %v4080_v31, %v467_v53  ;;  %v842_v53 = vld [vmem:[#allocation3 + $0x1d0] sm:$0xff] }
 0x508   :  { %v555_v41 = vmul.f32 %v2916_v28, %v549_v32  ;;  %v854_v32 = vld [vmem:[#allocation3 + $0x230] sm:$0xff] }
 0x509   :  { %v554_v42 = vmul.f32 %v2916_v28, %v548_v34  ;;  %v853_v28 = vld [vmem:[#allocation3 + $0x228] sm:$0xff] }
 0x50a   :  { %v561_v45 = vadd.f32 %v2917_v33, %v555_v41  ;;  %v3936_v31 = vpack.c.bf16 %v853_v28, %v852_v27  ;;  %v856_v41 = vld [vmem:[#allocation3 + $0x240] sm:$0xff] }
 0x50b   :  { %v560_v46 = vadd.f32 %v2917_v33, %v554_v42  ;;  %v855_v33 = vld [vmem:[#allocation3 + $0x238] sm:$0xff]  ;;  %v857_v42 = vld [vmem:[#allocation3 + $0x248] sm:$0xff] }
 0x50c   :  { %v565_v47 = vmul.f32 0.01, %v561_v45  ;;  %vm563_vm3 = vcmp.ge.f32.partialorder %v561_v45, 0.0  ;;  %v3940_v34 = vpack.c.bf16 %v855_v33, %v854_v32 }
 0x50d   :  { %vm562_vm2 = vcmp.ge.f32.partialorder %v560_v46, 0.0  ;;  %v564_v49 = vmul.f32 0.01, %v560_v46 }
 0x50e   :  { %v567_v52 = vsel %vm563_vm3, %v561_v45, %v565_v47  ;;  %v3944_v45 = vpack.c.bf16 %v857_v42, %v856_v41 }
 0x50f   :  { %v566_v50 = vsel %vm562_vm2, %v560_v46, %v564_v49  ;;  %vm2441_vm2 = vcmask 64512  }
 0x510   :  { %3408 = vmatprep.mubr.f32.mxu1 %v566_v50 }
 0x511   :  { %3409 = vmatmul.mubr.f32.vlgmr.msra.gmra.mrb[4].mxu1 %v567_v52  ;;  %v4445_v52 = vld [vmem:[#allocation3 + $0x278] ss:$0 sm:$0xff] }
 0x512   :  { %3887 = vmatpush3.bf16.msra.mxu1 %v4262_v7  ;;  %v2918_v7 = vld [vmem:[#allocation3 + $0x138] ss:$0 sm:$0xff] }
 0x513   :  { %3889 = vmatprep.subr.bf16.mxu1 %v4265_v8 }
 0x516   :  { %3891 = vmatpush3.bf16.msra.mxu1 %v4265_v8 }
 0x517   :  { %3893 = vmatprep.subr.bf16.mxu1 %v4274_v12 }
 0x51a   :  { %3895 = vmatpush3.bf16.msra.mxu1 %v4274_v12 }
 0x51b   :  { %3897 = vmatprep.subr.bf16.mxu1 %v4279_v16 }
 0x51e   :  { %3899 = vmatpush3.bf16.msra.mxu1 %v4279_v16 }
 0x51f   :  { %3901 = vmatprep.subr.bf16.mxu1 %v4285_v20 }
 0x522   :  { %3903 = vmatpush3.bf16.msra.mxu1 %v4285_v20  ;;  %v4213_v20 = vmov 0.0|0.0  }
 0x523   :  { %3905 = vmatprep.subr.bf16.mxu1 %v4291_v23 }
 0x526   :  { %3907 = vmatpush3.bf16.msra.mxu1 %v4291_v23  ;;  %v843_v23 = vld [vmem:[#allocation3 + $0x1d8] sm:$0xff] }
 0x527   :  { %3909 = vmatprep.subr.bf16.mxu1 %v4298_v26  ;;  %v3916_v56 = vpack.c.bf16 %v843_v23, %v842_v53 }
 0x529   :  { %3917 = vmatprep.subr.bf16.mxu0 %v3916_v56 }
 0x52a   :  { %3911 = vmatpush3.bf16.msra.mxu1 %v4298_v26  ;;  %v3920_v26 = vpack.c.bf16 %v845_v57, %v844_v55  ;;  %v2920_v55 = vld [vmem:[#allocation3 + $0x148] ss:$0 sm:$0xff] }
 0x52b   :  { %3913 = vmatprep.subr.bf16.mxu1 %v4304_v29 }
 0x52e   :  { %3915 = vmatpush3.bf16.msra.mxu1 %v4304_v29 }
 0x52f   :  { %3948 = vmatprep.subr.bf16.mxu1 %v4213_v20 }
 0x5e4   :  { %v3410_v8 = vpop.f32.mrb[4].mxu1 }
 0x5e5   :  { %v655_v12 = vpop.f32.mrb[5].mxu1  ;;  %v661_v51 = vadd.f32 %v3410_v8, %v2918_v7 }
 0x5e6   :  { %v656_v16 = vadd.f32 %v2918_v7, %v655_v12 }
 0x5e8   :  { %3443 = vmatprep.mubr.f32.mxu0 %v656_v16 }
 0x5e9   :  { %3444 = vmatmul.mubr.f32.vlgmr.msra.gmra.mrb[6].mxu0 %v661_v51 }
 0x5ea   :  { %3919 = vmatpush3.bf16.msra.mxu0 %v3916_v56 }
 0x5eb   :  { %3921 = vmatprep.subr.bf16.mxu0 %v3920_v26 }
 0x5ee   :  { %3923 = vmatpush3.bf16.msra.mxu0 %v3920_v26 }
 0x5ef   :  { %3925 = vmatprep.subr.bf16.mxu0 %v3924_v18 }
 0x5f2   :  { %3927 = vmatpush3.bf16.msra.mxu0 %v3924_v18 }
 0x5f3   :  { %3929 = vmatprep.subr.bf16.mxu0 %v3928_v22 }
 0x5f6   :  { %3931 = vmatpush3.bf16.msra.mxu0 %v3928_v22 }
 0x5f7   :  { %3933 = vmatprep.subr.bf16.mxu0 %v3932_v30 }
 0x5fa   :  { %3935 = vmatpush3.bf16.msra.mxu0 %v3932_v30 }
 0x5fb   :  { %3937 = vmatprep.subr.bf16.mxu0 %v3936_v31 }
 0x5fe   :  { %3939 = vmatpush3.bf16.msra.mxu0 %v3936_v31 }
 0x5ff   :  { %3941 = vmatprep.subr.bf16.mxu0 %v3940_v34 }
 0x602   :  { %3943 = vmatpush3.bf16.msra.mxu0 %v3940_v34 }
 0x603   :  { %3945 = vmatprep.subr.bf16.mxu0 %v3944_v45 }
 0x606   :  { %3947 = vmatpush3.bf16.msra.mxu0 %v3944_v45 }
 0x607   :  { %3972 = vmatprep.subr.bf16.mxu0 %v4213_v20 }
 0x6bc   :  { %v3445_v29 = vpop.f32.mrb[6].mxu0 }
 0x6bd   :  { %v4419_v60 = vsub.f32 %v661_v51, %v3445_v29  ;;  %v732_v61 = vpop.f32.mrb[7].mxu0  ;;  %v2919_v51 = vld [vmem:[#allocation3 + $0x140] ss:$0 sm:$0xff] }
 0x6be   :  { %v4421_v1 = vsub.f32 %v656_v16, %v732_v61 }
 0x6bf   :  { %v744_v5 = vmul.f32 %v4419_v60, %v4419_v60 }
 0x6c0   :  { %v743_v2 = vmul.f32 %v4421_v1, %v4421_v1 }
 0x6c2   :  { %3478 = vmatprep.mubr.f32.mxu1 %v743_v2 }
 0x6c3   :  { %3479 = vmatmul.mubr.f32.vlgmr.msra.gmra.mrb[6].mxu1 %v744_v5 }
 0x6c4   :  { %3950 = vmatpush3.bf16.msra.mxu1 %v4425_v4  ;;  %3524 = vmatprep.mubr.msk.f32.mxu1 %vm4214_vm4, %v4215_v14 }
 0x6c5   :  { %3951 = vmatprep.subr.bf16.mxu1 %v4213_v20 }
 0x6c8   :  { %3953 = vmatpush3.bf16.msra.mxu1 %v4430_v13 }
 0x6c9   :  { %3954 = vmatprep.subr.bf16.mxu1 %v4213_v20 }
 0x6cb   :  { %3525 = vmatmul.mubr.f32.vlgmr.msra.gmra.mrb[8].mxu1 %v4215_v14 }
 0x6cc   :  { %3956 = vmatpush3.bf16.msra.mxu1 %v4425_v4  ;;  %3535 = vmatprep.mubr.msk.f32.mxu1 %vm4214_vm4, %v4215_v14 }
 0x6cd   :  { %3957 = vmatprep.subr.bf16.mxu1 %v4213_v20 }
 0x6d0   :  { %3959 = vmatpush3.bf16.msra.mxu1 %v4430_v13 }
 0x6d1   :  { %3960 = vmatprep.subr.bf16.mxu1 %v4213_v20 }
 0x796   :  { %v3480_v46 = vpop.f32.mrb[6].mxu1 }
 0x797   :  { %v817_v47 = vadd.f32 1e-05, %v3480_v46  ;;  %v811_v49 = vpop.f32.mrb[7].mxu1 }
 0x798   :  { %v812_v50 = vadd.f32 1e-05, %v811_v49 }
 0x799   :  { %4081 = vrsqrt.f32 %v817_v47 }
 0x79a   :  { %4083 = vrsqrt.f32 %v812_v50 }
 0x79e   :  { %v1017_v7 = vpop.f32.mrb[8].mxu1 }
 0x79f   :  { %v1018_v8 = vadd.f32 %v4445_v52, %v1017_v7  ;;  %v3526_v12 = vpop.f32.mrb[9].mxu1 }
 0x7a1   :  { %1029 = vrot.lane.b32.xlu0 %v1018_v8, %s4216_s1 }
 0x7a3   :  { %v4082_v16 = vpop.eup %4081 }
 0x7a4   :  { %v4084_v53 = vpop.eup %4083  ;;  %v823_v23 = vmul.f32 %v4082_v16, %v4419_v60  ;;  %v2921_v60 = vld [vmem:[#allocation3 + $0x270] ss:$0 sm:$0xff] }
 0x7a5   :  { %v822_v56 = vmul.f32 %v4084_v53, %v4421_v1 }
 0x7a6   :  { %v829_v57 = vmul.f32 %v2919_v51, %v823_v23 }
 0x7a7   :  { %v828_v26 = vmul.f32 %v2919_v51, %v822_v56 }
 0x7a8   :  { %v835_v29 = vadd.f32 %v2920_v55, %v829_v57 }
 0x7a9   :  { %v834_v61 = vadd.f32 %v2920_v55, %v828_v26 }
 0x7aa   :  { %v839_v62 = vmul.f32 0.01, %v835_v29  ;;  %vm837_vm6 = vcmp.ge.f32.partialorder %v835_v29, 0.0 }
 0x7ab   :  { %vm836_vm5 = vcmp.ge.f32.partialorder %v834_v61, 0.0  ;;  %v838_v63 = vmul.f32 0.01, %v834_v61 }
 0x7ac   :  { %v841_v5 = vsel %vm837_vm6, %v835_v29, %v839_v62 }
 0x7ad   :  { %v840_v2 = vsel %vm836_vm5, %v834_v61, %v838_v63 }
 0x7ae   :  { %3513 = vmatprep.mubr.f32.mxu0 %v840_v2 }
 0x7af   :  { %3514 = vmatmul.mubr.f32.vlgmr.msra.gmra.mrb[8].mxu0 %v841_v5 }
 0x7b0   :  { %3974 = vmatpush3.bf16.msra.mxu0 %v4425_v4  ;;  %3568 = vmatprep.mubr.msk.f32.mxu0 %vm4214_vm4, %v4215_v14 }
 0x7b1   :  { %3975 = vmatprep.subr.bf16.mxu0 %v4213_v20 }
 0x7b4   :  { %3977 = vmatpush3.bf16.msra.mxu0 %v4430_v13 }
 0x7b5   :  { %3984 = vmatprep.subr.bf16.mxu0 %v4213_v20 }
 0x813   :  { %v1030_v22 = vpop.permute.xlu0 %1029 }
 0x882   :  { %v3515_v1 = vpop.f32.mrb[8].mxu0 }
 0x883   :  { %v4457_v6 = vadd.f32 %v3515_v1, %v2921_v60  ;;  %v929_v11 = vpop.f32.mrb[9].mxu0 }
 0x884   :  { %v4459_v15 = vadd.f32 %v2921_v60, %v929_v11 }
 0x886   :  { %v1021_v17 = vadd.f32 %v1018_v8, %v4459_v15 }
 0x888   :  { %v2923_v18 = vmul.f32 -1.442695, %v1021_v17 }
 0x88a   :  { %4085 = vpow2.f32 %v2923_v18 }
 0x894   :  { %v4086_v19 = vpop.eup %4085 }
 0x895   :  { %v1025_v21 = vadd.f32 1.0, %v4086_v19 }
 0x897   :  { %4087 = vrcp.f32 %v1025_v21 }
 0x8a1   :  { %v4088_v24 = vpop.eup %4087 }
 0x8a2   :  { %v1032_v25 = vmul.f32 %v4088_v24, %v1030_v22  ;;  %v1039_v31 = vsub.f32 1.0, %v4088_v24  ;;  %v1045_v33 = vmul.f32 0.0, %v4088_v24 }
 0x8a4   :  { %1034 = vrot.lane.b32.xlu1 %v1032_v25, %s4216_s1 }
 0x916   :  { %v1035_v27 = vpop.permute.xlu1 %1034 }
 0x917   :  { %v1037_v30 = vadd.f32 %v1035_v27, %v4459_v15 }
 0x919   :  { %4089 = vtanh.f32 %v1037_v30 }
 0x923   :  { %v4090_v28 = vpop.eup %4089 }
 0x924   :  { %1041 = vrot.lane.b32.xlu0 %v4090_v28, %s4217_s27 }
 0x996   :  { %v1042_v32 = vpop.permute.xlu0 %1041 }
 0x997   :  { %v1044_v34 = vmul.f32 %v1042_v32, %v1039_v31 }
 0x999   :  { %v1046_v41 = vadd.f32 %v1045_v33, %v1044_v34 }
 0x99b   :  { %1048 = vrot.lane.b32.xlu1 %v1046_v41, %s4217_s27  ;;  %v1151_v57 = vrot.slane %v1046_v41, 6 }
 0xa0d   :  { %v1049_v42 = vpop.permute.xlu1 %1048 }
 0xa0e   :  { %1052 = vst.msk [vmem:[#allocation2] sm:$0x3] %vm1051_vm7, %v1049_v42  ;;  %3536 = vmatmul.mubr.msk.f32.vlgmr.msra.gmra.mrb[10].mxu1 %vm947_vm8, %v1049_v42 }
 0xa0f   :  { %3962 = vmatpush3.bf16.msra.mxu1 %v4425_v4  ;;  %3546 = vmatprep.mubr.msk.f32.mxu1 %vm4214_vm4, %v4215_v14 }
 0xa10   :  { %3963 = vmatprep.subr.bf16.mxu1 %v4213_v20 }
 0xa13   :  { %3965 = vmatpush3.bf16.msra.mxu1 %v4430_v13 }
 0xa14   :  { %3966 = vmatprep.subr.bf16.mxu1 %v4213_v20 }
 0xae1   :  { %v1121_v45 = vpop.f32.mrb[10].mxu1 }
 0xae2   :  { %v1122_v46 = vadd.f32 %v4445_v52, %v1121_v45  ;;  %v3537_v47 = vpop.f32.mrb[11].mxu1 }
 0xae4   :  { %v1126_v49 = vrot.slane %v1122_v46, 6 }
 0xae6   :  { %1135 = vrot.lane.b32.xlu0 %v1126_v49, %s4216_s1  ;;  %v1128_v50 = vadd.f32 %v1126_v49, %v4459_v15 }
 0xae8   :  { %v2925_v7 = vmul.f32 -1.442695, %v1128_v50 }
 0xaea   :  { %4091 = vpow2.f32 %v2925_v7 }
 0xaf4   :  { %v4092_v8 = vpop.eup %4091 }
 0xaf5   :  { %v1132_v12 = vadd.f32 1.0, %v4092_v8 }
 0xaf7   :  { %4093 = vrcp.f32 %v1132_v12 }
 0xb01   :  { %v4094_v16 = vpop.eup %4093 }
 0xb02   :  { %v1145_v26 = vsub.f32 1.0, %v4094_v16  ;;  %v1153_v62 = vmul.f32 %v4094_v16, %v1151_v57 }
 0xb58   :  { %v1136_v51 = vpop.permute.xlu0 %1135 }
 0xb59   :  { %v1138_v53 = vmul.f32 %v4094_v16, %v1136_v51 }
 0xb5b   :  { %1140 = vrot.lane.b32.xlu1 %v1138_v53, %s4216_s1 }
 0xbcd   :  { %v1141_v23 = vpop.permute.xlu1 %1140 }
 0xbce   :  { %v1143_v55 = vadd.f32 %v1141_v23, %v4459_v15 }
 0xbd0   :  { %4095 = vtanh.f32 %v1143_v55 }
 0xbda   :  { %v4096_v56 = vpop.eup %4095 }
 0xbdb   :  { %1147 = vrot.lane.b32.xlu0 %v4096_v56, %s4217_s27 }
 0xc4d   :  { %v1148_v29 = vpop.permute.xlu0 %1147 }
 0xc4e   :  { %v1150_v61 = vmul.f32 %v1148_v29, %v1145_v26 }
 0xc50   :  { %v4480_v63 = vadd.f32 %v1153_v62, %v1150_v61 }
 0xc52   :  { %v1161_v2 = vrot.slane %v4480_v63, 2  ;;  %v1262_v33 = vrot.slane %v4480_v63, 6 }
 0xc54   :  { %1162 = vrot.lane.b32.xlu1 %v1161_v2, %s4217_s27 }
 0xcc6   :  { %v1163_v5 = vpop.permute.xlu1 %1162 }
 0xcc7   :  { %3547 = vmatmul.mubr.msk.f32.vlgmr.msra.gmra.mrb[12].mxu1 %vm947_vm8, %v1163_v5 }
 0xcc8   :  { %3968 = vmatpush3.bf16.msra.mxu1 %v4425_v4  ;;  %3557 = vmatprep.mubr.msk.f32.mxu1 %vm4214_vm4, %v4215_v14 }
 0xcc9   :  { %3969 = vmatprep.subr.bf16.mxu1 %v4213_v20 }
 0xccc   :  { %3971 = vmatpush3.bf16.msra.mxu1 %v4430_v13 }
 0xccd   :  { %3978 = vmatprep.subr.bf16.mxu1 %v4213_v20 }
 0xd9a   :  { %v1232_v60 = vpop.f32.mrb[12].mxu1 }
 0xd9b   :  { %v1233_v1 = vadd.f32 %v4445_v52, %v1232_v60  ;;  %v3548_v11 = vpop.f32.mrb[13].mxu1 }
 0xd9d   :  { %v1237_v17 = vrot.slane %v1233_v1, 4 }
 0xd9f   :  { %1246 = vrot.lane.b32.xlu0 %v1237_v17, %s4216_s1  ;;  %v1239_v18 = vadd.f32 %v1237_v17, %v4459_v15 }
 0xda1   :  { %v2927_v19 = vmul.f32 -1.442695, %v1239_v18 }
 0xda3   :  { %4097 = vpow2.f32 %v2927_v19 }
 0xdad   :  { %v4098_v21 = vpop.eup %4097 }
 0xdae   :  { %v1243_v22 = vadd.f32 1.0, %v4098_v21 }
 0xdb0   :  { %4099 = vrcp.f32 %v1243_v22 }
 0xdba   :  { %v4100_v24 = vpop.eup %4099 }
 0xdbb   :  { %v1256_v32 = vsub.f32 1.0, %v4100_v24  ;;  %v1264_v41 = vmul.f32 %v4100_v24, %v1262_v33 }
 0xe11   :  { %v1247_v25 = vpop.permute.xlu0 %1246 }
 0xe12   :  { %v1249_v27 = vmul.f32 %v4100_v24, %v1247_v25 }
 0xe14   :  { %1251 = vrot.lane.b32.xlu1 %v1249_v27, %s4216_s1 }
 0xe86   :  { %v1252_v30 = vpop.permute.xlu1 %1251 }
 0xe87   :  { %v1254_v28 = vadd.f32 %v1252_v30, %v4459_v15 }
 0xe89   :  { %4101 = vtanh.f32 %v1254_v28 }
 0xe93   :  { %v4102_v31 = vpop.eup %4101 }
 0xe94   :  { %1258 = vrot.lane.b32.xlu0 %v4102_v31, %s4217_s27 }
 0xf06   :  { %v1259_v34 = vpop.permute.xlu0 %1258 }
 0xf07   :  { %v1261_v42 = vmul.f32 %v1259_v34, %v1256_v32 }
 0xf09   :  { %v4498_v45 = vadd.f32 %v1264_v41, %v1261_v42 }
 0xf0b   :  { %v1272_v46 = vrot.slane %v4498_v45, 4  ;;  %v1373_v62 = vrot.slane %v4498_v45, 6 }
 0xf0d   :  { %1273 = vrot.lane.b32.xlu1 %v1272_v46, %s4217_s27 }
 0xf7f   :  { %v1274_v47 = vpop.permute.xlu1 %1273 }
 0xf80   :  { %3558 = vmatmul.mubr.msk.f32.vlgmr.msra.gmra.mrb[14].mxu1 %vm947_vm8, %v1274_v47 }
 0xf81   :  { %3980 = vmatpush3.bf16.msra.mxu1 %v4425_v4  ;;  %3579 = vmatprep.mubr.msk.f32.mxu1 %vm4214_vm4, %v4215_v14 }
 0xf82   :  { %3981 = vmatprep.subr.bf16.mxu1 %v4213_v20 }
 0xf85   :  { %3983 = vmatpush3.bf16.msra.mxu1 %v4430_v13 }
 0xf86   :  { %3990 = vmatprep.subr.bf16.mxu1 %v4213_v20 }
0x1053   :  { %v1343_v49 = vpop.f32.mrb[14].mxu1 }
0x1054   :  { %v1344_v50 = vadd.f32 %v4445_v52, %v1343_v49  ;;  %v3559_v7 = vpop.f32.mrb[15].mxu1 }
0x1056   :  { %v1348_v8 = vrot.slane %v1344_v50, 2 }
0x1058   :  { %1357 = vrot.lane.b32.xlu0 %v1348_v8, %s4216_s1  ;;  %v1350_v12 = vadd.f32 %v1348_v8, %v4459_v15 }
0x105a   :  { %v2929_v16 = vmul.f32 -1.442695, %v1350_v12 }
0x105c   :  { %4103 = vpow2.f32 %v2929_v16 }
0x1066   :  { %v4104_v51 = vpop.eup %4103 }
0x1067   :  { %v1354_v53 = vadd.f32 1.0, %v4104_v51 }
0x1069   :  { %4105 = vrcp.f32 %v1354_v53 }
0x1073   :  { %v4106_v23 = vpop.eup %4105 }
0x1074   :  { %v1367_v61 = vsub.f32 1.0, %v4106_v23  ;;  %v1375_v5 = vmul.f32 %v4106_v23, %v1373_v62 }
0x10ca   :  { %v1358_v55 = vpop.permute.xlu0 %1357 }
0x10cb   :  { %v1360_v56 = vmul.f32 %v4106_v23, %v1358_v55 }
0x10cd   :  { %1362 = vrot.lane.b32.xlu1 %v1360_v56, %s4216_s1 }
0x113f   :  { %v1363_v57 = vpop.permute.xlu1 %1362 }
0x1140   :  { %v1365_v26 = vadd.f32 %v1363_v57, %v4459_v15 }
0x1142   :  { %4107 = vtanh.f32 %v1365_v26 }
0x114c   :  { %v4108_v29 = vpop.eup %4107 }
0x114d   :  { %1369 = vrot.lane.b32.xlu0 %v4108_v29, %s4217_s27 }
0x11bf   :  { %v1370_v2 = vpop.permute.xlu0 %1369 }
0x11c0   :  { %v1372_v60 = vmul.f32 %v1370_v2, %v1367_v61 }
0x11c2   :  { %v4516_v1 = vadd.f32 %v1375_v5, %v1372_v60 }
0x11c4   :  { %v1383_v11 = vrot.slane %v4516_v1, 6 }
0x11c6   :  { %1384 = vrot.lane.b32.xlu1 %v1383_v11, %s4217_s27 }
0x1238   :  { %v1385_v17 = vpop.permute.xlu1 %1384 }
0x1239   :  { %3569 = vmatmul.mubr.msk.f32.vlgmr.msra.gmra.mrb[10].mxu0 %vm947_vm8, %v1385_v17 }
0x123a   :  { %3986 = vmatpush3.bf16.msra.mxu0 %v4425_v4  ;;  %3590 = vmatprep.mubr.msk.f32.mxu0 %vm4214_vm4, %v4215_v14 }
0x123b   :  { %3987 = vmatprep.subr.bf16.mxu0 %v4213_v20 }
0x123e   :  { %3989 = vmatpush3.bf16.msra.mxu0 %v4430_v13 }
0x130c   :  { %v1454_v15 = vpop.f32.mrb[10].mxu0 }
0x130d   :  { %v1455_v18 = vadd.f32 %v4445_v52, %v1454_v15  ;;  %v3570_v19 = vpop.f32.mrb[11].mxu0 }
0x130f   :  { %1466 = vrot.lane.b32.xlu0 %v1455_v18, %s4216_s1  ;;  %v1458_v21 = vadd.f32 %v1455_v18, %v4457_v6 }
0x1311   :  { %v2931_v22 = vmul.f32 -1.442695, %v1458_v21 }
0x1313   :  { %4109 = vpow2.f32 %v2931_v22 }
0x131d   :  { %v4110_v24 = vpop.eup %4109 }
0x131e   :  { %v1462_v25 = vadd.f32 1.0, %v4110_v24 }
0x1320   :  { %4111 = vrcp.f32 %v1462_v25 }
0x132a   :  { %v4112_v27 = vpop.eup %4111 }
0x132b   :  { %v1476_v34 = vsub.f32 1.0, %v4112_v27  ;;  %v1483_v42 = vmul.f32 %v4112_v27, %v1383_v11 }
0x1381   :  { %v1467_v30 = vpop.permute.xlu0 %1466 }
0x1382   :  { %v1469_v28 = vmul.f32 %v4112_v27, %v1467_v30 }
0x1384   :  { %1471 = vrot.lane.b32.xlu1 %v1469_v28, %s4216_s1 }
0x13f6   :  { %v1472_v31 = vpop.permute.xlu1 %1471 }
0x13f7   :  { %v1474_v32 = vadd.f32 %v1472_v31, %v4457_v6 }
0x13f9   :  { %4113 = vtanh.f32 %v1474_v32 }
0x1403   :  { %v4114_v33 = vpop.eup %4113 }
0x1404   :  { %1478 = vrot.lane.b32.xlu0 %v4114_v33, %s4217_s27 }
0x1476   :  { %v1479_v41 = vpop.permute.xlu0 %1478 }
0x1477   :  { %v1481_v46 = vmul.f32 %v1479_v41, %v1476_v34 }
0x1479   :  { %v1484_v47 = vadd.f32 %v1483_v42, %v1481_v46 }
0x147b   :  { %1486 = vrot.lane.b32.xlu1 %v1484_v47, %s4217_s27  ;;  %v1588_v26 = vrot.slane %v1484_v47, 6 }
0x14ed   :  { %v1487_v49 = vpop.permute.xlu1 %1486 }
0x14ee   :  { %1489 = vst.msk [vmem:[#allocation2 + $0x8] sm:$0x3] %vm1051_vm7, %v1487_v49  ;;  %3580 = vmatmul.mubr.msk.f32.vlgmr.msra.gmra.mrb[16].mxu1 %vm947_vm8, %v1487_v49 }
0x14ef   :  { %3992 = vmatpush3.bf16.msra.mxu1 %v4425_v4  ;;  %3601 = vmatprep.mubr.msk.f32.mxu1 %vm4214_vm4, %v4215_v14 }
0x14f0   :  { %3993 = vmatprep.subr.bf16.mxu1 %v4213_v20 }
0x14f3   :  { %3995 = vmatpush3.bf16.msra.mxu1 %v4430_v13 }
0x15c1   :  { %v1558_v50 = vpop.f32.mrb[16].mxu1 }
0x15c2   :  { %v1559_v7 = vadd.f32 %v4445_v52, %v1558_v50  ;;  %v3581_v8 = vpop.f32.mrb[17].mxu1 }
0x15c4   :  { %v1563_v12 = vrot.slane %v1559_v7, 6 }
0x15c6   :  { %1572 = vrot.lane.b32.xlu0 %v1563_v12, %s4216_s1  ;;  %v1565_v16 = vadd.f32 %v1563_v12, %v4457_v6 }
0x15c8   :  { %v2933_v51 = vmul.f32 -1.442695, %v1565_v16 }
0x15ca   :  { %4115 = vpow2.f32 %v2933_v51 }
0x15d4   :  { %v4116_v53 = vpop.eup %4115 }
0x15d5   :  { %v1569_v4 = vadd.f32 1.0, %v4116_v53 }
0x15d7   :  { %4117 = vrcp.f32 %v1569_v4 }
0x15e1   :  { %v4118_v23 = vpop.eup %4117 }
0x15e2   :  { %v1582_v29 = vsub.f32 1.0, %v4118_v23  ;;  %v1590_v62 = vmul.f32 %v4118_v23, %v1588_v26 }
0x1638   :  { %v1573_v55 = vpop.permute.xlu0 %1572 }
0x1639   :  { %v1575_v56 = vmul.f32 %v4118_v23, %v1573_v55 }
0x163b   :  { %1577 = vrot.lane.b32.xlu1 %v1575_v56, %s4216_s1 }
0x16ad   :  { %v1578_v20 = vpop.permute.xlu1 %1577 }
0x16ae   :  { %v1580_v13 = vadd.f32 %v1578_v20, %v4457_v6 }
0x16b0   :  { %4119 = vtanh.f32 %v1580_v13 }
0x16ba   :  { %v4120_v57 = vpop.eup %4119 }
0x16bb   :  { %1584 = vrot.lane.b32.xlu0 %v4120_v57, %s4217_s27 }
0x172d   :  { %v1585_v61 = vpop.permute.xlu0 %1584 }
0x172e   :  { %v1587_v2 = vmul.f32 %v1585_v61, %v1582_v29 }
0x1730   :  { %v4546_v5 = vadd.f32 %v1590_v62, %v1587_v2  ;;  %v1822_v2 = vld [vmem:[#allocation3 + $0x290] sm:$0xff] }
0x1732   :  { %v1597_v60 = vrot.slane %v4546_v5, 2  ;;  %v1698_v41 = vrot.slane %v4546_v5, 6 }
0x1734   :  { %1598 = vrot.lane.b32.xlu1 %v1597_v60, %s4217_s27  ;;  %v1823_v60 = vld [vmem:[#allocation3 + $0x298] sm:$0xff] }
0x17a6   :  { %v1599_v11 = vpop.permute.xlu1 %1598 }
0x17a7   :  { %3591 = vmatmul.mubr.msk.f32.vlgmr.msra.gmra.mrb[12].mxu0 %vm947_vm8, %v1599_v11  ;;  %v4000_v11 = vpack.c.bf16 %v1823_v60, %v1822_v2 }
0x187a   :  { %v1668_v17 = vpop.f32.mrb[12].mxu0 }
0x187b   :  { %v1669_v15 = vadd.f32 %v4445_v52, %v1668_v17  ;;  %v3592_v18 = vpop.f32.mrb[13].mxu0 }
0x187d   :  { %v1673_v19 = vrot.slane %v1669_v15, 4 }
0x187f   :  { %1682 = vrot.lane.b32.xlu0 %v1673_v19, %s4216_s1  ;;  %v1675_v21 = vadd.f32 %v1673_v19, %v4457_v6 }
0x1881   :  { %v2935_v22 = vmul.f32 -1.442695, %v1675_v21 }
0x1883   :  { %4121 = vpow2.f32 %v2935_v22 }
0x188d   :  { %v4122_v24 = vpop.eup %4121 }
0x188e   :  { %v1679_v25 = vadd.f32 1.0, %v4122_v24 }
0x1890   :  { %4123 = vrcp.f32 %v1679_v25 }
0x189a   :  { %v4124_v27 = vpop.eup %4123 }
0x189b   :  { %v1692_v34 = vsub.f32 1.0, %v4124_v27  ;;  %v1700_v46 = vmul.f32 %v4124_v27, %v1698_v41 }
0x18f1   :  { %v1683_v30 = vpop.permute.xlu0 %1682 }
0x18f2   :  { %v1685_v28 = vmul.f32 %v4124_v27, %v1683_v30  ;;  %v4181_v30 = vld [vmem:[#allocation3 + $0x2a0] sm:$0xf] }
0x18f4   :  { %1687 = vrot.lane.b32.xlu1 %v1685_v28, %s4216_s1  ;;  %v1827_v28 = vrot.slane %v4181_v30, %v4325_v39 }
0x1966   :  { %v1688_v31 = vpop.permute.xlu1 %1687 }
0x1967   :  { %v1690_v32 = vadd.f32 %v1688_v31, %v4457_v6  ;;  %v1914_v31 = vrot.slane %v4181_v30, %v4327_v40 }
0x1969   :  { %4125 = vtanh.f32 %v1690_v32  ;;  %v1829_v32 = vmul.f32 %v1827_v28, %v4315_v35  ;;  %v1916_v41 = vmul.f32 %v1914_v31, %v4329_v43 }
0x1973   :  { %v4126_v33 = vpop.eup %4125 }
0x1974   :  { %1694 = vrot.lane.b32.xlu0 %v4126_v33, %s4217_s27 }
0x19e6   :  { %v1695_v42 = vpop.permute.xlu0 %1694 }
0x19e7   :  { %v1697_v47 = vmul.f32 %v1695_v42, %v1692_v34  ;;  %v1828_v34 = vmul.f32 %v1827_v28, %v4317_v36 }
0x19e9   :  { %v1701_v49 = vadd.f32 %v1700_v46, %v1697_v47  ;;  %v1915_v47 = vmul.f32 %v1914_v31, %v4331_v44 }
0x19eb   :  { %v1707_v50 = vrot.slane %v1701_v49, 4  ;;  %v1808_v15 = vrot.slane %v1701_v49, 6 }
0x19ed   :  { %1708 = vrot.lane.b32.xlu1 %v1707_v50, %s4217_s27  ;;  %v1924_v50 = vmul.f32 %v4335_v48, %v4344_v59 }
0x1a5f   :  { %v1709_v7 = vpop.permute.xlu1 %1708 }
0x1a60   :  { %3602 = vmatmul.mubr.msk.f32.vlgmr.msra.gmra.mrb[18].mxu1 %vm947_vm8, %v1709_v7 }
0x1b33   :  { %v1778_v8 = vpop.f32.mrb[18].mxu1 }
0x1b34   :  { %v1779_v12 = vadd.f32 %v4445_v52, %v1778_v8  ;;  %v3603_v16 = vpop.f32.mrb[19].mxu1 }
0x1b36   :  { %v1783_v51 = vrot.slane %v1779_v12, 2  ;;  %v1932_v12 = vmul.f32 %v4342_v58, %v4352_v10 }
0x1b38   :  { %1792 = vrot.lane.b32.xlu0 %v1783_v51, %s4216_s1  ;;  %v1785_v53 = vadd.f32 %v1783_v51, %v4457_v6  ;;  %v2940_v51 = vld [vmem:[#allocation3 + $0x2a8] ss:$0 sm:$0xff] }
0x1b3a   :  { %v2937_v4 = vmul.f32 -1.442695, %v1785_v53 }
0x1b3c   :  { %4127 = vpow2.f32 %v2937_v4 }
0x1b46   :  { %v4128_v23 = vpop.eup %4127 }
0x1b47   :  { %v1789_v55 = vadd.f32 1.0, %v4128_v23 }
0x1b49   :  { %4129 = vrcp.f32 %v1789_v55 }
0x1b53   :  { %v4130_v56 = vpop.eup %4129 }
0x1b54   :  { %v1802_v17 = vsub.f32 1.0, %v4130_v56  ;;  %v1810_v19 = vmul.f32 %v4130_v56, %v1808_v15  ;;  %v2941_v15 = vld [vmem:[#allocation3 + $0x2b0] ss:$0 sm:$0xff] }
0x1baa   :  { %v1793_v20 = vpop.permute.xlu0 %1792 }
0x1bab   :  { %v1795_v13 = vmul.f32 %v4130_v56, %v1793_v20 }
0x1bad   :  { %1797 = vrot.lane.b32.xlu1 %v1795_v13, %s4216_s1 }
0x1bb1   :  { %1156 = vrot.lane.b32.xlu1 %v4480_v63, %s4217_s27 }
0x1bb5   :  { %1378 = vrot.lane.b32.xlu1 %v4516_v1, %s4217_s27  ;;  %v1821_v1 = vld [vmem:[#allocation3 + $0x288] sm:$0xff] }
0x1bb9   :  { %1703 = vrot.lane.b32.xlu1 %v1701_v49, %s4217_s27 }
0x1c1f   :  { %v1798_v52 = vpop.permute.xlu1 %1797 }
0x1c20   :  { %v1800_v57 = vadd.f32 %v1798_v52, %v4457_v6  ;;  %v1820_v6 = vld [vmem:[#allocation3 + $0x280] sm:$0xff] }
0x1c21   :  { %v3996_v62 = vpack.c.bf16 %v1821_v1, %v1820_v6  ;;  %v1989_v52 = vld [vmem:[#allocation3 + $0x2c0] sm:$0xff] }
0x1c22   :  { %4131 = vtanh.f32 %v1800_v57  ;;  %v1990_v57 = vld [vmem:[#allocation3 + $0x2c8] sm:$0xff] }
0x1c23   :  { %v1157_v26 = vpop.permute.xlu1 %1156  ;;  %3997 = vmatprep.subr.bf16.mxu0 %v3996_v62 }
0x1c24   :  { %1160 = vst.msk [vmem:[#allocation2] sm:$0xc] %vm1159_vm9, %v1157_v26  ;;  %3999 = vmatpush3.bf16.msra.mxu0 %v3996_v62  ;;  %v1991_v26 = vld [vmem:[#allocation3 + $0x2d0] sm:$0xff] }
0x1c25   :  { %4001 = vmatprep.subr.bf16.mxu0 %v4000_v11 }
0x1c27   :  { %v1379_v29 = vpop.permute.xlu1 %1378 }
0x1c28   :  { %1382 = vst.msk [vmem:[#allocation2] sm:$0xc0] %vm1381_vm10, %v1379_v29  ;;  %4003 = vmatpush3.bf16.msra.mxu0 %v4000_v11  ;;  %v4004_v29 = vpack.c.bf16 %v1990_v57, %v1989_v52 }
0x1c2a   :  { %4005 = vmatprep.subr.bf16.mxu1 %v4004_v29 }
0x1c2b   :  { %v1704_v61 = vpop.permute.xlu1 %1703  ;;  %4007 = vmatpush3.bf16.msra.mxu1 %v4004_v29 }
0x1c2c   :  { %v4132_v63 = vpop.eup %4131  ;;  %1706 = vst.msk [vmem:[#allocation2 + $0x8] sm:$0x30] %vm1270_vm11, %v1704_v61  ;;  %v1992_v61 = vld [vmem:[#allocation3 + $0x2d8] sm:$0xff] }
0x1c2d   :  { %1804 = vrot.lane.b32.xlu0 %v4132_v63, %s4217_s27  ;;  %v4008_v63 = vpack.c.bf16 %v1992_v61, %v1991_v26  ;;  %v2947_v26 = vld [vmem:[#allocation3 + $0x2f0] ss:$0 sm:$0xff] }
0x1c2f   :  { %4009 = vmatprep.subr.bf16.mxu1 %v4008_v63 }
0x1c30   :  { %4011 = vmatpush3.bf16.msra.mxu1 %v4008_v63 }
0x1c31   :  { %1267 = vrot.lane.b32.xlu0 %v4498_v45, %s4217_s27 }
0x1c35   :  { %1593 = vrot.lane.b32.xlu0 %v4546_v5, %s4217_s27 }
0x1c9f   :  { %v1805_v18 = vpop.permute.xlu0 %1804 }
0x1ca0   :  { %v1807_v21 = vmul.f32 %v1805_v18, %v1802_v17 }
0x1ca2   :  { %v1811_v22 = vadd.f32 %v1810_v19, %v1807_v21  ;;  %v2942_v21 = vld [vmem:[#allocation3 + $0x2b8] ss:$0 sm:$0xff] }
0x1ca3   :  { %v1268_v45 = vpop.permute.xlu0 %1267 }
0x1ca4   :  { %1271 = vst.msk [vmem:[#allocation2] sm:$0x30] %vm1270_vm11, %v1268_v45  ;;  %1813 = vrot.lane.b32.xlu0 %v1811_v22, %s4217_s27 }
0x1ca7   :  { %v1594_v5 = vpop.permute.xlu0 %1593 }
0x1ca8   :  { %1596 = vst.msk [vmem:[#allocation2 + $0x8] sm:$0xc] %vm1159_vm9, %v1594_v5 }
0x1cab   :  { %v1817_v24 = vld [vmem:[#allocation2] sm:$0xff] }
0x1cac   :  { %3612 = vmatprep.mubr.msk.f32.mxu0 %vm947_vm8, %v1817_v24 }
0x1d16   :  { %v1814_v25 = vpop.permute.xlu0 %1813 }
0x1d17   :  { %1816 = vst.msk [vmem:[#allocation2 + $0x8] sm:$0xc0] %vm1381_vm10, %v1814_v25 }
0x1d1e   :  { %v1818_v27 = vld [vmem:[#allocation2 + $0x8] sm:$0xff] }
0x1d1f   :  { %3613 = vmatmul.mubr.msk.f32.vlgmr.msra.gmra.mrb[14].mxu0 %vm947_vm8, %v1818_v27 }
0x1df2   :  { %v3614_v33 = vpop.f32.mrb[14].mxu0 }
0x1df3   :  { %v1908_v42 = vadd.f32 %v3614_v33, %v1829_v32  ;;  %v1902_v46 = vpop.f32.mrb[15].mxu0  ;;  %v2943_v32 = vld [vmem:[#allocation3 + $0x2e0] ss:$0 sm:$0xff] }
0x1df4   :  { %v1903_v49 = vadd.f32 %v1902_v46, %v1828_v34 }
0x1df5   :  { %v1918_v7 = vadd.f32 %v1916_v41, %v1908_v42 }
0x1df6   :  { %v1917_v8 = vadd.f32 %v1915_v47, %v1903_v49 }
0x1df7   :  { %v1926_v16 = vadd.f32 %v1924_v50, %v1918_v7 }
0x1df8   :  { %v1925_v35 = vadd.f32 %v4340_v54, %v1917_v8 }
0x1df9   :  { %v1934_v36 = vadd.f32 %v1932_v12, %v1926_v16 }
0x1dfa   :  { %v1933_v43 = vadd.f32 %v4350_v3, %v1925_v35 }
0x1dfb   :  { %v1941_v53 = vadd.f32 %v2940_v51, %v1934_v36 }
0x1dfc   :  { %v1940_v4 = vadd.f32 %v2940_v51, %v1933_v43 }
0x1dfd   :  { %v1947_v44 = vsel %vm947_vm8, %v1941_v53, 0.0 }
0x1dfe   :  { %1948 = vadd.xlane.f32.xlu0 %v1947_v44  ;;  %v1944_v23 = vsel %vm947_vm8, %v1940_v4, 0.0  ;;  %v2127_v44 = vld [vmem:[#allocation3 + $0x308] sm:$0xff] }
0x1dff   :  { %1945 = vadd.xlane.f32.xlu1 %v1944_v23 }
0x1e8b   :  { %v1949_v48 = vpop.xlane.xlu0 %1948 }
0x1e8c   :  { %v1952_v59 = vmul.f32 0.03125, %v1949_v48  ;;  %v1946_v55 = vpop.xlane.xlu1 %1945  ;;  %v2128_v48 = vld [vmem:[#allocation3 + $0x310] sm:$0xff] }
0x1e8d   :  { %v1951_v56 = vmul.f32 0.03125, %v1946_v55 }
0x1e8e   :  { %v1954_v58 = vsub.f32 %v1941_v53, %v1952_v59  ;;  %v2125_v53 = vld [vmem:[#allocation3 + $0x2f8] sm:$0xff]  ;;  %v4016_v59 = vpack.c.bf16 %v2128_v48, %v2127_v44  ;;  %v2951_v44 = vld [vmem:[#allocation3 + $0x320] ss:$0 sm:$0xff] }
0x1e8f   :  { %v1953_v10 = vsub.f32 %v1940_v4, %v1951_v56  ;;  %v2126_v4 = vld [vmem:[#allocation3 + $0x300] sm:$0xff] }
0x1e90   :  { %v1956_v20 = vmul.f32 %v1954_v58, %v1954_v58  ;;  %v4012_v23 = vpack.c.bf16 %v2126_v4, %v2125_v53 }
0x1e91   :  { %v1955_v54 = vmul.f32 %v1953_v10, %v1953_v10 }
0x1e92   :  { %v1960_v13 = vsel %vm947_vm8, %v1956_v20, 0.0  ;;  %4013 = vmatprep.subr.bf16.mxu0 %v4012_v23 }
0x1e93   :  { %1961 = vadd.xlane.f32.xlu1 %v1960_v13  ;;  %v1957_v3 = vsel %vm947_vm8, %v1955_v54, 0.0  ;;  %4015 = vmatpush3.bf16.msra.mxu0 %v4012_v23 }
0x1e94   :  { %1958 = vadd.xlane.f32.xlu0 %v1957_v3  ;;  %4017 = vmatprep.subr.bf16.mxu0 %v4016_v59  ;;  %v2946_v3 = vld [vmem:[#allocation3 + $0x2e8] ss:$0 sm:$0xff] }
0x1e97   :  { %4019 = vmatpush3.bf16.msra.mxu0 %v4016_v59  ;;  %v2952_v59 = vld [vmem:[#allocation3 + $0x328] ss:$0 sm:$0xff] }
0x1e98   :  { %3648 = vmatprep.subr.mxu0 %v4215_v14 }
0x1f20   :  { %v1962_v6 = vpop.xlane.xlu1 %1961 }
0x1f21   :  { %v1964_v1 = vmul.f32 0.03125, %v1962_v6  ;;  %v1959_v62 = vpop.xlane.xlu0 %1958 }
0x1f22   :  { %v1963_v2 = vmul.f32 0.03125, %v1959_v62 }
0x1f23   :  { %v1966_v60 = vadd.f32 1e-05, %v1964_v1 }
0x1f24   :  { %v1965_v11 = vadd.f32 1e-05, %v1963_v2 }
0x1f25   :  { %4133 = vrsqrt.f32 %v1966_v60 }
0x1f26   :  { %4135 = vrsqrt.f32 %v1965_v11 }
0x1f2f   :  { %v4134_v17 = vpop.eup %4133 }
0x1f30   :  { %v4136_v18 = vpop.eup %4135  ;;  %v1970_v19 = vmul.f32 %v4134_v17, %v1954_v58  ;;  %v2948_v17 = vld [vmem:[#allocation3 + $0x318] ss:$0 sm:$0xff] }
0x1f31   :  { %v1969_v22 = vmul.f32 %v4136_v18, %v1953_v10 }
0x1f32   :  { %v1976_v45 = vmul.f32 %v2941_v15, %v1970_v19 }
0x1f33   :  { %v1975_v5 = vmul.f32 %v2941_v15, %v1969_v22 }
0x1f34   :  { %v1982_v24 = vadd.f32 %v2942_v21, %v1976_v45 }
0x1f35   :  { %v1981_v25 = vadd.f32 %v2942_v21, %v1975_v5 }
0x1f36   :  { %v1986_v27 = vmul.f32 0.01, %v1982_v24  ;;  %vm1984_vm13 = vcmp.ge.f32.partialorder %v1982_v24, 0.0 }
0x1f37   :  { %vm1983_vm12 = vcmp.ge.f32.partialorder %v1981_v25, 0.0  ;;  %v1985_v30 = vmul.f32 0.01, %v1981_v25 }
0x1f38   :  { %v1988_v31 = vsel %vm1984_vm13, %v1982_v24, %v1986_v27 }
0x1f39   :  { %v1987_v28 = vsel %vm1983_vm12, %v1981_v25, %v1985_v30 }
0x1f3a   :  { %3623 = vmatprep.mubr.msk.f32.mxu1 %vm947_vm8, %v1987_v28 }
0x1f3b   :  { %3624 = vmatmul.mubr.msk.f32.vlgmr.msra.gmra.mrb[20].mxu1 %vm947_vm8, %v1988_v31 }
0x200e   :  { %v3625_v33 = vpop.f32.mrb[20].mxu1 }
0x200f   :  { %v2076_v34 = vadd.f32 %v3625_v33, %v2943_v32  ;;  %v2070_v41 = vpop.f32.mrb[21].mxu1 }
0x2010   :  { %v2071_v42 = vadd.f32 %v2943_v32, %v2070_v41  ;;  %v2420_v41 = vsel %vm2418_vm0, 1.0, %v4215_v14 }
0x2011   :  { %v2084_v46 = vsel %vm947_vm8, %v2076_v34, 0.0 }
0x2012   :  { %2085 = vadd.xlane.f32.xlu1 %v2084_v46  ;;  %v2081_v47 = vsel %vm947_vm8, %v2071_v42, 0.0  ;;  %v2419_v46 = vsel %vm2417_vm1, 1.0, %v4215_v14 }
0x2013   :  { %2082 = vadd.xlane.f32.xlu0 %v2081_v47  ;;  %v2421_v47 = vadd.f32 0.0001, %v2419_v46 }
0x209f   :  { %v2086_v49 = vpop.xlane.xlu1 %2085 }
0x20a0   :  { %v2088_v50 = vmul.f32 0.03125, %v2086_v49  ;;  %v2083_v7 = vpop.xlane.xlu0 %2082  ;;  %v2261_v49 = vld [vmem:[#allocation3 + $0x330] sm:$0xff] }
0x20a1   :  { %v2087_v8 = vmul.f32 0.03125, %v2083_v7  ;;  %v2263_v7 = vld [vmem:[#allocation3 + $0x340] sm:$0xff] }
0x20a2   :  { %v2090_v12 = vsub.f32 %v2076_v34, %v2088_v50  ;;  %v2262_v50 = vld [vmem:[#allocation3 + $0x338] sm:$0xff] }
0x20a3   :  { %v2089_v16 = vsub.f32 %v2071_v42, %v2087_v8  ;;  %v2422_v42 = vadd.f32 0.0001, %v2420_v41  ;;  %v4020_v8 = vpack.c.bf16 %v2262_v50, %v2261_v49 }
0x20a4   :  { %v2092_v35 = vmul.f32 %v2090_v12, %v2090_v12 }
0x20a5   :  { %v2091_v51 = vmul.f32 %v2089_v16, %v2089_v16  ;;  %4021 = vmatprep.subr.bf16.mxu1 %v4020_v8 }
0x20a6   :  { %v2096_v36 = vsel %vm947_vm8, %v2092_v35, 0.0  ;;  %4023 = vmatpush3.bf16.msra.mxu1 %v4020_v8 }
0x20a7   :  { %2097 = vadd.xlane.f32.xlu1 %v2096_v36  ;;  %v2093_v43 = vsel %vm947_vm8, %v2091_v51, 0.0 }
0x20a8   :  { %2094 = vadd.xlane.f32.xlu0 %v2093_v43 }
0x2134   :  { %v2098_v55 = vpop.xlane.xlu1 %2097 }
0x2135   :  { %v2100_v56 = vmul.f32 0.03125, %v2098_v55  ;;  %v2095_v58 = vpop.xlane.xlu0 %2094 }
0x2136   :  { %v2099_v10 = vmul.f32 0.03125, %v2095_v58 }
0x2137   :  { %v2102_v20 = vadd.f32 1e-05, %v2100_v56 }
0x2138   :  { %v2101_v54 = vadd.f32 1e-05, %v2099_v10 }
0x2139   :  { %4137 = vrsqrt.f32 %v2102_v20 }
0x213a   :  { %4139 = vrsqrt.f32 %v2101_v54 }
0x2143   :  { %v4138_v13 = vpop.eup %4137 }
0x2144   :  { %v4140_v52 = vpop.eup %4139  ;;  %v2106_v57 = vmul.f32 %v4138_v13, %v2090_v12  ;;  %v2264_v12 = vld [vmem:[#allocation3 + $0x348] sm:$0xff] }
0x2145   :  { %v2105_v29 = vmul.f32 %v4140_v52, %v2089_v16  ;;  %v4024_v16 = vpack.c.bf16 %v2264_v12, %v2263_v7 }
0x2146   :  { %v2112_v61 = vmul.f32 %v2946_v3, %v2106_v57  ;;  %v2953_v57 = vld [vmem:[#allocation3 + $0x350] ss:$0 sm:$0xff] }
0x2147   :  { %v2111_v63 = vmul.f32 %v2946_v3, %v2105_v29  ;;  %4025 = vmatprep.subr.bf16.mxu1 %v4024_v16 }
0x2148   :  { %v2118_v6 = vadd.f32 %v2947_v26, %v2112_v61  ;;  %4027 = vmatpush3.bf16.msra.mxu1 %v4024_v16 }
0x2149   :  { %v2117_v1 = vadd.f32 %v2947_v26, %v2111_v63 }
0x214a   :  { %v2122_v62 = vmul.f32 0.01, %v2118_v6  ;;  %vm2120_vm15 = vcmp.ge.f32.partialorder %v2118_v6, 0.0 }
0x214b   :  { %vm2119_vm14 = vcmp.ge.f32.partialorder %v2117_v1, 0.0  ;;  %v2121_v2 = vmul.f32 0.01, %v2117_v1 }
0x214c   :  { %v2124_v11 = vsel %vm2120_vm15, %v2118_v6, %v2122_v62 }
0x214d   :  { %v2123_v60 = vsel %vm2119_vm14, %v2117_v1, %v2121_v2 }
0x214e   :  { %3634 = vmatprep.mubr.msk.f32.mxu0 %vm947_vm8, %v2123_v60 }
0x214f   :  { %3635 = vmatmul.mubr.msk.f32.vlgmr.msra.gmra.mrb[16].mxu0 %vm947_vm8, %v2124_v11 }
0x2150   :  { %3650 = vmatprep.mubr.msk.f32.mxu0 %vm4214_vm4, %v4215_v14  ;;  %3649 = vmatpush3.msra.mxu0 %v2464_v37 }
0x2153   :  { %3651 = vmatmul.mubr.msk.f32.vlgmr.msra.gmra.mrb[18].mxu0 %vm2441_vm2, %v27_v38 }
0x2222   :  { %v3636_v15 = vpop.f32.mrb[16].mxu0 }
0x2223   :  { %v2212_v18 = vadd.f32 %v3636_v15, %v2948_v17  ;;  %v2206_v19 = vpop.f32.mrb[17].mxu0 }
0x2224   :  { %v2207_v21 = vadd.f32 %v2948_v17, %v2206_v19 }
0x2225   :  { %v2220_v22 = vsel %vm947_vm8, %v2212_v18, 0.0 }
0x2226   :  { %2221 = vadd.xlane.f32.xlu1 %v2220_v22  ;;  %v2217_v45 = vsel %vm947_vm8, %v2207_v21, 0.0 }
0x2227   :  { %2218 = vadd.xlane.f32.xlu0 %v2217_v45 }
0x22b3   :  { %v2222_v5 = vpop.xlane.xlu1 %2221 }
0x22b4   :  { %v2224_v24 = vmul.f32 0.03125, %v2222_v5  ;;  %v2219_v25 = vpop.xlane.xlu0 %2218 }
0x22b5   :  { %v2223_v27 = vmul.f32 0.03125, %v2219_v25 }
0x22b6   :  { %v2226_v30 = vsub.f32 %v2212_v18, %v2224_v24 }
0x22b7   :  { %v2225_v28 = vsub.f32 %v2207_v21, %v2223_v27 }
0x22b8   :  { %v2228_v31 = vmul.f32 %v2226_v30, %v2226_v30 }
0x22b9   :  { %v2227_v32 = vmul.f32 %v2225_v28, %v2225_v28 }
0x22ba   :  { %v2232_v33 = vsel %vm947_vm8, %v2228_v31, 0.0 }
0x22bb   :  { %2233 = vadd.xlane.f32.xlu1 %v2232_v33  ;;  %v2229_v34 = vsel %vm947_vm8, %v2227_v32, 0.0 }
0x22bc   :  { %2230 = vadd.xlane.f32.xlu0 %v2229_v34 }
0x22cc   :  { %2427 = vrot.lane.b32.xlu1 %v2422_v42, %s4218_s28 }
0x22d2   :  { %2425 = vrot.lane.b32.xlu0 %v2421_v47, %s4218_s28 }
0x2348   :  { %v2234_v14 = vpop.xlane.xlu1 %2233 }
0x2349   :  { %v2236_v35 = vmul.f32 0.03125, %v2234_v14  ;;  %v2231_v51 = vpop.xlane.xlu0 %2230 }
0x234a   :  { %v2235_v36 = vmul.f32 0.03125, %v2231_v51 }
0x234b   :  { %v2238_v43 = vadd.f32 1e-05, %v2236_v35 }
0x234c   :  { %v2237_v53 = vadd.f32 1e-05, %v2235_v36 }
0x234d   :  { %4141 = vrsqrt.f32 %v2238_v43 }
0x234e   :  { %4143 = vrsqrt.f32 %v2237_v53 }
0x2357   :  { %v4142_v4 = vpop.eup %4141 }
0x2358   :  { %v4144_v23 = vpop.eup %4143  ;;  %v2242_v48 = vmul.f32 %v4142_v4, %v2226_v30 }
0x2359   :  { %v2241_v55 = vmul.f32 %v4144_v23, %v2225_v28 }
0x235a   :  { %v2248_v56 = vmul.f32 %v2951_v44, %v2242_v48 }
0x235b   :  { %v2247_v58 = vmul.f32 %v2951_v44, %v2241_v55 }
0x235c   :  { %v2254_v10 = vadd.f32 %v2952_v59, %v2248_v56 }
0x235d   :  { %v2253_v20 = vadd.f32 %v2952_v59, %v2247_v58 }
0x235e   :  { %v2258_v54 = vmul.f32 0.01, %v2254_v10  ;;  %vm2256_vm4 = vcmp.ge.f32.partialorder %v2254_v10, 0.0 }
0x235f   :  { %vm2255_vm3 = vcmp.ge.f32.partialorder %v2253_v20, 0.0  ;;  %v2257_v13 = vmul.f32 0.01, %v2253_v20 }
0x2360   :  { %v2260_v52 = vsel %vm2256_vm4, %v2254_v10, %v2258_v54 }
0x2361   :  { %v2259_v3 = vsel %vm2255_vm3, %v2253_v20, %v2257_v13 }
0x2362   :  { %3645 = vmatprep.mubr.msk.f32.mxu1 %vm947_vm8, %v2259_v3 }
0x2363   :  { %3646 = vmatmul.mubr.msk.f32.vlgmr.msra.gmra.mrb[22].mxu1 %vm947_vm8, %v2260_v52  ;;  %v2428_v52 = vpop.permute.xlu1 %2427 }
0x2436   :  { %v3647_v26 = vpop.f32.mrb[22].mxu1 }
0x2437   :  { %v2348_v29 = vadd.f32 %v3647_v26, %v2953_v57  ;;  %v2342_v61 = vpop.f32.mrb[23].mxu1 }
0x2438   :  { %v2343_v63 = vadd.f32 %v2953_v57, %v2342_v61 }
0x2439   :  { %v2957_v6 = vadd.f32 -5.0, %v2348_v29  ;;  %v2386_v1 = vand.u32 2147483647, %v2348_v29  ;;  %v2384_v42 = vmin.f32 %v2348_v29, 0.0  ;;  %v2426_v29 = vpop.permute.xlu0 %2425 }
0x243a   :  { %v2956_v62 = vadd.f32 -5.0, %v2343_v63  ;;  %v2385_v2 = vand.u32 2147483647, %v2343_v63  ;;  %v2383_v49 = vmin.f32 %v2343_v63, 0.0 }
0x243b   :  { %v2356_v60 = vand.u32 2147483647, %v2957_v6  ;;  %v2388_v11 = vsub.f32 0.0, %v2386_v1  ;;  %v2354_v8 = vmin.f32 %v2957_v6, 0.0 }
0x243c   :  { %v2355_v17 = vand.u32 2147483647, %v2956_v62  ;;  %v2387_v15 = vsub.f32 0.0, %v2385_v2  ;;  %v2353_v37 = vmin.f32 %v2956_v62, 0.0  ;;  %v2539_v62 = vld [vmem:[#allocation3 + $0x368] sm:$0xff]  ;;  %v2538_v2 = vld [vmem:[#allocation3 + $0x360] sm:$0xff] }
0x243d   :  { %v2358_v18 = vsub.f32 0.0, %v2356_v60  ;;  %v2391_v19 = vmul.f32 1.442695, %v2388_v11  ;;  %v2534_v60 = vpop.f32.mrb[18].mxu0 }
0x243e   :  { %v2357_v21 = vsub.f32 0.0, %v2355_v17  ;;  %v2389_v22 = vmul.f32 1.442695, %v2387_v15  ;;  %v3652_v11 = vpop.f32.mrb[19].mxu0 }
0x243f   :  { %v2361_v45 = vmul.f32 1.442695, %v2358_v18  ;;  %4145 = vpow2.f32 %v2391_v19 }
0x2440   :  { %v2359_v5 = vmul.f32 1.442695, %v2357_v21  ;;  %4147 = vpow2.f32 %v2389_v22  ;;  %v2553_v22 = vrot.slane %v2534_v60, %v4325_v39 }
0x2441   :  { %4149 = vpow2.f32 %v2361_v45  ;;  %v2567_v45 = vrot.slane %v2534_v60, %v4327_v40 }
0x2442   :  { %4151 = vpow2.f32 %v2359_v5 }
0x2449   :  { %v4146_v24 = vpop.eup %4145 }
0x244a   :  { %v4148_v25 = vpop.eup %4147  ;;  %v2394_v27 = vadd.f32 1.0, %v4146_v24 }
0x244b   :  { %v4150_v30 = vpop.eup %4149  ;;  %v2393_v28 = vadd.f32 1.0, %v4148_v25 }
0x244c   :  { %v4152_v31 = vpop.eup %4151  ;;  %v2364_v32 = vadd.f32 1.0, %v4150_v30  ;;  %4153 = vlog2.f32 %v2394_v27 }
0x244d   :  { %v2363_v33 = vadd.f32 1.0, %v4152_v31  ;;  %4155 = vlog2.f32 %v2393_v28 }
0x244e   :  { %4157 = vlog2.f32 %v2364_v32 }
0x244f   :  { %4159 = vlog2.f32 %v2363_v33 }
0x2456   :  { %v4154_v34 = vpop.eup %4153 }
0x2457   :  { %v4156_v41 = vpop.eup %4155  ;;  %v2398_v46 = vmul.f32 0.6931472, %v4154_v34 }
0x2458   :  { %v4158_v47 = vpop.eup %4157  ;;  %v2396_v50 = vmul.f32 0.6931472, %v4156_v41 }
0x2459   :  { %v4160_v7 = vpop.eup %4159  ;;  %v2368_v12 = vmul.f32 0.6931472, %v4158_v47  ;;  %v2400_v16 = vsub.f32 %v2384_v42, %v2398_v46 }
0x245a   :  { %v2366_v38 = vmul.f32 0.6931472, %v4160_v7  ;;  %v2399_v14 = vsub.f32 %v2383_v49, %v2396_v50 }
0x245b   :  { %v2370_v35 = vsub.f32 %v2354_v8, %v2368_v12  ;;  %v2402_v51 = vmul.f32 2.3025851, %v2400_v16 }
0x245c   :  { %v2369_v36 = vsub.f32 %v2353_v37, %v2366_v38  ;;  %v2401_v43 = vmul.f32 2.3025851, %v2399_v14 }
0x245d   :  { %v2372_v53 = vmul.f32 2.3025851, %v2370_v35  ;;  %v2405_v4 = vmul.f32 1.442695, %v2402_v51  ;;  %v4220_v35 = vmov 683565275  }
0x245e   :  { %v2371_v44 = vmul.f32 2.3025851, %v2369_v36  ;;  %v2403_v23 = vmul.f32 1.442695, %v2401_v43  ;;  %v4221_v36 = vmov 2475754826  }
0x245f   :  { %v2375_v48 = vmul.f32 1.442695, %v2372_v53  ;;  %4161 = vpow2.f32 %v2405_v4  ;;  %v4222_v53 = vmov 2131351028  }
0x2460   :  { %v2373_v59 = vmul.f32 1.442695, %v2371_v44  ;;  %4163 = vpow2.f32 %v2403_v23  ;;  %v4223_v44 = vmov 2102212464  }
0x2461   :  { %4165 = vpow2.f32 %v2375_v48  ;;  %v4224_v48 = vmov 920167782  }
0x2462   :  { %4167 = vpow2.f32 %v2373_v59 }
0x2469   :  { %v4162_v55 = vpop.eup %4161 }
0x246a   :  { %v4164_v56 = vpop.eup %4163  ;;  %v2408_v58 = vmul.f32 2.0, %v4162_v55 }
0x246b   :  { %v4166_v10 = vpop.eup %4165  ;;  %v2407_v20 = vmul.f32 2.0, %v4164_v56 }
0x246c   :  { %v4168_v54 = vpop.eup %4167  ;;  %v2378_v13 = vmul.f32 2.0, %v4166_v10  ;;  %v2410_v3 = vadd.f32 1e-07, %v2408_v58 }
0x246d   :  { %v2377_v57 = vmul.f32 2.0, %v4168_v54  ;;  %v2409_v26 = vadd.f32 1e-07, %v2407_v20 }
0x246e   :  { %v2380_v61 = vadd.f32 1e-07, %v2378_v13  ;;  %v4625_v63 = vmul.f32 %v2428_v52, %v2410_v3  ;;  %v4225_v13 = vmov 1326507024  }
0x246f   :  { %v2379_v6 = vadd.f32 1e-07, %v2377_v57  ;;  %v4627_v1 = vmul.f32 %v2426_v29, %v2409_v26 }
0x2470   :  { %2382 = vst [vmem:[%s4724_s2 + $0x8] sm:$0xff] %v2380_v61  ;;  %2437 = vrot.lane.b32.xlu0 %v4625_v63, %s4219_s4 }
0x2471   :  { %2381 = vst [vmem:[%s4724_s2] sm:$0xff] %v2379_v6  ;;  %2435 = vrot.lane.b32.xlu1 %v4627_v1, %s4219_s4 }
0x2474   :  { %2547 = vperm.xlu0 %4069, %v2539_v62  }
0x2475   :  { %2542 = vperm.xlu1 %4068, %v2538_v2  }
0x2479   :  { %4070 = vset.pattern.permute.xlu1 %v4210_v9 }
0x247a   :  { %2557 = vperm.xlu1 %4070, %v2538_v2  }
0x247e   :  { %2561 = vperm.xlu1 %4070, %v2539_v62  }
0x2482   :  { %4071 = vset.pattern.permute.xlu1 %v4209_v0 }
0x24e2   :  { %v2438_v17 = vpop.permute.xlu0 %2437 }
0x24e3   :  { %v2436_v15 = vpop.permute.xlu1 %2435  ;;  %v2445_v18 = vsel %vm2441_vm2, %v2438_v17, 0.0 }
0x24e4   :  { %2446 = vadd.xlane.f32.xlu1 %v2445_v18  ;;  %v2442_v19 = vsel %vm2441_vm2, %v2436_v15, 0.0 }
0x24e5   :  { %2443 = vadd.xlane.f32.xlu0 %v2442_v19 }
0x24f3   :  { %v2548_v25 = vpop.permute.xlu0 %2547 }
0x24f4   :  { %v2543_v21 = vpop.permute.xlu1 %2542  ;;  %v2555_v30 = vmul.f32 %v2553_v22, %v2548_v25 }
0x24f5   :  { %2459 = vperm.xlu1 %4071, %v2410_v3   ;;  %v2554_v5 = vmul.f32 %v2553_v22, %v2543_v21 }
0x24f9   :  { %v2558_v24 = vpop.permute.xlu1 %2557 }
0x24fa   :  { %v2568_v27 = vmul.f32 %v2567_v45, %v2558_v24 }
0x24fb   :  { %2454 = vperm.xlu0 %4069, %v2409_v26  }
0x24fc   :  { %v4645_v0 = vadd.f32 %v2568_v27, %v2554_v5 }
0x24fd   :  { %v2562_v28 = vpop.permute.xlu1 %2561 }
0x24fe   :  { %v2572_v31 = vand.u32 2147483647, %v4645_v0  ;;  %v2575_v32 = vand.u32 2139095040, %v4645_v0  ;;  %v2569_v33 = vmul.f32 %v2567_v45, %v2562_v28  ;;  %vm2574_vm4 = vcmp.lt.s32.totalorder %v4645_v0, 0 }
0x24ff   :  { %4072 = vset.pattern.permute.xlu0 %v4210_v9 }
0x2500   :  { %v2576_v39 = vshrl.u32 %v2575_v32, 23  ;;  %v4650_v34 = vadd.f32 %v2569_v33, %v2555_v30  ;;  %v2579_v40 = vand.u32 8388607, %v2572_v31 }
0x2502   :  { %v2959_v41 = vadd.s32 4294967169, %v2576_v39  ;;  %v2676_v42 = vand.u32 2147483647, %v4650_v34  ;;  %v2679_v46 = vand.u32 2139095040, %v4650_v34  ;;  %v2580_v49 = vor.u32 8388608, %v2579_v40 }
0x2504   :  { %v2582_v47 = vadd.s32 1, %v2959_v41  ;;  %v2680_v50 = vshrl.u32 %v2679_v46, 23  ;;  %v2683_v9 = vand.u32 8388607, %v2676_v42  ;;  %v4658_v37 = vshll.u32 %v2580_v49, 8 }
0x2506   :  { %vm2583_vm5 = vcmp.gt.s32.totalorder %v2582_v47, 0  ;;  %v2963_v8 = vadd.s32 4294967169, %v2680_v50  ;;  %v2684_v55 = vor.u32 8388608, %v2683_v9 }
0x2507   :  { %v2584_v7 = vsel %vm2583_vm5, %v2582_v47, 0  ;;  %vm2573_vm5 = vcmp.le.f32.partialorder %v2572_v31, 0.7853982 }
0x2508   :  { %v2585_v12 = vshrl.u32 %v2584_v7, 5  ;;  %v2586_v16 = vand.u32 31, %v2584_v7  ;;  %v2686_v38 = vadd.s32 1, %v2963_v8  ;;  %v2724_v27 = vshll.u32 %v2684_v55, 8 }
0x250a   :  { %v2587_v14 = vsub.s32 32, %v2586_v16  ;;  %v2589_v51 = vshll.u32 %v4220_v35, %v2586_v16  ;;  %v2592_v43 = vshll.u32 %v4221_v36, %v2586_v16  ;;  %v2595_v4 = vshll.u32 %v4222_v53, %v2586_v16 }
0x250b   :  { %v2598_v23 = vshll.u32 %v4223_v44, %v2586_v16  ;;  %v2601_v59 = vshll.u32 %v4224_v48, %v2586_v16  ;;  %vm2604_vm6 = vcmp.lt.s32.totalorder %v2585_v12, 1  ;;  %vm2605_vm7 = vcmp.lt.s32.totalorder %v2585_v12, 2 }
0x250c   :  { %v2588_v56 = vshrl.u32 %v4220_v35, %v2587_v14  ;;  %v2590_v58 = vshrl.u32 %v4221_v36, %v2587_v14  ;;  %v2593_v10 = vshrl.u32 %v4222_v53, %v2587_v14  ;;  %v2596_v20 = vshrl.u32 %v4223_v44, %v2587_v14 }
0x250d   :  { %v2599_v54 = vshrl.u32 %v4224_v48, %v2587_v14  ;;  %v2602_v3 = vshrl.u32 %v4225_v13, %v2587_v14  ;;  %vm2607_vm8 = vcmp.lt.s32.totalorder %v2585_v12, 4  ;;  %vm2687_vm9 = vcmp.gt.s32.totalorder %v2686_v38, 0 }
0x250e   :  { %v2591_v52 = vor.u32 %v2590_v58, %v2589_v51  ;;  %v2594_v57 = vor.u32 %v2593_v10, %v2592_v43  ;;  %v2597_v26 = vor.u32 %v2596_v20, %v2595_v4  ;;  %vm2606_vm10 = vcmp.lt.s32.totalorder %v2585_v12, 3 }
0x250f   :  { %v2600_v29 = vor.u32 %v2599_v54, %v2598_v23  ;;  %v2603_v61 = vor.u32 %v2602_v3, %v2601_v59  ;;  %v2688_v6 = vsel %vm2687_vm9, %v2686_v38, 0 }
0x2510   :  { %v2608_v62 = vsel %vm2604_vm6, %v2588_v56, %v2591_v52  ;;  %v2609_v2 = vsel %vm2607_vm8, %v2597_v26, 2102212464  ;;  %v2612_v60 = vsel %vm2604_vm6, %v2591_v52, %v2594_v57  ;;  %v2616_v11 = vsel %vm2604_vm6, %v2594_v57, %v2597_v26 }
0x2511   :  { %v2610_v17 = vsel %vm2606_vm10, %v2594_v57, %v2609_v2  ;;  %v2613_v15 = vsel %vm2607_vm8, %v2600_v29, 920167782  ;;  %v2617_v18 = vsel %vm2607_vm8, %v2603_v61, 1326507024  ;;  %v2689_v22 = vshrl.u32 %v2688_v6, 5 }
0x2512   :  { %v2614_v19 = vsel %vm2606_vm10, %v2597_v26, %v2613_v15  ;;  %v2618_v21 = vsel %vm2606_vm10, %v2600_v29, %v2617_v18  ;;  %v2690_v45 = vand.u32 31, %v2688_v6  ;;  %v2611_v5 = vsel %vm2605_vm7, %v2608_v62, %v2610_v17 }
0x2513   :  { %v2615_v24 = vsel %vm2605_vm7, %v2612_v60, %v2614_v19  ;;  %v2619_v25 = vsel %vm2605_vm7, %v2616_v11, %v2618_v21  ;;  %v2627_v47 = vmul.u32 %v4658_v37, %v2611_v5  ;;  %vm2708_vm11 = vcmp.lt.s32.totalorder %v2689_v22, 1 }
0x2514   :  { %v4667_v30 = vmul.u32.u64.low %v4658_v37, %v2619_v25  ;;  %v4668_v28 = vmul.u32.u64.high %v4658_v37, %v2619_v25, %v4667_v30  ;;  %v4671_v32 = vmul.u32.u64.low %v4658_v37, %v2615_v24  ;;  %v4672_v33 = vmul.u32.u64.high %v4658_v37, %v2615_v24, %v4671_v32 }
0x2515   :  { %v2691_v39 = vsub.s32 32, %v2690_v45  ;;  %v2693_v40 = vshll.u32 %v4220_v35, %v2690_v45  ;;  %v2696_v41 = vshll.u32 %v4221_v36, %v2690_v45  ;;  %v2699_v46 = vshll.u32 %v4222_v53, %v2690_v45 }
0x2516   :  { %v2702_v49 = vshll.u32 %v4223_v44, %v2690_v45  ;;  %v2705_v50 = vshll.u32 %v4224_v48, %v2690_v45  ;;  %vm2629_vm12 = vc.u32 %v4668_v28, %v4671_v32  ;;  %v2630_v16 = vadd.s32 1, %v4672_v33 }
0x2517   :  { %v2692_v7 = vshrl.u32 %v4220_v35, %v2691_v39  ;;  %v2694_v8 = vshrl.u32 %v4221_v36, %v2691_v39  ;;  %v2697_v9 = vshrl.u32 %v4222_v53, %v2691_v39  ;;  %v2700_v12 = vshrl.u32 %v4223_v44, %v2691_v39 }
0x2518   :  { %v2703_v38 = vshrl.u32 %v4224_v48, %v2691_v39  ;;  %vm2709_vm13 = vcmp.lt.s32.totalorder %v2689_v22, 2  ;;  %v2706_v4 = vshrl.u32 %v4225_v13, %v2691_v39  ;;  %v2631_v23 = vsel %vm2629_vm12, %v2630_v16, %v4672_v33 }
0x2519   :  { %v2695_v14 = vor.u32 %v2694_v8, %v2693_v40  ;;  %v2698_v51 = vor.u32 %v2697_v9, %v2696_v41  ;;  %v2701_v43 = vor.u32 %v2700_v12, %v2699_v46  ;;  %vm2710_vm14 = vcmp.lt.s32.totalorder %v2689_v22, 3 }
0x251a   :  { %v2704_v37 = vor.u32 %v2703_v38, %v2702_v49  ;;  %vm2711_vm15 = vcmp.lt.s32.totalorder %v2689_v22, 4  ;;  %v2632_v59 = vadd.s32 %v2631_v23, %v2627_v47  ;;  %v2707_v35 = vor.u32 %v2706_v4, %v2705_v50 }
0x251b   :  { %v2712_v36 = vsel %vm2708_vm11, %v2692_v7, %v2695_v14  ;;  %v2713_v53 = vsel %vm2711_vm15, %v2701_v43, 2102212464  ;;  %v2716_v55 = vsel %vm2708_vm11, %v2695_v14, %v2698_v51  ;;  %v2720_v48 = vsel %vm2708_vm11, %v2698_v51, %v2701_v43 }
0x251c   :  { %v2714_v44 = vsel %vm2710_vm14, %v2698_v51, %v2713_v53  ;;  %v2717_v56 = vsel %vm2711_vm15, %v2704_v37, 920167782  ;;  %v2633_v58 = vadd.s32 536870912, %v2632_v59  ;;  %v2721_v20 = vsel %vm2711_vm15, %v2707_v35, 1326507024 }
0x251d   :  { %v2718_v10 = vsel %vm2710_vm14, %v2701_v43, %v2717_v56  ;;  %v2715_v54 = vsel %vm2709_vm13, %v2712_v36, %v2714_v44  ;;  %v2722_v3 = vsel %vm2710_vm14, %v2704_v37, %v2721_v20  ;;  %v2628_v25 = vadd.s32 %v4671_v32, %v4668_v28 }
0x251e   :  { %v2719_v13 = vsel %vm2709_vm13, %v2716_v55, %v2718_v10  ;;  %v2634_v52 = vshrl.u32 %v2633_v58, 30  ;;  %v2723_v57 = vsel %vm2709_vm13, %v2720_v48, %v2722_v3  ;;  %v2731_v2 = vmul.u32 %v2724_v27, %v2715_v54 }
0x251f   :  { %v4684_v26 = vmul.u32.u64.low %v2724_v27, %v2719_v13  ;;  %v4685_v29 = vmul.u32.u64.high %v2724_v27, %v2719_v13, %v4684_v26  ;;  %v4687_v61 = vmul.u32.u64.low %v2724_v27, %v2723_v57  ;;  %v4688_v6 = vmul.u32.u64.high %v2724_v27, %v2723_v57, %v4687_v61 }
0x2520   :  { %v2635_v62 = vshll.u32 %v2634_v52, 30  ;;  %v2658_v51 = vsub.s32 4, %v2634_v52  ;;  %vm2678_vm6 = vcmp.lt.s32.totalorder %v4650_v34, 0  ;;  %vm4702_vm7 = vcmp.le.f32.partialorder %v2676_v42, 0.7853982 }
0x2521   :  { %v2734_v11 = vadd.s32 1, %v4685_v29  ;;  %vm2733_vm0 = vc.u32 %v4688_v6, %v4684_v26  ;;  %v2732_v14 = vadd.s32 %v4684_v26, %v4688_v6  ;;  %vm2664_vm11 = vweird.f32 %v4645_v0 }
0x2522   :  { %v2636_v60 = vsub.s32 %v2632_v59, %v2635_v62  ;;  %v2659_v53 = vsel %vm2574_vm4, %v2658_v51, %v2634_v52  ;;  %vm2768_vm15 = vweird.f32 %v4650_v34 }
0x2523   :  { %v2735_v15 = vsel %vm2733_vm0, %v2734_v11, %v4685_v29  ;;  %v2661_v10 = vsel %vm2573_vm5, 0, %v2659_v53  ;;  %vm2800_vm0 = vcmask 130048  }
0x2524   :  { %v2638_v17 = vsub.s32 0, %v2636_v60  ;;  %v2736_v18 = vadd.s32 %v2735_v15, %v2731_v2  ;;  %v2665_v54 = vadd.s32 3, %v2661_v10 }
0x2526   :  { %v2960_v19 = vmin.u32 %v2638_v17, %v2636_v60  ;;  %v2737_v21 = vadd.s32 536870912, %v2736_v18  ;;  %v2666_v57 = vand.u32 3, %v2665_v54 }
0x2528   :  { %v2640_v22 = vclz %v2960_v19  ;;  %v2738_v45 = vshrl.u32 %v2737_v21, 30  ;;  %vm2671_vm8 = vcmp.eq.s32.totalorder %v2666_v57, 2  ;;  %vm2668_vm9 = vcmp.eq.s32.totalorder %v2666_v57, 0 }
0x2529   :  { %vm2667_vm10 = vcmp.lt.s32.totalorder %v2666_v57, 2 }
0x252a   :  { %v2961_v5 = vadd.s32 4294967294, %v2640_v22  ;;  %v2739_v24 = vshll.u32 %v2738_v45, 30  ;;  %v2762_v3 = vsub.s32 4, %v2738_v45 }
0x252c   :  { %vm2962_vm1 = vcmp.lt.s32.totalorder %v2961_v5, 0  ;;  %v2740_v27 = vsub.s32 %v2736_v18, %v2739_v24  ;;  %v2763_v29 = vsel %vm2678_vm6, %v2762_v3, %v2738_v45 }
0x252d   :  { %v2643_v30 = vsel %vm2962_vm1, 0, %v2961_v5  ;;  %v2765_v11 = vsel %vm4702_vm7, 0, %v2763_v29 }
0x252e   :  { %v2644_v33 = vsub.s32 32, %v2643_v30  ;;  %v2645_v39 = vshll.u32 %v2636_v60, %v2643_v30  ;;  %v2648_v40 = vsub.s32 4294967266, %v2643_v30  ;;  %v2742_v41 = vsub.s32 0, %v2740_v27 }
0x252f   :  { %v2769_v18 = vadd.s32 3, %v2765_v11 }
0x2530   :  { %v2646_v46 = vshrl.u32 %v2628_v25, %v2644_v33  ;;  %v2649_v47 = vadd.s32 127, %v2648_v40  ;;  %v2964_v49 = vmin.u32 %v2742_v41, %v2740_v27 }
0x2531   :  { %v2770_v21 = vand.u32 3, %v2769_v18 }
0x2532   :  { %v2647_v50 = vor.u32 %v2646_v46, %v2645_v39  ;;  %v2650_v7 = vshll.u32 %v2649_v47, 23  ;;  %v2744_v8 = vclz %v2964_v49 }
0x2533   :  { %vm2775_vm12 = vcmp.eq.s32.totalorder %v2770_v21, 2  ;;  %vm2772_vm13 = vcmp.eq.s32.totalorder %v2770_v21, 0  ;;  %vm2771_vm14 = vcmp.lt.s32.totalorder %v2770_v21, 2 }
0x2534   :  { %v2651_v9 = vor.u32 4788187, %v2650_v7  ;;  %v2654_v12 = vcvt.s32.f32 %v2647_v50  ;;  %v2965_v16 = vadd.s32 4294967294, %v2744_v8 }
0x2536   :  { %v2652_v38 = vand.u32 2147483647, %v2651_v9  ;;  %vm2966_vm3 = vcmp.lt.s32.totalorder %v2965_v16, 0  ;;  %v2780_v9 = vld [vmem:[#allocation3 + $0x370] sm:$0xff] }
0x2537   :  { %v2747_v32 = vsel %vm2966_vm3, 0, %v2965_v16 }
0x2538   :  { %v2655_v28 = vmul.f32 %v2654_v12, %v2652_v38  ;;  %v2748_v43 = vsub.s32 32, %v2747_v32  ;;  %v2749_v4 = vshll.u32 %v2740_v27, %v2747_v32  ;;  %v2752_v23 = vsub.s32 4294967266, %v2747_v32 }
0x253a   :  { %v2656_v37 = vxor.u32 2147483648, %v2655_v28  ;;  %v2750_v59 = vshrl.u32 %v2732_v14, %v2748_v43  ;;  %v2753_v35 = vadd.s32 127, %v2752_v23  ;;  %v2781_v14 = vld [vmem:[#allocation3 + $0x378] sm:$0xff]  ;;  %v2883_v43 = vld [vmem:[#allocation3 + $0x388] sm:$0xff]  ;;  %v2882_v23 = vld [vmem:[#allocation3 + $0x380] sm:$0xff] }
0x253c   :  { %v2657_v36 = vsel %vm2574_vm4, %v2656_v37, %v2655_v28  ;;  %v2751_v44 = vor.u32 %v2750_v59, %v2749_v4  ;;  %v2754_v55 = vshll.u32 %v2753_v35, 23  ;;  %v2894_v4 = vld [vmem:[#allocation3 + $0x398] sm:$0xff]  ;;  %v2893_v37 = vld [vmem:[#allocation3 + $0x390] sm:$0xff] }
0x253d   :  { %v2660_v56 = vsel %vm2573_vm5, %v4645_v0, %v2657_v36 }
0x253e   :  { %4169 = vcosq.f32 %v2660_v56  ;;  %v2755_v48 = vor.u32 4788187, %v2754_v55  ;;  %v2758_v58 = vcvt.s32.f32 %v2751_v44 }
0x253f   :  { %4171 = vsinq.f32 %v2660_v56 }
0x2540   :  { %v2756_v20 = vand.u32 2147483647, %v2755_v48 }
0x2542   :  { %v2759_v13 = vmul.f32 %v2758_v58, %v2756_v20 }
0x2544   :  { %v2760_v31 = vxor.u32 2147483648, %v2759_v13 }
0x2546   :  { %v2761_v26 = vsel %vm2678_vm6, %v2760_v31, %v2759_v13 }
0x2547   :  { %v2764_v6 = vsel %vm4702_vm7, %v4650_v34, %v2761_v26 }
0x2548   :  { %v4170_v61 = vpop.eup %4169  ;;  %4173 = vcosq.f32 %v2764_v6 }
0x2549   :  { %v4172_v62 = vpop.eup %4171  ;;  %v2672_v2 = vxor.u32 2147483648, %v4170_v61  ;;  %4175 = vsinq.f32 %v2764_v6 }
0x254a   :  { %v2669_v60 = vxor.u32 2147483648, %v4172_v62 }
0x254b   :  { %v2673_v42 = vsel %vm2671_vm8, %v2672_v2, %v4172_v62 }
0x254c   :  { %v2670_v17 = vsel %vm2668_vm9, %v4170_v61, %v2669_v60 }
0x254d   :  { %v2674_v15 = vsel %vm2667_vm10, %v2670_v17, %v2673_v42 }
0x254e   :  { %v2675_v19 = vsel %vm2664_vm11, nan, %v2674_v15 }
0x2552   :  { %v4174_v22 = vpop.eup %4173 }
0x2553   :  { %v4176_v45 = vpop.eup %4175  ;;  %v2776_v5 = vxor.u32 2147483648, %v4174_v22 }
0x2554   :  { %v2773_v24 = vxor.u32 2147483648, %v4176_v45 }
0x2555   :  { %v2777_v25 = vsel %vm2775_vm12, %v2776_v5, %v4176_v45 }
0x2556   :  { %v2774_v30 = vsel %vm2772_vm13, %v4174_v22, %v2773_v24 }
0x2557   :  { %v2778_v27 = vsel %vm2771_vm14, %v2774_v30, %v2777_v25 }
0x2558   :  { %v2779_v33 = vsel %vm2768_vm15, nan, %v2778_v27 }
0x2559   :  { %v4028_v39 = vpack.c.bf16 %v2779_v33, %v2675_v19 }
0x255b   :  { %4029 = vmatprep.subr.bf16.mxu1 %v4028_v39 }
0x255c   :  { %4031 = vmatpush3.bf16.msra.mxu1 %v4028_v39 }
0x2571   :  { %v2447_v0 = vpop.xlane.xlu1 %2446 }
0x2572   :  { %4177 = vrcp.f32 %v2447_v0  ;;  %v2444_v40 = vpop.xlane.xlu0 %2443 }
0x2573   :  { %4179 = vrcp.f32 %v2444_v40 }
0x2575   :  { %v2460_v34 = vpop.permute.xlu1 %2459 }
0x257a   :  { %v2455_v49 = vpop.permute.xlu0 %2454 }
0x257c   :  { %v4178_v41 = vpop.eup %4177 }
0x257d   :  { %v4180_v46 = vpop.eup %4179  ;;  %v2451_v50 = vmul.f32 %v4178_v41, %v4625_v63 }
0x257e   :  { %v2450_v47 = vmul.f32 %v4180_v46, %v4627_v1 }
0x257f   :  { %v2463_v8 = vmul.f32 %v2460_v34, %v2451_v50 }
0x2580   :  { %v2462_v7 = vmul.f32 %v2455_v49, %v2450_v47 }
0x2582   :  { %2790 = vrot.lane.b32.xlu1 %v2462_v7, %s4226_s7  ;;  %2784 = vrot.lane.b32.xlu0 %v2462_v7, %s4219_s4 }
0x2586   :  { %2792 = vrot.lane.b32.xlu1 %v2463_v8, %s4226_s7  ;;  %2786 = vrot.lane.b32.xlu0 %v2463_v8, %s4219_s4 }
0x25f4   :  { %v2791_v12 = vpop.permute.xlu1 %2790  ;;  %v2785_v16 = vpop.permute.xlu0 %2784 }
0x25f5   :  { %v2796_v38 = vsel %vm2441_vm2, %v2785_v16, %v2791_v12 }
0x25f6   :  { %v2798_v1 = vmul.f32 %v2796_v38, %v2780_v9 }
0x25f8   :  { %v2793_v28 = vpop.permute.xlu1 %2792  ;;  %3657 = vmatprep.mubr.msk.f32.mxu1 %vm2800_vm0, %v2798_v1  ;;  %v2787_v63 = vpop.permute.xlu0 %2786 }
0x25f9   :  { %v2797_v32 = vsel %vm2441_vm2, %v2787_v63, %v2793_v28  ;;  %vm2904_vm2 = vcmask 1040384  }
0x25fa   :  { %v2799_v51 = vmul.f32 %v2797_v32, %v2781_v14 }
0x25fc   :  { %3658 = vmatmul.mubr.msk.f32.vlgmr.msra.gmra.mrb[24].mxu1 %vm2800_vm0, %v2799_v51 }
0x26cf   :  { %v3659_v59 = vpop.f32.mrb[24].mxu1 }
0x26d0   :  { %v2885_v35 = vmul.f32 %v3659_v59, %v2883_v43  ;;  %v2896_v36 = vmul.f32 %v3659_v59, %v2894_v4  ;;  %v2873_v53 = vpop.f32.mrb[25].mxu1 }
0x26d1   :  { %v2884_v44 = vmul.f32 %v2882_v23, %v2873_v53  ;;  %v2895_v55 = vmul.f32 %v2893_v37, %v2873_v53 }
0x26d3   :  { %v2886_v56 = vadd.f32 %v2885_v35, %v2884_v44  ;;  %v2897_v48 = vadd.f32 %v2896_v36, %v2895_v55 }
0x26d5   :  { %v2887_v58 = vrot.slane %v2886_v56, 4  ;;  %v2898_v10 = vrot.slane %v2897_v48, 4 }
0x26d7   :  { %v2888_v20 = vadd.f32 %v2887_v58, %v2886_v56  ;;  %v2899_v54 = vadd.f32 %v2898_v10, %v2897_v48 }
0x26d9   :  { %v2889_v13 = vrot.slane %v2888_v20, 2  ;;  %v2900_v3 = vrot.slane %v2899_v54, 2 }
0x26db   :  { %v2890_v31 = vadd.f32 %v2889_v13, %v2888_v20  ;;  %v2901_v52 = vadd.f32 %v2900_v3, %v2899_v54 }
0x26dd   :  { %v2891_v57 = vrot.slane %v2890_v31, 1  ;;  %v2902_v26 = vrot.slane %v2901_v52, 1 }
0x26df   :  { %v2892_v29 = vadd.f32 %v2891_v57, %v2890_v31  ;;  %v2903_v61 = vadd.f32 %v2902_v26, %v2901_v52 }
0x26e1   :  { %v2905_v6 = vsel %vm2904_vm2, %v2892_v29, %v2903_v61 }
0x26e2   :  { %2906 = vst [vmem:[%s4724_s2 + $0x10] sm:$0x3] %v2905_v6 }
0x26e3   :  { %2911 = vsyncpa [#allocation4], 1 }

// kernel: reverse.2
= control target key start
LH: loop header
LB: loop body
LE: loop exit
PB: predicated region body
PF: predicated region fallthrough
CT: control target
= control target key end

     0   :  { %v2_v0 = vlaneseq  ;;  %s105_s0 = inlined_call_operand.vmem [shape: f32[2,127], index: 0, kind: input, shape index: {}]   ;;  %s106_s1 = inlined_call_operand.vmem [shape: f32[2,127], index: 1, kind: output, shape index: {}]  }
   0x2   :  { %v3_v1 = vsub.s32 126, %v2_v0 }
   0x4   :  { %4 = vset.pattern.permute.xlu0 %v3_v1 }
   0x5   :  { %v20_v2 = vld [vmem:[%s105_s0] sm:$0x3] }
   0x6   :  { %21 = vst [vmem:[#allocation1] sm:$0x3] %v20_v2 }
   0xd   :  { %v38_v3 = vld [vmem:[#allocation1] sm:$0x3] }
   0xe   :  { %39 = vst [vmem:[#allocation0] sm:$0x3] %v38_v3 }
  0x15   :  { %v40_v4 = vld [vmem:[#allocation0] sm:$0xff] }
  0x16   :  { %41 = vperm.xlu0 %4, %v40_v4  }
  0x95   :  { %v42_v5 = vpop.permute.xlu0 %41 }
  0x96   :  { %43 = vst [vmem:[#allocation2] sm:$0xff] %v42_v5 }
  0x9d   :  { %v47_v6 = vld [vmem:[#allocation2] sm:$0x3] }
  0x9e   :  { %49 = vst [vmem:[#allocation3] sm:$0x3] %v47_v6 }
  0xa5   :  { %v65_v7 = vld [vmem:[#allocation3] sm:$0x3] }
  0xa6   :  { %66 = vst [vmem:[%s106_s1] sm:$0x3] %v65_v7 }

</bundles_post_ra>
